<compile_context>
chip_gen: v5e
topology: v5e:2x2
jax: 0.10.0
libtpu: 0.0.40
codegen_flags: <defaults>
</compile_context>

<pallas_src>
from functools import partial

import numpy as np
import jax
import jax.numpy as jnp
from jax.experimental import pallas as pl
from jax.experimental.pallas import tpu as pltpu

# ---------------------------------------------------------------------------
# Static geometry for 80x80 inputs (k=6/s=2 then k=6/s=4 -> 38x38 -> 9x9).
# ---------------------------------------------------------------------------
_R1 = 40      # conv1 output rows computed per image (38 valid, padded to 40)
_U1 = 42      # input half-row pairs per image (40 real + 2 zero-pad rows)
_K1 = 320     # conv1 matmul K: 80 cols * 2 in-ch * 2 row-phases
_C1 = 152     # conv1 output lanes: 38 cols * 4 channels
_C2 = 144     # conv2 output lanes:  9 cols * 16 channels
_OH2 = 9      # conv2 output rows


# ---------------------------------------------------------------------------
# Fused forward kernel: conv1 + conv2 + fc1 + fc2 + sigmoid (single launch).
# ---------------------------------------------------------------------------
def _policy_kernel(xb_ref, w1_ref, w2_ref, sel_ref, b2_ref, wfc1_hbm_ref,
                   b1_ref, wfc2_ref, bf2_ref, o_ref, wfc1_vmem, dma_sem, *,
                   n_batch):
    f32, bf16 = jnp.float32, jnp.bfloat16

    # Kick off the fc1-weight DMA (HBM -> VMEM scratch); it overlaps the whole
    # conv stack and is waited on right before fc1 consumes it.
    wfc1_cp = pltpu.make_async_copy(wfc1_hbm_ref, wfc1_vmem, dma_sem)
    wfc1_cp.start()

    # ---- conv1 (bias-free) + ReLU ------------------------------------------
    # 3 accumulated MXU matmuls, one per input half-row tap a in {0,1,2}:
    #   LHS (N*40, 320) lanes=(col, ci, row-phase), RHS (320, 152) lanes=(col_out, c1)
    m1 = n_batch * _R1
    acc1 = jnp.zeros((m1, _C1), f32)
    for a in range(3):
        acc1 = acc1 + jnp.dot(xb_ref[a], w1_ref[a], preferred_element_type=f32)
    h1 = jnp.maximum(acc1, 0.0).astype(bf16)          # (N*40, 152), rows (n, r)

    # ---- conv2 + bias + ReLU -----------------------------------------------
    # Stride-4 row access is a 0/1 selection matmul (selection commutes with
    # ReLU and copies bf16 values exactly), then 6 accumulated row-tap matmuls
    # with 144 output lanes = (ow2, c2).
    m2 = _OH2 * n_batch
    slab = jnp.dot(sel_ref[...], h1, preferred_element_type=f32).astype(bf16)  # (6*m2, 152)
    acc2 = jnp.zeros((m2, _C2), f32)
    for i2 in range(6):
        acc2 = acc2 + jnp.dot(slab[i2 * m2:(i2 + 1) * m2, :], w2_ref[i2],
                              preferred_element_type=f32)
    h2 = jnp.maximum(acc2 + b2_ref[...], 0.0).astype(bf16)   # (9N, 144), rows (oh2, n)

    # ---- fc1 + ReLU ----------------------------------------------------------
    # PyTorch NCHW flatten is absorbed into the init-time wfc1 repack; fc1 is
    # 9 accumulated (N, 144) x (144, 256) matmuls (256 lanes, no transposes).
    wfc1_cp.wait()
    accf = jnp.zeros((n_batch, 256), f32)
    for oh2 in range(_OH2):
        accf = accf + jnp.dot(h2[oh2 * n_batch:(oh2 + 1) * n_batch, :],
                              wfc1_vmem[oh2], preferred_element_type=f32)
    y1 = jnp.maximum(accf + b1_ref[...], 0.0)          # (N, 256) f32

    # ---- fc2 + sigmoid (lane reduction; avoids a 1-lane matmul) -------------
    z = jnp.sum(y1 * wfc2_ref[...], axis=1, keepdims=True) + bf2_ref[...]
    o_ref[...] = 1.0 / (1.0 + jnp.exp(-z))


# ---------------------------------------------------------------------------
# Wrapper: cheap input re-layout (layout plumbing only) + single pallas_call.
# ---------------------------------------------------------------------------
def _build_x(x):
    """(N,2,80,80) NCHW f32 -> (3, N*40, 320) bf16: per-tap pre-shifted LHS.

    Lane = col*4 + ci*2 + row_phase; row (n, r) of tap a holds input half-row
    pair r + a of image n (rows 40,41 are zero pads)."""
    n = x.shape[0]
    xt = jnp.transpose(x.astype(jnp.float32), (0, 2, 3, 1))     # (N, 80, 80, 2)
    xt = xt.reshape(n, _R1, 2, 80, 2)                            # (n, u, pi, t, ci)
    xt = jnp.transpose(xt, (0, 1, 3, 4, 2))                      # (n, u, t, ci, pi)
    xt = xt.reshape(n, _R1, _K1)
    xt = jnp.pad(xt, ((0, 0), (0, _U1 - _R1), (0, 0)))           # u: 40 -> 42
    taps = jnp.stack([xt[:, a:a + _R1, :] for a in range(3)], axis=0)
    return taps.reshape(3, n * _R1, _K1).astype(jnp.bfloat16)


def _selection_matrix(n):
    """(6*9*n, 40*n) 0/1 matrix: row (i2, oh2, b) picks conv1 row b*40+4*oh2+i2."""
    m2 = _OH2 * n
    s = np.zeros((6 * m2, _R1 * n), np.float32)
    for i2 in range(6):
        for oh2 in range(_OH2):
            for b in range(n):
                s[i2 * m2 + oh2 * n + b, b * _R1 + 4 * oh2 + i2] = 1.0
    return s


@jax.jit
def policy_forward(prepared, x):
    """x: (N, 2, 80, 80) float32 (NCHW) -> (N, 1) sigmoid probabilities."""
    n = x.shape[0]
    assert x.shape[1:] == (2, 80, 80), x.shape
    xb = _build_x(x)
    sel = jnp.asarray(_selection_matrix(n), jnp.bfloat16)
    args = (xb, prepared["w1"], prepared["w2"], sel, prepared["b2"],
            prepared["wfc1"], prepared["b1"], prepared["wfc2"], prepared["bf2"])
    vmem = pltpu.MemorySpace.VMEM
    in_specs = [pl.BlockSpec(memory_space=vmem) for _ in args]
    in_specs[5] = pl.BlockSpec(memory_space=pl.ANY)        # wfc1: manual DMA
    return pl.pallas_call(
        partial(_policy_kernel, n_batch=n),
        out_shape=jax.ShapeDtypeStruct((n, 1), jnp.float32),
        in_specs=in_specs,
        out_specs=pl.BlockSpec(memory_space=vmem),
        scratch_shapes=[pltpu.VMEM((_OH2, _C2, 256), jnp.bfloat16),
                        pltpu.SemaphoreType.DMA(())],
    )(*args)


# ---------------------------------------------------------------------------
# One-time weight re-layout (pre-transposed / widened at init, shipped bf16).
# ---------------------------------------------------------------------------
def prepare_params(p):
    # conv1: (320, 152) per row tap a; row = col*4 + ci*2 + row_phase,
    # output lane = out_col*4 + c1.
    w1 = np.asarray(p["conv1_w"], np.float32)                 # (4,2,6,6) OIHW
    W1 = np.zeros((3, 80, 2, 2, 38, 4), np.float32)           # [a, t, ci, pi, col, co]
    for a in range(3):
        for pi in range(2):
            kh = 2 * a + pi
            for kw in range(6):
                for col in range(38):
                    W1[a, 2 * col + kw, :, pi, col, :] = w1[:, :, kh, kw].T
    W1 = W1.reshape(3, _K1, _C1)

    # conv2: (152, 144) per row tap i2; row = conv1 col*4 + c1,
    # output lane = ow2*16 + c2.
    w2 = np.asarray(p["conv2_w"], np.float32)                 # (16,4,6,6) OIHW
    W2 = np.zeros((6, 38, 4, _OH2, 16), np.float32)           # [i2, col, c1, ow2, c2]
    for i2 in range(6):
        for kw in range(6):
            for ow2 in range(_OH2):
                W2[i2, 4 * ow2 + kw, :, ow2, :] = w2[:, :, i2, kw].T
    W2 = W2.reshape(6, _C1, _C2)
    b2 = np.tile(np.asarray(p["conv2_b"], np.float32)[None, :],
                 (_OH2, 1)).reshape(1, _C2)                   # lane = ow2*16 + c2

    # fc1: PyTorch flatten order (c2, oh2, ow2) -> per-oh2 blocks (144, 256)
    # with rows (ow2, c2), matching the conv2 output lane layout.
    wf1 = np.asarray(p["fc1_w"], np.float32).reshape(256, 16, _OH2, 9)
    Wfc1 = np.transpose(wf1, (2, 3, 1, 0)).reshape(_OH2, _C2, 256)

    return {
        "w1":   jnp.asarray(W1, jnp.bfloat16),
        "w2":   jnp.asarray(W2, jnp.bfloat16),
        "b2":   jnp.asarray(b2, jnp.float32),
        "wfc1": jnp.asarray(Wfc1, jnp.bfloat16),
        "b1":   jnp.asarray(np.asarray(p["fc1_b"], np.float32).reshape(1, 256)),
        "wfc2": jnp.asarray(np.asarray(p["fc2_w"], np.float32).reshape(1, 256)),
        "bf2":  jnp.asarray(np.asarray(p["fc2_b"], np.float32).reshape(1, 1)),
    }


# ---------------------------------------------------------------------------
# Deterministic PyTorch-layout parameter init + pure-JAX reference.
# ---------------------------------------------------------------------------
def init_params(key):
    ks = jax.random.split(key, 7)

    def u(k, shape, fan_in):
        bound = 1.0 / np.sqrt(fan_in)
        return jax.random.uniform(k, shape, jnp.float32, -bound, bound)

    return {
        "conv1_w": u(ks[0], (4, 2, 6, 6), 2 * 6 * 6),     # bias=False
        "conv2_w": u(ks[1], (16, 4, 6, 6), 4 * 6 * 6),
        "conv2_b": u(ks[2], (16,), 4 * 6 * 6),
        "fc1_w":   u(ks[3], (256, 1296), 1296),           # PyTorch Linear: (out, in)
        "fc1_b":   u(ks[4], (256,), 1296),
        "fc2_w":   u(ks[5], (1, 256), 256),
        "fc2_b":   u(ks[6], (1,), 256),
    }


def policy_forward_ref(params, x):
    hi = jax.lax.Precision.HIGHEST
    h = jax.lax.conv_general_dilated(
        x, params["conv1_w"], (2, 2), "VALID",
        dimension_numbers=("NCHW", "OIHW", "NCHW"), precision=hi)
    h = jnp.maximum(h, 0.0)
    h = jax.lax.conv_general_dilated(
        h, params["conv2_w"], (4, 4), "VALID",
        dimension_numbers=("NCHW", "OIHW", "NCHW"), precision=hi)
    h = jnp.maximum(h + params["conv2_b"].reshape(1, -1, 1, 1), 0.0)
    h = h.reshape(x.shape[0], -1)                          # NCHW flatten -> (N, 1296)
    h = jnp.maximum(jnp.dot(h, params["fc1_w"].T, precision=hi) + params["fc1_b"], 0.0)
    z = jnp.dot(h, params["fc2_w"].T, precision=hi) + params["fc2_b"]
    return 1.0 / (1.0 + jnp.exp(-z))


if __name__ == "__main__":
    key = jax.random.PRNGKey(0)
    pkey, xkey = jax.random.split(key)
    params = init_params(pkey)
    prepared = prepare_params(params)      # one-time weight re-layout (not per call)

    # fc1 pins the conv stack to (N, 2, 80, 80) inputs; use batch = 2.
    x = jax.random.normal(xkey, (2, 2, 80, 80), jnp.float32)

    out = jax.block_until_ready(policy_forward(prepared, x))
    assert out.shape == (2, 1), out.shape
    assert bool(jnp.all((out >= 0.0) & (out <= 1.0)))

    # Numerical check against the plain-JAX reference (bf16 MXU operands =>
    # generous but meaningful tolerance on post-sigmoid outputs).
    ref = policy_forward_ref(params, x)
    err = float(jnp.max(jnp.abs(out - ref)))
    assert err < 0.05, (err, out, ref)

    print("KERNEL_OK")
</pallas_src>

<mosaic_0001>
module attributes {stable_mosaic.version = 11 : i64} {
  func.func @_policy_kernel(%arg0: memref<3x80x320xbf16, #tpu.memory_space<vmem>>, %arg1: memref<3x320x152xbf16, #tpu.memory_space<vmem>>, %arg2: memref<6x152x144xbf16, #tpu.memory_space<vmem>>, %arg3: memref<108x80xbf16, #tpu.memory_space<vmem>>, %arg4: memref<1x144xf32, #tpu.memory_space<vmem>>, %arg5: memref<9x144x256xbf16, #tpu.memory_space<any>>, %arg6: memref<1x256xf32, #tpu.memory_space<vmem>>, %arg7: memref<1x256xf32, #tpu.memory_space<vmem>>, %arg8: memref<1x1xf32, #tpu.memory_space<vmem>>, %arg9: memref<2x1xf32, #tpu.memory_space<vmem>>, %arg10: memref<9x144x256xbf16, #tpu.memory_space<vmem>>, %arg11: memref<!tpu.dma_semaphore, #tpu.memory_space<semaphore_mem>>) attributes {dimension_semantics = [], scalar_prefetch = 0 : i64, scratch_operands = 2 : i64, tpu.core_type = #tpu.core_type<tc>} {
    tpu.enqueue_dma source(%arg5 : memref<9x144x256xbf16, #tpu.memory_space<any>>) target(%arg10 : memref<9x144x256xbf16, #tpu.memory_space<vmem>>) target_semaphore(%arg11 : memref<!tpu.dma_semaphore, #tpu.memory_space<semaphore_mem>>)
    %cst = arith.constant 0.000000e+00 : f32
    %0 = vector.broadcast %cst : f32 to vector<80x152xf32>
    %c0 = arith.constant 0 : index
    %c0_0 = arith.constant 0 : index
    %c0_1 = arith.constant 0 : index
    %1 = vector.load %arg0[%c0, %c0_0, %c0_1] : memref<3x80x320xbf16, #tpu.memory_space<vmem>>, vector<1x80x320xbf16>
    %2 = vector.shape_cast %1 : vector<1x80x320xbf16> to vector<80x320xbf16>
    %c0_2 = arith.constant 0 : index
    %c0_3 = arith.constant 0 : index
    %c0_4 = arith.constant 0 : index
    %3 = vector.load %arg1[%c0_2, %c0_3, %c0_4] : memref<3x320x152xbf16, #tpu.memory_space<vmem>>, vector<1x320x152xbf16>
    %4 = vector.shape_cast %3 : vector<1x320x152xbf16> to vector<320x152xbf16>
    %cst_5 = arith.constant dense<0.000000e+00> : vector<80x152xf32>
    %5 = tpu.matmul %2, %4, %cst_5 {dimension_numbers = #tpu.dot_dimension_numbers<[1], [0], [0], [1], [0, 0, 1, 1], [], []>} : vector<80x320xbf16>, vector<320x152xbf16>, vector<80x152xf32> -> vector<80x152xf32>
    %6 = arith.addf %0, %5 : vector<80x152xf32>
    %c1 = arith.constant 1 : index
    %c0_6 = arith.constant 0 : index
    %c0_7 = arith.constant 0 : index
    %7 = vector.load %arg0[%c1, %c0_6, %c0_7] : memref<3x80x320xbf16, #tpu.memory_space<vmem>>, vector<1x80x320xbf16>
    %8 = vector.shape_cast %7 : vector<1x80x320xbf16> to vector<80x320xbf16>
    %c1_8 = arith.constant 1 : index
    %c0_9 = arith.constant 0 : index
    %c0_10 = arith.constant 0 : index
    %9 = vector.load %arg1[%c1_8, %c0_9, %c0_10] : memref<3x320x152xbf16, #tpu.memory_space<vmem>>, vector<1x320x152xbf16>
    %10 = vector.shape_cast %9 : vector<1x320x152xbf16> to vector<320x152xbf16>
    %cst_11 = arith.constant dense<0.000000e+00> : vector<80x152xf32>
    %11 = tpu.matmul %8, %10, %cst_11 {dimension_numbers = #tpu.dot_dimension_numbers<[1], [0], [0], [1], [0, 0, 1, 1], [], []>} : vector<80x320xbf16>, vector<320x152xbf16>, vector<80x152xf32> -> vector<80x152xf32>
    %12 = arith.addf %6, %11 : vector<80x152xf32>
    %c2 = arith.constant 2 : index
    %c0_12 = arith.constant 0 : index
    %c0_13 = arith.constant 0 : index
    %13 = vector.load %arg0[%c2, %c0_12, %c0_13] : memref<3x80x320xbf16, #tpu.memory_space<vmem>>, vector<1x80x320xbf16>
    %14 = vector.shape_cast %13 : vector<1x80x320xbf16> to vector<80x320xbf16>
    %c2_14 = arith.constant 2 : index
    %c0_15 = arith.constant 0 : index
    %c0_16 = arith.constant 0 : index
    %15 = vector.load %arg1[%c2_14, %c0_15, %c0_16] : memref<3x320x152xbf16, #tpu.memory_space<vmem>>, vector<1x320x152xbf16>
    %16 = vector.shape_cast %15 : vector<1x320x152xbf16> to vector<320x152xbf16>
    %cst_17 = arith.constant dense<0.000000e+00> : vector<80x152xf32>
    %17 = tpu.matmul %14, %16, %cst_17 {dimension_numbers = #tpu.dot_dimension_numbers<[1], [0], [0], [1], [0, 0, 1, 1], [], []>} : vector<80x320xbf16>, vector<320x152xbf16>, vector<80x152xf32> -> vector<80x152xf32>
    %18 = arith.addf %12, %17 : vector<80x152xf32>
    %cst_18 = arith.constant 0.000000e+00 : f32
    %19 = vector.broadcast %cst_18 : f32 to vector<80x152xf32>
    %20 = arith.maximumf %18, %19 : vector<80x152xf32>
    %21 = arith.truncf %20 : vector<80x152xf32> to vector<80x152xbf16>
    %c0_19 = arith.constant 0 : index
    %c0_20 = arith.constant 0 : index
    %22 = vector.load %arg3[%c0_19, %c0_20] : memref<108x80xbf16, #tpu.memory_space<vmem>>, vector<108x80xbf16>
    %cst_21 = arith.constant dense<0.000000e+00> : vector<108x152xf32>
    %23 = tpu.matmul %22, %21, %cst_21 {dimension_numbers = #tpu.dot_dimension_numbers<[1], [0], [0], [1], [0, 0, 1, 1], [], []>} : vector<108x80xbf16>, vector<80x152xbf16>, vector<108x152xf32> -> vector<108x152xf32>
    %24 = arith.truncf %23 : vector<108x152xf32> to vector<108x152xbf16>
    %cst_22 = arith.constant 0.000000e+00 : f32
    %25 = vector.broadcast %cst_22 : f32 to vector<18x144xf32>
    %26 = vector.extract_strided_slice %24 {offsets = [0, 0], sizes = [18, 152], strides = [1, 1]} : vector<108x152xbf16> to vector<18x152xbf16>
    %c0_23 = arith.constant 0 : index
    %c0_24 = arith.constant 0 : index
    %c0_25 = arith.constant 0 : index
    %27 = vector.load %arg2[%c0_23, %c0_24, %c0_25] : memref<6x152x144xbf16, #tpu.memory_space<vmem>>, vector<1x152x144xbf16>
    %28 = vector.shape_cast %27 : vector<1x152x144xbf16> to vector<152x144xbf16>
    %cst_26 = arith.constant dense<0.000000e+00> : vector<18x144xf32>
    %29 = tpu.matmul %26, %28, %cst_26 {dimension_numbers = #tpu.dot_dimension_numbers<[1], [0], [0], [1], [0, 0, 1, 1], [], []>} : vector<18x152xbf16>, vector<152x144xbf16>, vector<18x144xf32> -> vector<18x144xf32>
    %30 = arith.addf %25, %29 : vector<18x144xf32>
    %31 = vector.extract_strided_slice %24 {offsets = [18, 0], sizes = [18, 152], strides = [1, 1]} : vector<108x152xbf16> to vector<18x152xbf16>
    %c1_27 = arith.constant 1 : index
    %c0_28 = arith.constant 0 : index
    %c0_29 = arith.constant 0 : index
    %32 = vector.load %arg2[%c1_27, %c0_28, %c0_29] : memref<6x152x144xbf16, #tpu.memory_space<vmem>>, vector<1x152x144xbf16>
    %33 = vector.shape_cast %32 : vector<1x152x144xbf16> to vector<152x144xbf16>
    %cst_30 = arith.constant dense<0.000000e+00> : vector<18x144xf32>
    %34 = tpu.matmul %31, %33, %cst_30 {dimension_numbers = #tpu.dot_dimension_numbers<[1], [0], [0], [1], [0, 0, 1, 1], [], []>} : vector<18x152xbf16>, vector<152x144xbf16>, vector<18x144xf32> -> vector<18x144xf32>
    %35 = arith.addf %30, %34 : vector<18x144xf32>
    %36 = vector.extract_strided_slice %24 {offsets = [36, 0], sizes = [18, 152], strides = [1, 1]} : vector<108x152xbf16> to vector<18x152xbf16>
    %c2_31 = arith.constant 2 : index
    %c0_32 = arith.constant 0 : index
    %c0_33 = arith.constant 0 : index
    %37 = vector.load %arg2[%c2_31, %c0_32, %c0_33] : memref<6x152x144xbf16, #tpu.memory_space<vmem>>, vector<1x152x144xbf16>
    %38 = vector.shape_cast %37 : vector<1x152x144xbf16> to vector<152x144xbf16>
    %cst_34 = arith.constant dense<0.000000e+00> : vector<18x144xf32>
    %39 = tpu.matmul %36, %38, %cst_34 {dimension_numbers = #tpu.dot_dimension_numbers<[1], [0], [0], [1], [0, 0, 1, 1], [], []>} : vector<18x152xbf16>, vector<152x144xbf16>, vector<18x144xf32> -> vector<18x144xf32>
    %40 = arith.addf %35, %39 : vector<18x144xf32>
    %41 = vector.extract_strided_slice %24 {offsets = [54, 0], sizes = [18, 152], strides = [1, 1]} : vector<108x152xbf16> to vector<18x152xbf16>
    %c3 = arith.constant 3 : index
    %c0_35 = arith.constant 0 : index
    %c0_36 = arith.constant 0 : index
    %42 = vector.load %arg2[%c3, %c0_35, %c0_36] : memref<6x152x144xbf16, #tpu.memory_space<vmem>>, vector<1x152x144xbf16>
    %43 = vector.shape_cast %42 : vector<1x152x144xbf16> to vector<152x144xbf16>
    %cst_37 = arith.constant dense<0.000000e+00> : vector<18x144xf32>
    %44 = tpu.matmul %41, %43, %cst_37 {dimension_numbers = #tpu.dot_dimension_numbers<[1], [0], [0], [1], [0, 0, 1, 1], [], []>} : vector<18x152xbf16>, vector<152x144xbf16>, vector<18x144xf32> -> vector<18x144xf32>
    %45 = arith.addf %40, %44 : vector<18x144xf32>
    %46 = vector.extract_strided_slice %24 {offsets = [72, 0], sizes = [18, 152], strides = [1, 1]} : vector<108x152xbf16> to vector<18x152xbf16>
    %c4 = arith.constant 4 : index
    %c0_38 = arith.constant 0 : index
    %c0_39 = arith.constant 0 : index
    %47 = vector.load %arg2[%c4, %c0_38, %c0_39] : memref<6x152x144xbf16, #tpu.memory_space<vmem>>, vector<1x152x144xbf16>
    %48 = vector.shape_cast %47 : vector<1x152x144xbf16> to vector<152x144xbf16>
    %cst_40 = arith.constant dense<0.000000e+00> : vector<18x144xf32>
    %49 = tpu.matmul %46, %48, %cst_40 {dimension_numbers = #tpu.dot_dimension_numbers<[1], [0], [0], [1], [0, 0, 1, 1], [], []>} : vector<18x152xbf16>, vector<152x144xbf16>, vector<18x144xf32> -> vector<18x144xf32>
    %50 = arith.addf %45, %49 : vector<18x144xf32>
    %51 = vector.extract_strided_slice %24 {offsets = [90, 0], sizes = [18, 152], strides = [1, 1]} : vector<108x152xbf16> to vector<18x152xbf16>
    %c5 = arith.constant 5 : index
    %c0_41 = arith.constant 0 : index
    %c0_42 = arith.constant 0 : index
    %52 = vector.load %arg2[%c5, %c0_41, %c0_42] : memref<6x152x144xbf16, #tpu.memory_space<vmem>>, vector<1x152x144xbf16>
    %53 = vector.shape_cast %52 : vector<1x152x144xbf16> to vector<152x144xbf16>
    %cst_43 = arith.constant dense<0.000000e+00> : vector<18x144xf32>
    %54 = tpu.matmul %51, %53, %cst_43 {dimension_numbers = #tpu.dot_dimension_numbers<[1], [0], [0], [1], [0, 0, 1, 1], [], []>} : vector<18x152xbf16>, vector<152x144xbf16>, vector<18x144xf32> -> vector<18x144xf32>
    %55 = arith.addf %50, %54 : vector<18x144xf32>
    %c0_44 = arith.constant 0 : index
    %c0_45 = arith.constant 0 : index
    %56 = vector.load %arg4[%c0_44, %c0_45] : memref<1x144xf32, #tpu.memory_space<vmem>>, vector<1x144xf32>
    %57 = vector.broadcast %56 : vector<1x144xf32> to vector<18x144xf32>
    %58 = arith.addf %55, %57 : vector<18x144xf32>
    %cst_46 = arith.constant 0.000000e+00 : f32
    %59 = vector.broadcast %cst_46 : f32 to vector<18x144xf32>
    %60 = arith.maximumf %58, %59 : vector<18x144xf32>
    %61 = arith.truncf %60 : vector<18x144xf32> to vector<18x144xbf16>
    tpu.wait_dma2 semaphore(%arg11 : memref<!tpu.dma_semaphore, #tpu.memory_space<semaphore_mem>>) src(%arg5 : memref<9x144x256xbf16, #tpu.memory_space<any>>) dst(%arg10 : memref<9x144x256xbf16, #tpu.memory_space<vmem>>)
    %cst_47 = arith.constant 0.000000e+00 : f32
    %62 = vector.broadcast %cst_47 : f32 to vector<2x256xf32>
    %63 = vector.extract_strided_slice %61 {offsets = [0, 0], sizes = [2, 144], strides = [1, 1]} : vector<18x144xbf16> to vector<2x144xbf16>
    %c0_48 = arith.constant 0 : index
    %c0_49 = arith.constant 0 : index
    %c0_50 = arith.constant 0 : index
    %64 = vector.load %arg10[%c0_48, %c0_49, %c0_50] : memref<9x144x256xbf16, #tpu.memory_space<vmem>>, vector<1x144x256xbf16>
    %65 = vector.shape_cast %64 : vector<1x144x256xbf16> to vector<144x256xbf16>
    %cst_51 = arith.constant dense<0.000000e+00> : vector<2x256xf32>
    %66 = tpu.matmul %63, %65, %cst_51 {dimension_numbers = #tpu.dot_dimension_numbers<[1], [0], [0], [1], [0, 0, 1, 1], [], []>} : vector<2x144xbf16>, vector<144x256xbf16>, vector<2x256xf32> -> vector<2x256xf32>
    %67 = arith.addf %62, %66 : vector<2x256xf32>
    %68 = vector.extract_strided_slice %61 {offsets = [2, 0], sizes = [2, 144], strides = [1, 1]} : vector<18x144xbf16> to vector<2x144xbf16>
    %c1_52 = arith.constant 1 : index
    %c0_53 = arith.constant 0 : index
    %c0_54 = arith.constant 0 : index
    %69 = vector.load %arg10[%c1_52, %c0_53, %c0_54] : memref<9x144x256xbf16, #tpu.memory_space<vmem>>, vector<1x144x256xbf16>
    %70 = vector.shape_cast %69 : vector<1x144x256xbf16> to vector<144x256xbf16>
    %cst_55 = arith.constant dense<0.000000e+00> : vector<2x256xf32>
    %71 = tpu.matmul %68, %70, %cst_55 {dimension_numbers = #tpu.dot_dimension_numbers<[1], [0], [0], [1], [0, 0, 1, 1], [], []>} : vector<2x144xbf16>, vector<144x256xbf16>, vector<2x256xf32> -> vector<2x256xf32>
    %72 = arith.addf %67, %71 : vector<2x256xf32>
    %73 = vector.extract_strided_slice %61 {offsets = [4, 0], sizes = [2, 144], strides = [1, 1]} : vector<18x144xbf16> to vector<2x144xbf16>
    %c2_56 = arith.constant 2 : index
    %c0_57 = arith.constant 0 : index
    %c0_58 = arith.constant 0 : index
    %74 = vector.load %arg10[%c2_56, %c0_57, %c0_58] : memref<9x144x256xbf16, #tpu.memory_space<vmem>>, vector<1x144x256xbf16>
    %75 = vector.shape_cast %74 : vector<1x144x256xbf16> to vector<144x256xbf16>
    %cst_59 = arith.constant dense<0.000000e+00> : vector<2x256xf32>
    %76 = tpu.matmul %73, %75, %cst_59 {dimension_numbers = #tpu.dot_dimension_numbers<[1], [0], [0], [1], [0, 0, 1, 1], [], []>} : vector<2x144xbf16>, vector<144x256xbf16>, vector<2x256xf32> -> vector<2x256xf32>
    %77 = arith.addf %72, %76 : vector<2x256xf32>
    %78 = vector.extract_strided_slice %61 {offsets = [6, 0], sizes = [2, 144], strides = [1, 1]} : vector<18x144xbf16> to vector<2x144xbf16>
    %c3_60 = arith.constant 3 : index
    %c0_61 = arith.constant 0 : index
    %c0_62 = arith.constant 0 : index
    %79 = vector.load %arg10[%c3_60, %c0_61, %c0_62] : memref<9x144x256xbf16, #tpu.memory_space<vmem>>, vector<1x144x256xbf16>
    %80 = vector.shape_cast %79 : vector<1x144x256xbf16> to vector<144x256xbf16>
    %cst_63 = arith.constant dense<0.000000e+00> : vector<2x256xf32>
    %81 = tpu.matmul %78, %80, %cst_63 {dimension_numbers = #tpu.dot_dimension_numbers<[1], [0], [0], [1], [0, 0, 1, 1], [], []>} : vector<2x144xbf16>, vector<144x256xbf16>, vector<2x256xf32> -> vector<2x256xf32>
    %82 = arith.addf %77, %81 : vector<2x256xf32>
    %83 = vector.extract_strided_slice %61 {offsets = [8, 0], sizes = [2, 144], strides = [1, 1]} : vector<18x144xbf16> to vector<2x144xbf16>
    %c4_64 = arith.constant 4 : index
    %c0_65 = arith.constant 0 : index
    %c0_66 = arith.constant 0 : index
    %84 = vector.load %arg10[%c4_64, %c0_65, %c0_66] : memref<9x144x256xbf16, #tpu.memory_space<vmem>>, vector<1x144x256xbf16>
    %85 = vector.shape_cast %84 : vector<1x144x256xbf16> to vector<144x256xbf16>
    %cst_67 = arith.constant dense<0.000000e+00> : vector<2x256xf32>
    %86 = tpu.matmul %83, %85, %cst_67 {dimension_numbers = #tpu.dot_dimension_numbers<[1], [0], [0], [1], [0, 0, 1, 1], [], []>} : vector<2x144xbf16>, vector<144x256xbf16>, vector<2x256xf32> -> vector<2x256xf32>
    %87 = arith.addf %82, %86 : vector<2x256xf32>
    %88 = vector.extract_strided_slice %61 {offsets = [10, 0], sizes = [2, 144], strides = [1, 1]} : vector<18x144xbf16> to vector<2x144xbf16>
    %c5_68 = arith.constant 5 : index
    %c0_69 = arith.constant 0 : index
    %c0_70 = arith.constant 0 : index
    %89 = vector.load %arg10[%c5_68, %c0_69, %c0_70] : memref<9x144x256xbf16, #tpu.memory_space<vmem>>, vector<1x144x256xbf16>
    %90 = vector.shape_cast %89 : vector<1x144x256xbf16> to vector<144x256xbf16>
    %cst_71 = arith.constant dense<0.000000e+00> : vector<2x256xf32>
    %91 = tpu.matmul %88, %90, %cst_71 {dimension_numbers = #tpu.dot_dimension_numbers<[1], [0], [0], [1], [0, 0, 1, 1], [], []>} : vector<2x144xbf16>, vector<144x256xbf16>, vector<2x256xf32> -> vector<2x256xf32>
    %92 = arith.addf %87, %91 : vector<2x256xf32>
    %93 = vector.extract_strided_slice %61 {offsets = [12, 0], sizes = [2, 144], strides = [1, 1]} : vector<18x144xbf16> to vector<2x144xbf16>
    %c6 = arith.constant 6 : index
    %c0_72 = arith.constant 0 : index
    %c0_73 = arith.constant 0 : index
    %94 = vector.load %arg10[%c6, %c0_72, %c0_73] : memref<9x144x256xbf16, #tpu.memory_space<vmem>>, vector<1x144x256xbf16>
    %95 = vector.shape_cast %94 : vector<1x144x256xbf16> to vector<144x256xbf16>
    %cst_74 = arith.constant dense<0.000000e+00> : vector<2x256xf32>
    %96 = tpu.matmul %93, %95, %cst_74 {dimension_numbers = #tpu.dot_dimension_numbers<[1], [0], [0], [1], [0, 0, 1, 1], [], []>} : vector<2x144xbf16>, vector<144x256xbf16>, vector<2x256xf32> -> vector<2x256xf32>
    %97 = arith.addf %92, %96 : vector<2x256xf32>
    %98 = vector.extract_strided_slice %61 {offsets = [14, 0], sizes = [2, 144], strides = [1, 1]} : vector<18x144xbf16> to vector<2x144xbf16>
    %c7 = arith.constant 7 : index
    %c0_75 = arith.constant 0 : index
    %c0_76 = arith.constant 0 : index
    %99 = vector.load %arg10[%c7, %c0_75, %c0_76] : memref<9x144x256xbf16, #tpu.memory_space<vmem>>, vector<1x144x256xbf16>
    %100 = vector.shape_cast %99 : vector<1x144x256xbf16> to vector<144x256xbf16>
    %cst_77 = arith.constant dense<0.000000e+00> : vector<2x256xf32>
    %101 = tpu.matmul %98, %100, %cst_77 {dimension_numbers = #tpu.dot_dimension_numbers<[1], [0], [0], [1], [0, 0, 1, 1], [], []>} : vector<2x144xbf16>, vector<144x256xbf16>, vector<2x256xf32> -> vector<2x256xf32>
    %102 = arith.addf %97, %101 : vector<2x256xf32>
    %103 = vector.extract_strided_slice %61 {offsets = [16, 0], sizes = [2, 144], strides = [1, 1]} : vector<18x144xbf16> to vector<2x144xbf16>
    %c8 = arith.constant 8 : index
    %c0_78 = arith.constant 0 : index
    %c0_79 = arith.constant 0 : index
    %104 = vector.load %arg10[%c8, %c0_78, %c0_79] : memref<9x144x256xbf16, #tpu.memory_space<vmem>>, vector<1x144x256xbf16>
    %105 = vector.shape_cast %104 : vector<1x144x256xbf16> to vector<144x256xbf16>
    %cst_80 = arith.constant dense<0.000000e+00> : vector<2x256xf32>
    %106 = tpu.matmul %103, %105, %cst_80 {dimension_numbers = #tpu.dot_dimension_numbers<[1], [0], [0], [1], [0, 0, 1, 1], [], []>} : vector<2x144xbf16>, vector<144x256xbf16>, vector<2x256xf32> -> vector<2x256xf32>
    %107 = arith.addf %102, %106 : vector<2x256xf32>
    %c0_81 = arith.constant 0 : index
    %c0_82 = arith.constant 0 : index
    %108 = vector.load %arg6[%c0_81, %c0_82] : memref<1x256xf32, #tpu.memory_space<vmem>>, vector<1x256xf32>
    %109 = vector.broadcast %108 : vector<1x256xf32> to vector<2x256xf32>
    %110 = arith.addf %107, %109 : vector<2x256xf32>
    %cst_83 = arith.constant 0.000000e+00 : f32
    %111 = vector.broadcast %cst_83 : f32 to vector<2x256xf32>
    %112 = arith.maximumf %110, %111 : vector<2x256xf32>
    %c0_84 = arith.constant 0 : index
    %c0_85 = arith.constant 0 : index
    %113 = vector.load %arg7[%c0_84, %c0_85] : memref<1x256xf32, #tpu.memory_space<vmem>>, vector<1x256xf32>
    %114 = vector.broadcast %113 : vector<1x256xf32> to vector<2x256xf32>
    %115 = arith.mulf %112, %114 : vector<2x256xf32>
    %cst_86 = arith.constant dense<0.000000e+00> : vector<2xf32>
    %116 = vector.multi_reduction <add>, %115, %cst_86 [1] : vector<2x256xf32> to vector<2xf32>
    %117 = vector.shape_cast %116 : vector<2xf32> to vector<2x1xf32>
    %c0_87 = arith.constant 0 : index
    %c0_88 = arith.constant 0 : index
    %118 = vector.load %arg8[%c0_87, %c0_88] : memref<1x1xf32, #tpu.memory_space<vmem>>, vector<1x1xf32>
    %119 = vector.broadcast %118 : vector<1x1xf32> to vector<2x1xf32>
    %120 = arith.addf %117, %119 : vector<2x1xf32>
    %cst_89 = arith.constant 0.000000e+00 : f32
    %121 = vector.broadcast %cst_89 : f32 to vector<2x1xf32>
    %122 = arith.subf %121, %120 : vector<2x1xf32>
    %123 = math.exp %122 : vector<2x1xf32>
    %cst_90 = arith.constant 1.000000e+00 : f32
    %124 = vector.broadcast %cst_90 : f32 to vector<2x1xf32>
    %125 = arith.addf %124, %123 : vector<2x1xf32>
    %cst_91 = arith.constant 1.000000e+00 : f32
    %126 = vector.broadcast %cst_91 : f32 to vector<2x1xf32>
    %127 = arith.divf %126, %125 : vector<2x1xf32>
    %c0_92 = arith.constant 0 : index
    %c0_93 = arith.constant 0 : index
    %128 = vector.load %arg9[%c0_92, %c0_93] : memref<2x1xf32, #tpu.memory_space<vmem>>, vector<2x1xf32>
    tpu.vector_store %arg9[%c0_92, %c0_93], %127 {strides = array<i32>} : memref<2x1xf32, #tpu.memory_space<vmem>>, vector<2x1xf32>,
    return
  }
}

</mosaic_0001>

<bundles_post_ra>
// kernel: policy_forward.1
= control target key start
LH: loop header
LB: loop body
LE: loop exit
PB: predicated region body
PF: predicated region fallthrough
CT: control target
= control target key end

     0   :  { %s10664_s0 = inlined_call_operand.vmem [shape: bf16[3,80,320], index: 0, kind: input, shape index: {}]   ;;  %s10665_s1 = inlined_call_operand.vmem [shape: bf16[3,320,152], index: 1, kind: input, shape index: {}]   ;;  %s10666_s2 = inlined_call_operand.vmem [shape: bf16[6,152,144], index: 2, kind: input, shape index: {}]   ;;  %s10667_s3 = inlined_call_operand.vmem [shape: bf16[108,80], index: 3, kind: input, shape index: {}]   ;;  %s10668_s4 = inlined_call_operand.vmem [shape: f32[1,144], index: 4, kind: input, shape index: {}]   ;;  %s10669_s6 = inlined_call_operand.vmem [shape: f32[1,256], index: 6, kind: input, shape index: {}]   ;;  %s10670_s7 = inlined_call_operand.vmem [shape: f32[1,256], index: 7, kind: input, shape index: {}]   ;;  %s10671_s8 = inlined_call_operand.<no memory space> [shape: f32[1,1], index: 8, kind: input, shape index: {}]   ;;  %s10672_s9 = inlined_call_operand.vmem [shape: f32[2,1], index: 9, kind: output, shape index: {}]   ;;  %s10673_s5 = inlined_call_operand.vmem [shape: bf16[9,144,256], index: 5, kind: input, shape index: {}]  }
   0x1   :  { %v14_v0 = vstv %s10671_s8  ;;  %v43_v1 = vld [vmem:[%s10673_s5] sm:$0xff]  ;;  %v45_v2 = vld [vmem:[%s10673_s5 + $0x8] sm:$0xff]  ;;  %v47_v3 = vld [vmem:[%s10673_s5 + $0x10] sm:$0xff] }
   0x2   :  { %15 = vst [vmem:[#allocation4] sm:$0x1] %v14_v0  ;;  %v49_v4 = vld [vmem:[%s10673_s5 + $0x18] sm:$0xff]  ;;  %v51_v5 = vld [vmem:[%s10673_s5 + $0x20] sm:$0xff]  ;;  %v53_v6 = vld [vmem:[%s10673_s5 + $0x28] sm:$0xff] }
   0x3   :  { %44 = vst [vmem:[#allocation2] sm:$0xff] %v43_v1  ;;  %v55_v7 = vld [vmem:[%s10673_s5 + $0x30] sm:$0xff]  ;;  %v57_v8 = vld [vmem:[%s10673_s5 + $0x38] sm:$0xff]  ;;  %v59_v9 = vld [vmem:[%s10673_s5 + $0x40] sm:$0xff] }
   0x4   :  { %46 = vst [vmem:[#allocation2 + $0x8] sm:$0xff] %v45_v2  ;;  %v61_v10 = vld [vmem:[%s10673_s5 + $0x48] sm:$0xff]  ;;  %v63_v11 = vld [vmem:[%s10673_s5 + $0x50] sm:$0xff]  ;;  %v65_v12 = vld [vmem:[%s10673_s5 + $0x58] sm:$0xff] }
   0x5   :  { %48 = vst [vmem:[#allocation2 + $0x10] sm:$0xff] %v47_v3  ;;  %v67_v13 = vld [vmem:[%s10673_s5 + $0x60] sm:$0xff]  ;;  %v69_v14 = vld [vmem:[%s10673_s5 + $0x68] sm:$0xff]  ;;  %v71_v15 = vld [vmem:[%s10673_s5 + $0x70] sm:$0xff] }
   0x6   :  { %50 = vst [vmem:[#allocation2 + $0x18] sm:$0xff] %v49_v4  ;;  %v73_v16 = vld [vmem:[%s10673_s5 + $0x78] sm:$0xff]  ;;  %v75_v17 = vld [vmem:[%s10673_s5 + $0x80] sm:$0xff]  ;;  %v77_v18 = vld [vmem:[%s10673_s5 + $0x88] sm:$0xff] }
   0x7   :  { %52 = vst [vmem:[#allocation2 + $0x20] sm:$0xff] %v51_v5  ;;  %v79_v19 = vld [vmem:[%s10673_s5 + $0x90] sm:$0xff]  ;;  %v81_v20 = vld [vmem:[%s10673_s5 + $0x98] sm:$0xff]  ;;  %v83_v21 = vld [vmem:[%s10673_s5 + $0xa0] sm:$0xff] }
   0x8   :  { %54 = vst [vmem:[#allocation2 + $0x28] sm:$0xff] %v53_v6  ;;  %v85_v22 = vld [vmem:[%s10673_s5 + $0xa8] sm:$0xff]  ;;  %v87_v23 = vld [vmem:[%s10673_s5 + $0xb0] sm:$0xff]  ;;  %v89_v24 = vld [vmem:[%s10673_s5 + $0xb8] sm:$0xff] }
   0x9   :  { %56 = vst [vmem:[#allocation2 + $0x30] sm:$0xff] %v55_v7  ;;  %v91_v25 = vld [vmem:[%s10673_s5 + $0xc0] sm:$0xff]  ;;  %v93_v26 = vld [vmem:[%s10673_s5 + $0xc8] sm:$0xff]  ;;  %v95_v27 = vld [vmem:[%s10673_s5 + $0xd0] sm:$0xff] }
   0xa   :  { %58 = vst [vmem:[#allocation2 + $0x38] sm:$0xff] %v57_v8  ;;  %v97_v28 = vld [vmem:[%s10673_s5 + $0xd8] sm:$0xff]  ;;  %v99_v29 = vld [vmem:[%s10673_s5 + $0xe0] sm:$0xff]  ;;  %v101_v30 = vld [vmem:[%s10673_s5 + $0xe8] sm:$0xff] }
   0xb   :  { %60 = vst [vmem:[#allocation2 + $0x40] sm:$0xff] %v59_v9  ;;  %v103_v31 = vld [vmem:[%s10673_s5 + $0xf0] sm:$0xff]  ;;  %v105_v32 = vld [vmem:[%s10673_s5 + $0xf8] sm:$0xff]  ;;  %v107_v33 = vld [vmem:[%s10673_s5 + $0x100] sm:$0xff] }
   0xc   :  { %62 = vst [vmem:[#allocation2 + $0x48] sm:$0xff] %v61_v10  ;;  %v109_v34 = vld [vmem:[%s10673_s5 + $0x108] sm:$0xff]  ;;  %v111_v35 = vld [vmem:[%s10673_s5 + $0x110] sm:$0xff]  ;;  %v113_v36 = vld [vmem:[%s10673_s5 + $0x118] sm:$0xff] }
   0xd   :  { %64 = vst [vmem:[#allocation2 + $0x50] sm:$0xff] %v63_v11  ;;  %v115_v37 = vld [vmem:[%s10673_s5 + $0x120] sm:$0xff]  ;;  %v117_v38 = vld [vmem:[%s10673_s5 + $0x128] sm:$0xff]  ;;  %v119_v39 = vld [vmem:[%s10673_s5 + $0x130] sm:$0xff] }
   0xe   :  { %66 = vst [vmem:[#allocation2 + $0x58] sm:$0xff] %v65_v12  ;;  %v121_v40 = vld [vmem:[%s10673_s5 + $0x138] sm:$0xff]  ;;  %v123_v41 = vld [vmem:[%s10673_s5 + $0x140] sm:$0xff]  ;;  %v125_v42 = vld [vmem:[%s10673_s5 + $0x148] sm:$0xff] }
   0xf   :  { %68 = vst [vmem:[#allocation2 + $0x60] sm:$0xff] %v67_v13  ;;  %v127_v43 = vld [vmem:[%s10673_s5 + $0x150] sm:$0xff]  ;;  %v129_v44 = vld [vmem:[%s10673_s5 + $0x158] sm:$0xff]  ;;  %v131_v45 = vld [vmem:[%s10673_s5 + $0x160] sm:$0xff] }
  0x10   :  { %70 = vst [vmem:[#allocation2 + $0x68] sm:$0xff] %v69_v14  ;;  %v133_v46 = vld [vmem:[%s10673_s5 + $0x168] sm:$0xff]  ;;  %v135_v47 = vld [vmem:[%s10673_s5 + $0x170] sm:$0xff]  ;;  %v137_v48 = vld [vmem:[%s10673_s5 + $0x178] sm:$0xff] }
  0x11   :  { %72 = vst [vmem:[#allocation2 + $0x70] sm:$0xff] %v71_v15  ;;  %v139_v49 = vld [vmem:[%s10673_s5 + $0x180] sm:$0xff]  ;;  %v141_v50 = vld [vmem:[%s10673_s5 + $0x188] sm:$0xff]  ;;  %v143_v51 = vld [vmem:[%s10673_s5 + $0x190] sm:$0xff] }
  0x12   :  { %74 = vst [vmem:[#allocation2 + $0x78] sm:$0xff] %v73_v16  ;;  %v145_v52 = vld [vmem:[%s10673_s5 + $0x198] sm:$0xff]  ;;  %v147_v53 = vld [vmem:[%s10673_s5 + $0x1a0] sm:$0xff]  ;;  %v149_v54 = vld [vmem:[%s10673_s5 + $0x1a8] sm:$0xff] }
  0x13   :  { %76 = vst [vmem:[#allocation2 + $0x80] sm:$0xff] %v75_v17  ;;  %v151_v55 = vld [vmem:[%s10673_s5 + $0x1b0] sm:$0xff]  ;;  %v153_v56 = vld [vmem:[%s10673_s5 + $0x1b8] sm:$0xff]  ;;  %v155_v57 = vld [vmem:[%s10673_s5 + $0x1c0] sm:$0xff] }
  0x14   :  { %78 = vst [vmem:[#allocation2 + $0x88] sm:$0xff] %v77_v18  ;;  %v157_v58 = vld [vmem:[%s10673_s5 + $0x1c8] sm:$0xff]  ;;  %v159_v59 = vld [vmem:[%s10673_s5 + $0x1d0] sm:$0xff]  ;;  %v161_v60 = vld [vmem:[%s10673_s5 + $0x1d8] sm:$0xff] }
  0x15   :  { %80 = vst [vmem:[#allocation2 + $0x90] sm:$0xff] %v79_v19  ;;  %v163_v61 = vld [vmem:[%s10673_s5 + $0x1e0] sm:$0xff]  ;;  %v165_v62 = vld [vmem:[%s10673_s5 + $0x1e8] sm:$0xff]  ;;  %v167_v63 = vld [vmem:[%s10673_s5 + $0x1f0] sm:$0xff] }
  0x16   :  { %82 = vst [vmem:[#allocation2 + $0x98] sm:$0xff] %v81_v20  ;;  %v169_v0 = vld [vmem:[%s10673_s5 + $0x1f8] sm:$0xff]  ;;  %v171_v1 = vld [vmem:[%s10673_s5 + $0x200] sm:$0xff]  ;;  %v173_v2 = vld [vmem:[%s10673_s5 + $0x208] sm:$0xff] }
  0x17   :  { %84 = vst [vmem:[#allocation2 + $0xa0] sm:$0xff] %v83_v21  ;;  %v175_v3 = vld [vmem:[%s10673_s5 + $0x210] sm:$0xff]  ;;  %v177_v4 = vld [vmem:[%s10673_s5 + $0x218] sm:$0xff]  ;;  %v179_v5 = vld [vmem:[%s10673_s5 + $0x220] sm:$0xff] }
  0x18   :  { %86 = vst [vmem:[#allocation2 + $0xa8] sm:$0xff] %v85_v22  ;;  %v181_v6 = vld [vmem:[%s10673_s5 + $0x228] sm:$0xff]  ;;  %v183_v7 = vld [vmem:[%s10673_s5 + $0x230] sm:$0xff]  ;;  %v185_v8 = vld [vmem:[%s10673_s5 + $0x238] sm:$0xff] }
  0x19   :  { %88 = vst [vmem:[#allocation2 + $0xb0] sm:$0xff] %v87_v23  ;;  %v187_v9 = vld [vmem:[%s10673_s5 + $0x240] sm:$0xff]  ;;  %v189_v10 = vld [vmem:[%s10673_s5 + $0x248] sm:$0xff]  ;;  %v191_v11 = vld [vmem:[%s10673_s5 + $0x250] sm:$0xff] }
  0x1a   :  { %90 = vst [vmem:[#allocation2 + $0xb8] sm:$0xff] %v89_v24  ;;  %v193_v12 = vld [vmem:[%s10673_s5 + $0x258] sm:$0xff]  ;;  %v195_v13 = vld [vmem:[%s10673_s5 + $0x260] sm:$0xff]  ;;  %v197_v14 = vld [vmem:[%s10673_s5 + $0x268] sm:$0xff] }
  0x1b   :  { %92 = vst [vmem:[#allocation2 + $0xc0] sm:$0xff] %v91_v25  ;;  %v199_v15 = vld [vmem:[%s10673_s5 + $0x270] sm:$0xff]  ;;  %v201_v16 = vld [vmem:[%s10673_s5 + $0x278] sm:$0xff]  ;;  %v203_v17 = vld [vmem:[%s10673_s5 + $0x280] sm:$0xff] }
  0x1c   :  { %94 = vst [vmem:[#allocation2 + $0xc8] sm:$0xff] %v93_v26  ;;  %v205_v18 = vld [vmem:[%s10673_s5 + $0x288] sm:$0xff]  ;;  %v207_v19 = vld [vmem:[%s10673_s5 + $0x290] sm:$0xff]  ;;  %v209_v20 = vld [vmem:[%s10673_s5 + $0x298] sm:$0xff] }
  0x1d   :  { %96 = vst [vmem:[#allocation2 + $0xd0] sm:$0xff] %v95_v27  ;;  %v211_v21 = vld [vmem:[%s10673_s5 + $0x2a0] sm:$0xff]  ;;  %v213_v22 = vld [vmem:[%s10673_s5 + $0x2a8] sm:$0xff]  ;;  %v215_v23 = vld [vmem:[%s10673_s5 + $0x2b0] sm:$0xff] }
  0x1e   :  { %98 = vst [vmem:[#allocation2 + $0xd8] sm:$0xff] %v97_v28  ;;  %v217_v24 = vld [vmem:[%s10673_s5 + $0x2b8] sm:$0xff]  ;;  %v219_v25 = vld [vmem:[%s10673_s5 + $0x2c0] sm:$0xff]  ;;  %v221_v26 = vld [vmem:[%s10673_s5 + $0x2c8] sm:$0xff] }
  0x1f   :  { %100 = vst [vmem:[#allocation2 + $0xe0] sm:$0xff] %v99_v29  ;;  %v223_v27 = vld [vmem:[%s10673_s5 + $0x2d0] sm:$0xff]  ;;  %v225_v28 = vld [vmem:[%s10673_s5 + $0x2d8] sm:$0xff]  ;;  %v227_v29 = vld [vmem:[%s10673_s5 + $0x2e0] sm:$0xff] }
  0x20   :  { %102 = vst [vmem:[#allocation2 + $0xe8] sm:$0xff] %v101_v30  ;;  %v229_v30 = vld [vmem:[%s10673_s5 + $0x2e8] sm:$0xff] }
  0x21   :  { %104 = vst [vmem:[#allocation2 + $0xf0] sm:$0xff] %v103_v31  ;;  %v231_v31 = vld [vmem:[%s10673_s5 + $0x2f0] sm:$0xff] }
  0x22   :  { %106 = vst [vmem:[#allocation2 + $0xf8] sm:$0xff] %v105_v32  ;;  %v233_v32 = vld [vmem:[%s10673_s5 + $0x2f8] sm:$0xff] }
  0x23   :  { %108 = vst [vmem:[#allocation2 + $0x100] sm:$0xff] %v107_v33  ;;  %v235_v33 = vld [vmem:[%s10673_s5 + $0x300] sm:$0xff] }
  0x24   :  { %110 = vst [vmem:[#allocation2 + $0x108] sm:$0xff] %v109_v34  ;;  %v237_v34 = vld [vmem:[%s10673_s5 + $0x308] sm:$0xff] }
  0x25   :  { %112 = vst [vmem:[#allocation2 + $0x110] sm:$0xff] %v111_v35  ;;  %v239_v35 = vld [vmem:[%s10673_s5 + $0x310] sm:$0xff] }
  0x26   :  { %114 = vst [vmem:[#allocation2 + $0x118] sm:$0xff] %v113_v36  ;;  %v241_v36 = vld [vmem:[%s10673_s5 + $0x318] sm:$0xff] }
  0x27   :  { %116 = vst [vmem:[#allocation2 + $0x120] sm:$0xff] %v115_v37  ;;  %v243_v37 = vld [vmem:[%s10673_s5 + $0x320] sm:$0xff] }
  0x28   :  { %118 = vst [vmem:[#allocation2 + $0x128] sm:$0xff] %v117_v38  ;;  %v245_v38 = vld [vmem:[%s10673_s5 + $0x328] sm:$0xff] }
  0x29   :  { %120 = vst [vmem:[#allocation2 + $0x130] sm:$0xff] %v119_v39  ;;  %v247_v39 = vld [vmem:[%s10673_s5 + $0x330] sm:$0xff] }
  0x2a   :  { %122 = vst [vmem:[#allocation2 + $0x138] sm:$0xff] %v121_v40  ;;  %v249_v40 = vld [vmem:[%s10673_s5 + $0x338] sm:$0xff] }
  0x2b   :  { %124 = vst [vmem:[#allocation2 + $0x140] sm:$0xff] %v123_v41  ;;  %v251_v41 = vld [vmem:[%s10673_s5 + $0x340] sm:$0xff] }
  0x2c   :  { %126 = vst [vmem:[#allocation2 + $0x148] sm:$0xff] %v125_v42  ;;  %v253_v42 = vld [vmem:[%s10673_s5 + $0x348] sm:$0xff] }
  0x2d   :  { %128 = vst [vmem:[#allocation2 + $0x150] sm:$0xff] %v127_v43  ;;  %v255_v43 = vld [vmem:[%s10673_s5 + $0x350] sm:$0xff] }
  0x2e   :  { %130 = vst [vmem:[#allocation2 + $0x158] sm:$0xff] %v129_v44  ;;  %v257_v44 = vld [vmem:[%s10673_s5 + $0x358] sm:$0xff] }
  0x2f   :  { %132 = vst [vmem:[#allocation2 + $0x160] sm:$0xff] %v131_v45  ;;  %v259_v45 = vld [vmem:[%s10673_s5 + $0x360] sm:$0xff] }
  0x30   :  { %134 = vst [vmem:[#allocation2 + $0x168] sm:$0xff] %v133_v46  ;;  %v261_v46 = vld [vmem:[%s10673_s5 + $0x368] sm:$0xff] }
  0x31   :  { %136 = vst [vmem:[#allocation2 + $0x170] sm:$0xff] %v135_v47  ;;  %v263_v47 = vld [vmem:[%s10673_s5 + $0x370] sm:$0xff] }
  0x32   :  { %138 = vst [vmem:[#allocation2 + $0x178] sm:$0xff] %v137_v48  ;;  %v265_v48 = vld [vmem:[%s10673_s5 + $0x378] sm:$0xff] }
  0x33   :  { %140 = vst [vmem:[#allocation2 + $0x180] sm:$0xff] %v139_v49  ;;  %v267_v49 = vld [vmem:[%s10673_s5 + $0x380] sm:$0xff] }
  0x34   :  { %142 = vst [vmem:[#allocation2 + $0x188] sm:$0xff] %v141_v50  ;;  %v269_v50 = vld [vmem:[%s10673_s5 + $0x388] sm:$0xff] }
  0x35   :  { %144 = vst [vmem:[#allocation2 + $0x190] sm:$0xff] %v143_v51  ;;  %v271_v51 = vld [vmem:[%s10673_s5 + $0x390] sm:$0xff] }
  0x36   :  { %146 = vst [vmem:[#allocation2 + $0x198] sm:$0xff] %v145_v52  ;;  %v273_v52 = vld [vmem:[%s10673_s5 + $0x398] sm:$0xff] }
  0x37   :  { %148 = vst [vmem:[#allocation2 + $0x1a0] sm:$0xff] %v147_v53  ;;  %v275_v53 = vld [vmem:[%s10673_s5 + $0x3a0] sm:$0xff] }
  0x38   :  { %150 = vst [vmem:[#allocation2 + $0x1a8] sm:$0xff] %v149_v54  ;;  %v277_v54 = vld [vmem:[%s10673_s5 + $0x3a8] sm:$0xff] }
  0x39   :  { %152 = vst [vmem:[#allocation2 + $0x1b0] sm:$0xff] %v151_v55  ;;  %v279_v55 = vld [vmem:[%s10673_s5 + $0x3b0] sm:$0xff] }
  0x3a   :  { %154 = vst [vmem:[#allocation2 + $0x1b8] sm:$0xff] %v153_v56  ;;  %v281_v56 = vld [vmem:[%s10673_s5 + $0x3b8] sm:$0xff] }
  0x3b   :  { %156 = vst [vmem:[#allocation2 + $0x1c0] sm:$0xff] %v155_v57  ;;  %v283_v57 = vld [vmem:[%s10673_s5 + $0x3c0] sm:$0xff] }
  0x3c   :  { %158 = vst [vmem:[#allocation2 + $0x1c8] sm:$0xff] %v157_v58  ;;  %v285_v58 = vld [vmem:[%s10673_s5 + $0x3c8] sm:$0xff] }
  0x3d   :  { %160 = vst [vmem:[#allocation2 + $0x1d0] sm:$0xff] %v159_v59  ;;  %v287_v59 = vld [vmem:[%s10673_s5 + $0x3d0] sm:$0xff] }
  0x3e   :  { %162 = vst [vmem:[#allocation2 + $0x1d8] sm:$0xff] %v161_v60  ;;  %v289_v60 = vld [vmem:[%s10673_s5 + $0x3d8] sm:$0xff] }
  0x3f   :  { %164 = vst [vmem:[#allocation2 + $0x1e0] sm:$0xff] %v163_v61  ;;  %v291_v61 = vld [vmem:[%s10673_s5 + $0x3e0] sm:$0xff] }
  0x40   :  { %166 = vst [vmem:[#allocation2 + $0x1e8] sm:$0xff] %v165_v62  ;;  %v293_v62 = vld [vmem:[%s10673_s5 + $0x3e8] sm:$0xff] }
  0x41   :  { %168 = vst [vmem:[#allocation2 + $0x1f0] sm:$0xff] %v167_v63  ;;  %v295_v63 = vld [vmem:[%s10673_s5 + $0x3f0] sm:$0xff] }
  0x42   :  { %170 = vst [vmem:[#allocation2 + $0x1f8] sm:$0xff] %v169_v0  ;;  %v297_v0 = vld [vmem:[%s10673_s5 + $0x3f8] sm:$0xff] }
  0x43   :  { %172 = vst [vmem:[#allocation2 + $0x200] sm:$0xff] %v171_v1  ;;  %v299_v1 = vld [vmem:[%s10673_s5 + $0x400] sm:$0xff] }
  0x44   :  { %174 = vst [vmem:[#allocation2 + $0x208] sm:$0xff] %v173_v2  ;;  %v301_v2 = vld [vmem:[%s10673_s5 + $0x408] sm:$0xff] }
  0x45   :  { %176 = vst [vmem:[#allocation2 + $0x210] sm:$0xff] %v175_v3  ;;  %v303_v3 = vld [vmem:[%s10673_s5 + $0x410] sm:$0xff] }
  0x46   :  { %178 = vst [vmem:[#allocation2 + $0x218] sm:$0xff] %v177_v4  ;;  %v305_v4 = vld [vmem:[%s10673_s5 + $0x418] sm:$0xff] }
  0x47   :  { %180 = vst [vmem:[#allocation2 + $0x220] sm:$0xff] %v179_v5  ;;  %v307_v5 = vld [vmem:[%s10673_s5 + $0x420] sm:$0xff] }
  0x48   :  { %182 = vst [vmem:[#allocation2 + $0x228] sm:$0xff] %v181_v6  ;;  %v309_v6 = vld [vmem:[%s10673_s5 + $0x428] sm:$0xff] }
  0x49   :  { %184 = vst [vmem:[#allocation2 + $0x230] sm:$0xff] %v183_v7  ;;  %v311_v7 = vld [vmem:[%s10673_s5 + $0x430] sm:$0xff] }
  0x4a   :  { %186 = vst [vmem:[#allocation2 + $0x238] sm:$0xff] %v185_v8  ;;  %v313_v8 = vld [vmem:[%s10673_s5 + $0x438] sm:$0xff] }
  0x4b   :  { %188 = vst [vmem:[#allocation2 + $0x240] sm:$0xff] %v187_v9  ;;  %v315_v9 = vld [vmem:[%s10673_s5 + $0x440] sm:$0xff] }
  0x4c   :  { %190 = vst [vmem:[#allocation2 + $0x248] sm:$0xff] %v189_v10  ;;  %v317_v10 = vld [vmem:[%s10673_s5 + $0x448] sm:$0xff] }
  0x4d   :  { %192 = vst [vmem:[#allocation2 + $0x250] sm:$0xff] %v191_v11  ;;  %v319_v11 = vld [vmem:[%s10673_s5 + $0x450] sm:$0xff] }
  0x4e   :  { %194 = vst [vmem:[#allocation2 + $0x258] sm:$0xff] %v193_v12  ;;  %v321_v12 = vld [vmem:[%s10673_s5 + $0x458] sm:$0xff] }
  0x4f   :  { %196 = vst [vmem:[#allocation2 + $0x260] sm:$0xff] %v195_v13  ;;  %v323_v13 = vld [vmem:[%s10673_s5 + $0x460] sm:$0xff] }
  0x50   :  { %198 = vst [vmem:[#allocation2 + $0x268] sm:$0xff] %v197_v14  ;;  %v325_v14 = vld [vmem:[%s10673_s5 + $0x468] sm:$0xff] }
  0x51   :  { %200 = vst [vmem:[#allocation2 + $0x270] sm:$0xff] %v199_v15  ;;  %v327_v15 = vld [vmem:[%s10673_s5 + $0x470] sm:$0xff] }
  0x52   :  { %202 = vst [vmem:[#allocation2 + $0x278] sm:$0xff] %v201_v16  ;;  %v329_v16 = vld [vmem:[%s10673_s5 + $0x478] sm:$0xff] }
  0x53   :  { %204 = vst [vmem:[#allocation2 + $0x280] sm:$0xff] %v203_v17  ;;  %v331_v17 = vld [vmem:[%s10673_s5 + $0x480] sm:$0xff] }
  0x54   :  { %206 = vst [vmem:[#allocation2 + $0x288] sm:$0xff] %v205_v18  ;;  %v333_v18 = vld [vmem:[%s10673_s5 + $0x488] sm:$0xff] }
  0x55   :  { %208 = vst [vmem:[#allocation2 + $0x290] sm:$0xff] %v207_v19  ;;  %v335_v19 = vld [vmem:[%s10673_s5 + $0x490] sm:$0xff] }
  0x56   :  { %210 = vst [vmem:[#allocation2 + $0x298] sm:$0xff] %v209_v20  ;;  %v337_v20 = vld [vmem:[%s10673_s5 + $0x498] sm:$0xff] }
  0x57   :  { %212 = vst [vmem:[#allocation2 + $0x2a0] sm:$0xff] %v211_v21  ;;  %v339_v21 = vld [vmem:[%s10673_s5 + $0x4a0] sm:$0xff] }
  0x58   :  { %214 = vst [vmem:[#allocation2 + $0x2a8] sm:$0xff] %v213_v22  ;;  %v341_v22 = vld [vmem:[%s10673_s5 + $0x4a8] sm:$0xff] }
  0x59   :  { %216 = vst [vmem:[#allocation2 + $0x2b0] sm:$0xff] %v215_v23  ;;  %v343_v23 = vld [vmem:[%s10673_s5 + $0x4b0] sm:$0xff] }
  0x5a   :  { %218 = vst [vmem:[#allocation2 + $0x2b8] sm:$0xff] %v217_v24  ;;  %v345_v24 = vld [vmem:[%s10673_s5 + $0x4b8] sm:$0xff] }
  0x5b   :  { %220 = vst [vmem:[#allocation2 + $0x2c0] sm:$0xff] %v219_v25  ;;  %v347_v25 = vld [vmem:[%s10673_s5 + $0x4c0] sm:$0xff] }
  0x5c   :  { %222 = vst [vmem:[#allocation2 + $0x2c8] sm:$0xff] %v221_v26  ;;  %v349_v26 = vld [vmem:[%s10673_s5 + $0x4c8] sm:$0xff] }
  0x5d   :  { %224 = vst [vmem:[#allocation2 + $0x2d0] sm:$0xff] %v223_v27  ;;  %v351_v27 = vld [vmem:[%s10673_s5 + $0x4d0] sm:$0xff] }
  0x5e   :  { %226 = vst [vmem:[#allocation2 + $0x2d8] sm:$0xff] %v225_v28  ;;  %v353_v28 = vld [vmem:[%s10673_s5 + $0x4d8] sm:$0xff] }
  0x5f   :  { %228 = vst [vmem:[#allocation2 + $0x2e0] sm:$0xff] %v227_v29  ;;  %v355_v29 = vld [vmem:[%s10673_s5 + $0x4e0] sm:$0xff] }
  0x60   :  { %230 = vst [vmem:[#allocation2 + $0x2e8] sm:$0xff] %v229_v30  ;;  %v357_v30 = vld [vmem:[%s10673_s5 + $0x4e8] sm:$0xff] }
  0x61   :  { %232 = vst [vmem:[#allocation2 + $0x2f0] sm:$0xff] %v231_v31  ;;  %v359_v31 = vld [vmem:[%s10673_s5 + $0x4f0] sm:$0xff] }
  0x62   :  { %234 = vst [vmem:[#allocation2 + $0x2f8] sm:$0xff] %v233_v32  ;;  %v361_v32 = vld [vmem:[%s10673_s5 + $0x4f8] sm:$0xff] }
  0x63   :  { %236 = vst [vmem:[#allocation2 + $0x300] sm:$0xff] %v235_v33  ;;  %v363_v33 = vld [vmem:[%s10673_s5 + $0x500] sm:$0xff] }
  0x64   :  { %238 = vst [vmem:[#allocation2 + $0x308] sm:$0xff] %v237_v34  ;;  %v365_v34 = vld [vmem:[%s10673_s5 + $0x508] sm:$0xff] }
  0x65   :  { %240 = vst [vmem:[#allocation2 + $0x310] sm:$0xff] %v239_v35 }
  0x66   :  { %242 = vst [vmem:[#allocation2 + $0x318] sm:$0xff] %v241_v36 }
  0x67   :  { %244 = vst [vmem:[#allocation2 + $0x320] sm:$0xff] %v243_v37 }
  0x68   :  { %246 = vst [vmem:[#allocation2 + $0x328] sm:$0xff] %v245_v38 }
  0x69   :  { %248 = vst [vmem:[#allocation2 + $0x330] sm:$0xff] %v247_v39 }
  0x6a   :  { %250 = vst [vmem:[#allocation2 + $0x338] sm:$0xff] %v249_v40 }
  0x6b   :  { %252 = vst [vmem:[#allocation2 + $0x340] sm:$0xff] %v251_v41 }
  0x6c   :  { %254 = vst [vmem:[#allocation2 + $0x348] sm:$0xff] %v253_v42 }
  0x6d   :  { %256 = vst [vmem:[#allocation2 + $0x350] sm:$0xff] %v255_v43 }
  0x6e   :  { %258 = vst [vmem:[#allocation2 + $0x358] sm:$0xff] %v257_v44 }
  0x6f   :  { %260 = vst [vmem:[#allocation2 + $0x360] sm:$0xff] %v259_v45 }
  0x70   :  { %262 = vst [vmem:[#allocation2 + $0x368] sm:$0xff] %v261_v46 }
  0x71   :  { %264 = vst [vmem:[#allocation2 + $0x370] sm:$0xff] %v263_v47 }
  0x72   :  { %266 = vst [vmem:[#allocation2 + $0x378] sm:$0xff] %v265_v48 }
  0x73   :  { %268 = vst [vmem:[#allocation2 + $0x380] sm:$0xff] %v267_v49 }
  0x74   :  { %270 = vst [vmem:[#allocation2 + $0x388] sm:$0xff] %v269_v50 }
  0x75   :  { %272 = vst [vmem:[#allocation2 + $0x390] sm:$0xff] %v271_v51 }
  0x76   :  { %274 = vst [vmem:[#allocation2 + $0x398] sm:$0xff] %v273_v52 }
  0x77   :  { %276 = vst [vmem:[#allocation2 + $0x3a0] sm:$0xff] %v275_v53 }
  0x78   :  { %278 = vst [vmem:[#allocation2 + $0x3a8] sm:$0xff] %v277_v54 }
  0x79   :  { %280 = vst [vmem:[#allocation2 + $0x3b0] sm:$0xff] %v279_v55 }
  0x7a   :  { %282 = vst [vmem:[#allocation2 + $0x3b8] sm:$0xff] %v281_v56 }
  0x7b   :  { %284 = vst [vmem:[#allocation2 + $0x3c0] sm:$0xff] %v283_v57 }
  0x7c   :  { %286 = vst [vmem:[#allocation2 + $0x3c8] sm:$0xff] %v285_v58 }
  0x7d   :  { %288 = vst [vmem:[#allocation2 + $0x3d0] sm:$0xff] %v287_v59 }
  0x7e   :  { %290 = vst [vmem:[#allocation2 + $0x3d8] sm:$0xff] %v289_v60 }
  0x7f   :  { %292 = vst [vmem:[#allocation2 + $0x3e0] sm:$0xff] %v291_v61 }
  0x80   :  { %294 = vst [vmem:[#allocation2 + $0x3e8] sm:$0xff] %v293_v62 }
  0x81   :  { %296 = vst [vmem:[#allocation2 + $0x3f0] sm:$0xff] %v295_v63 }
  0x82   :  { %298 = vst [vmem:[#allocation2 + $0x3f8] sm:$0xff] %v297_v0 }
  0x83   :  { %300 = vst [vmem:[#allocation2 + $0x400] sm:$0xff] %v299_v1 }
  0x84   :  { %302 = vst [vmem:[#allocation2 + $0x408] sm:$0xff] %v301_v2 }
  0x85   :  { %304 = vst [vmem:[#allocation2 + $0x410] sm:$0xff] %v303_v3 }
  0x86   :  { %306 = vst [vmem:[#allocation2 + $0x418] sm:$0xff] %v305_v4 }
  0x87   :  { %308 = vst [vmem:[#allocation2 + $0x420] sm:$0xff] %v307_v5 }
  0x88   :  { %310 = vst [vmem:[#allocation2 + $0x428] sm:$0xff] %v309_v6 }
  0x89   :  { %312 = vst [vmem:[#allocation2 + $0x430] sm:$0xff] %v311_v7 }
  0x8a   :  { %314 = vst [vmem:[#allocation2 + $0x438] sm:$0xff] %v313_v8 }
  0x8b   :  { %316 = vst [vmem:[#allocation2 + $0x440] sm:$0xff] %v315_v9 }
  0x8c   :  { %318 = vst [vmem:[#allocation2 + $0x448] sm:$0xff] %v317_v10 }
  0x8d   :  { %320 = vst [vmem:[#allocation2 + $0x450] sm:$0xff] %v319_v11 }
  0x8e   :  { %322 = vst [vmem:[#allocation2 + $0x458] sm:$0xff] %v321_v12 }
  0x8f   :  { %324 = vst [vmem:[#allocation2 + $0x460] sm:$0xff] %v323_v13 }
  0x90   :  { %326 = vst [vmem:[#allocation2 + $0x468] sm:$0xff] %v325_v14 }
  0x91   :  { %328 = vst [vmem:[#allocation2 + $0x470] sm:$0xff] %v327_v15 }
  0x92   :  { %330 = vst [vmem:[#allocation2 + $0x478] sm:$0xff] %v329_v16 }
  0x93   :  { %332 = vst [vmem:[#allocation2 + $0x480] sm:$0xff] %v331_v17 }
  0x94   :  { %334 = vst [vmem:[#allocation2 + $0x488] sm:$0xff] %v333_v18 }
  0x95   :  { %336 = vst [vmem:[#allocation2 + $0x490] sm:$0xff] %v335_v19 }
  0x96   :  { %338 = vst [vmem:[#allocation2 + $0x498] sm:$0xff] %v337_v20 }
  0x97   :  { %340 = vst [vmem:[#allocation2 + $0x4a0] sm:$0xff] %v339_v21 }
  0x98   :  { %342 = vst [vmem:[#allocation2 + $0x4a8] sm:$0xff] %v341_v22 }
  0x99   :  { %344 = vst [vmem:[#allocation2 + $0x4b0] sm:$0xff] %v343_v23 }
  0x9a   :  { %346 = vst [vmem:[#allocation2 + $0x4b8] sm:$0xff] %v345_v24 }
  0x9b   :  { %348 = vst [vmem:[#allocation2 + $0x4c0] sm:$0xff] %v347_v25 }
  0x9c   :  { %350 = vst [vmem:[#allocation2 + $0x4c8] sm:$0xff] %v349_v26 }
  0x9d   :  { %352 = vst [vmem:[#allocation2 + $0x4d0] sm:$0xff] %v351_v27 }
  0x9e   :  { %354 = vst [vmem:[#allocation2 + $0x4d8] sm:$0xff] %v353_v28 }
  0x9f   :  { %356 = vst [vmem:[#allocation2 + $0x4e0] sm:$0xff] %v355_v29 }
  0xa0   :  { %358 = vst [vmem:[#allocation2 + $0x4e8] sm:$0xff] %v357_v30 }
  0xa1   :  { %360 = vst [vmem:[#allocation2 + $0x4f0] sm:$0xff] %v359_v31 }
  0xa2   :  { %362 = vst [vmem:[#allocation2 + $0x4f8] sm:$0xff] %v361_v32 }
  0xa3   :  { %364 = vst [vmem:[#allocation2 + $0x500] sm:$0xff] %v363_v33 }
  0xa4   :  { %366 = vst [vmem:[#allocation2 + $0x508] sm:$0xff] %v365_v34 }
  0xa5   :  { %372 = vsyncadd [#allocation3], 20736  ;;  %v5381_v35 = vld [vmem:[%s10665_s1 + $0x1b0] sm:$0xf]  ;;  %v7358_v36 = vld [vmem:[%s10665_s1 + $0x1b4] sm:$0xf0] }
  0xa6   :  { %v5382_v37 = vor.u32 %v7358_v36, %v5381_v35  ;;  %v5445_v38 = vld [vmem:[%s10665_s1 + $0x230] sm:$0xf]  ;;  %v7374_v39 = vld [vmem:[%s10665_s1 + $0x234] sm:$0xf0]  ;;  %v7357_v43 = vld [vmem:[%s10665_s1 + $0x1b4] sm:$0xf] }
  0xa7   :  { %v5477_v40 = vld [vmem:[%s10665_s1 + $0x270] sm:$0xf]  ;;  %v5446_v41 = vor.u32 %v7374_v39, %v5445_v38  ;;  %v7382_v42 = vld [vmem:[%s10665_s1 + $0x274] sm:$0xf0]  ;;  %v5383_v44 = vld [vmem:[%s10665_s1 + $0x1b8] sm:$0xf0] }
  0xa8   :  { %786 = vmatpush.bf16.msra.mxu0 %v5382_v37  ;;  %v5478_v45 = vor.u32 %v7382_v42, %v5477_v40  ;;  %v5386_v46 = vor.u32 %v7357_v43, %v5383_v44  ;;  %v5373_v47 = vld [vmem:[%s10665_s1 + $0x1a0] sm:$0xf]  ;;  %v7356_v48 = vld [vmem:[%s10665_s1 + $0x1a4] sm:$0xf0]  ;;  %v7355_v56 = vld [vmem:[%s10665_s1 + $0x1a4] sm:$0xf] }
  0xa9   :  { %v5437_v49 = vld [vmem:[%s10665_s1 + $0x220] sm:$0xf]  ;;  %820 = vmatpush.bf16.msra.mxu1 %v5446_v41  ;;  %v5374_v50 = vor.u32 %v7356_v48, %v5373_v47  ;;  %v7372_v51 = vld [vmem:[%s10665_s1 + $0x224] sm:$0xf0]  ;;  %v5375_v57 = vld [vmem:[%s10665_s1 + $0x1a8] sm:$0xf0] }
  0xaa   :  { %v5469_v52 = vld [vmem:[%s10665_s1 + $0x260] sm:$0xf]  ;;  %v7380_v53 = vld [vmem:[%s10665_s1 + $0x264] sm:$0xf0]  ;;  %858 = vmatpush.bf16.msra.mxu2 %v5478_v45  ;;  %888 = vmatpush.bf16.msra.mxu3 %v5386_v46  ;;  %v5438_v54 = vor.u32 %v7372_v51, %v5437_v49  ;;  %v5365_v58 = vld [vmem:[%s10665_s1 + $0x190] sm:$0xf]  ;;  %v5378_v59 = vor.u32 %v7355_v56, %v5375_v57 }
  0xab   :  { %v5470_v55 = vor.u32 %v7380_v53, %v5469_v52  ;;  %v7354_v60 = vld [vmem:[%s10665_s1 + $0x194] sm:$0xf0]  ;;  %v5429_v61 = vld [vmem:[%s10665_s1 + $0x210] sm:$0xf]  ;;  %v7353_v2 = vld [vmem:[%s10665_s1 + $0x194] sm:$0xf] }
  0xac   :  { %v7370_v62 = vld [vmem:[%s10665_s1 + $0x214] sm:$0xf0]  ;;  %787 = vmatpush.bf16.msra.mxu0 %v5374_v50  ;;  %v5366_v63 = vor.u32 %v7354_v60, %v5365_v58  ;;  %v5461_v0 = vld [vmem:[%s10665_s1 + $0x250] sm:$0xf]  ;;  %v5367_v4 = vld [vmem:[%s10665_s1 + $0x198] sm:$0xf0] }
  0xad   :  { %v7378_v1 = vld [vmem:[%s10665_s1 + $0x254] sm:$0xf0]  ;;  %821 = vmatpush.bf16.msra.mxu1 %v5438_v54  ;;  %v5430_v3 = vor.u32 %v7370_v62, %v5429_v61  ;;  %v5357_v5 = vld [vmem:[%s10665_s1 + $0x180] sm:$0xf]  ;;  %v7352_v6 = vld [vmem:[%s10665_s1 + $0x184] sm:$0xf0]  ;;  %v5370_v8 = vor.u32 %v7353_v2, %v5367_v4 }
  0xae   :  { %859 = vmatpush.bf16.msra.mxu2 %v5470_v55  ;;  %889 = vmatpush.bf16.msra.mxu3 %v5378_v59  ;;  %v5462_v7 = vor.u32 %v7378_v1, %v5461_v0  ;;  %v5421_v9 = vld [vmem:[%s10665_s1 + $0x200] sm:$0xf]  ;;  %v7368_v10 = vld [vmem:[%s10665_s1 + $0x204] sm:$0xf0]  ;;  %v7351_v13 = vld [vmem:[%s10665_s1 + $0x184] sm:$0xf]  ;;  %v5358_v15 = vor.u32 %v7352_v6, %v5357_v5 }
  0xaf   :  { %v5453_v11 = vld [vmem:[%s10665_s1 + $0x240] sm:$0xf]  ;;  %v7376_v12 = vld [vmem:[%s10665_s1 + $0x244] sm:$0xf0]  ;;  %v5359_v14 = vld [vmem:[%s10665_s1 + $0x188] sm:$0xf0]  ;;  %v5422_v16 = vor.u32 %v7368_v10, %v5421_v9 }
  0xb0   :  { %788 = vmatpush.bf16.msra.mxu0 %v5366_v63  ;;  %v5273_v17 = vld [vmem:[%s10664_s0 + $0x80] sm:$0xf]  ;;  %v5349_v18 = vld [vmem:[%s10665_s1 + $0x170] sm:$0xf]  ;;  %v7350_v19 = vld [vmem:[%s10665_s1 + $0x174] sm:$0xf0]  ;;  %v5454_v20 = vor.u32 %v7376_v12, %v5453_v11  ;;  %v5362_v21 = vor.u32 %v7351_v13, %v5359_v14 }
  0xb1   :  { %822 = vmatpush.bf16.msra.mxu1 %v5430_v3  ;;  %v7330_v22 = vld [vmem:[%s10664_s0 + $0x88] sm:$0xf0]  ;;  %v5413_v23 = vld [vmem:[%s10665_s1 + $0x1f0] sm:$0xf]  ;;  %v7366_v24 = vld [vmem:[%s10665_s1 + $0x1f4] sm:$0xf0]  ;;  %v5350_v27 = vor.u32 %v7350_v19, %v5349_v18 }
  0xb2   :  { %860 = vmatpush.bf16.msra.mxu2 %v5462_v7  ;;  %890 = vmatpush.bf16.msra.mxu3 %v5370_v8  ;;  %v7349_v25 = vld [vmem:[%s10665_s1 + $0x174] sm:$0xf]  ;;  %v5351_v26 = vld [vmem:[%s10665_s1 + $0x178] sm:$0xf0]  ;;  %v8381_v28 = vor.u32 %v7330_v22, %v5273_v17  ;;  %v5414_v29 = vor.u32 %v7366_v24, %v5413_v23  ;;  %v5341_v30 = vld [vmem:[%s10665_s1 + $0x160] sm:$0xf] }
  0xb3   :  { %v7348_v31 = vld [vmem:[%s10665_s1 + $0x164] sm:$0xf0]  ;;  %vm770_vm0 = vcmask 523264   ;;  %v5354_v32 = vor.u32 %v7349_v25, %v5351_v26  ;;  %v5405_v33 = vld [vmem:[%s10665_s1 + $0x1e0] sm:$0xf]  ;;  %vm2139_vm1 = vcmask 654336  }
  0xb4   :  { %789 = vmatpush.bf16.msra.mxu0 %v5358_v15  ;;  %v7364_v34 = vld [vmem:[%s10665_s1 + $0x1e4] sm:$0xf0]  ;;  %v7347_v35 = vld [vmem:[%s10665_s1 + $0x164] sm:$0xf]  ;;  %v5343_v36 = vld [vmem:[%s10665_s1 + $0x168] sm:$0xf0]  ;;  %v5342_v37 = vor.u32 %v7348_v31, %v5341_v30 }
  0xb5   :  { %823 = vmatpush.bf16.msra.mxu1 %v5422_v16  ;;  %v5406_v38 = vor.u32 %v7364_v34, %v5405_v33  ;;  %v5333_v39 = vld [vmem:[%s10665_s1 + $0x150] sm:$0xf]  ;;  %v7346_v40 = vld [vmem:[%s10665_s1 + $0x154] sm:$0xf0]  ;;  %v5346_v41 = vor.u32 %v7347_v35, %v5343_v36  ;;  %v7345_v44 = vld [vmem:[%s10665_s1 + $0x154] sm:$0xf] }
  0xb6   :  { %861 = vmatpush.bf16.msra.mxu2 %v5454_v20  ;;  %891 = vmatpush.bf16.msra.mxu3 %v5362_v21  ;;  %v5397_v42 = vld [vmem:[%s10665_s1 + $0x1d0] sm:$0xf]  ;;  %v7362_v43 = vld [vmem:[%s10665_s1 + $0x1d4] sm:$0xf0]  ;;  %v5335_v45 = vld [vmem:[%s10665_s1 + $0x158] sm:$0xf0]  ;;  %v5334_v46 = vor.u32 %v7346_v40, %v5333_v39 }
  0xb7   :  { %v5398_v47 = vor.u32 %v7362_v43, %v5397_v42  ;;  %v5325_v48 = vld [vmem:[%s10665_s1 + $0x140] sm:$0xf]  ;;  %v7344_v49 = vld [vmem:[%s10665_s1 + $0x144] sm:$0xf0]  ;;  %v5338_v50 = vor.u32 %v7345_v44, %v5335_v45  ;;  %v7343_v53 = vld [vmem:[%s10665_s1 + $0x144] sm:$0xf] }
  0xb8   :  { %790 = vmatpush.bf16.msra.mxu0 %v5350_v27  ;;  %v5389_v51 = vld [vmem:[%s10665_s1 + $0x1c0] sm:$0xf]  ;;  %v7360_v52 = vld [vmem:[%s10665_s1 + $0x1c4] sm:$0xf0]  ;;  %v5327_v54 = vld [vmem:[%s10665_s1 + $0x148] sm:$0xf0]  ;;  %v5326_v55 = vor.u32 %v7344_v49, %v5325_v48 }
  0xb9   :  { %5483 = vmatmul.msk.bf16.vlgmr.msra.gmra.mxu2 %vm770_vm0, %v8381_v28  ;;  %824 = vmatpush.bf16.msra.mxu1 %v5414_v29  ;;  %v5265_v56 = vld [vmem:[%s10664_s0 + $0x78] sm:$0xf]  ;;  %v7329_v57 = vld [vmem:[%s10664_s0 + $0x80] sm:$0xf0]  ;;  %v5390_v58 = vor.u32 %v7360_v52, %v5389_v51  ;;  %v7328_v59 = vld [vmem:[%s10664_s0 + $0x7c] sm:$0xf]  ;;  %v5330_v61 = vor.u32 %v7343_v53, %v5327_v54 }
  0xba   :  { %892 = vmatpush.bf16.msra.mxu3 %v5354_v32  ;;  %v5267_v60 = vld [vmem:[%s10664_s0 + $0x84] sm:$0xf0]  ;;  %v5285_v62 = vld [vmem:[%s10664_s0 + $0x98] sm:$0xf]  ;;  %v7333_v63 = vld [vmem:[%s10664_s0 + $0xa0] sm:$0xf0]  ;;  %v5266_v0 = vor.u32 %v7329_v57, %v5265_v56 }
  0xbb   :  { %v8457_v1 = vor.u32 %v7328_v59, %v5267_v60  ;;  %v8459_v2 = vor.u32 %v7333_v63, %v5285_v62  ;;  %v7373_v3 = vld [vmem:[%s10665_s1 + $0x234] sm:$0xf]  ;;  %v5447_v4 = vld [vmem:[%s10665_s1 + $0x238] sm:$0xf0]  ;;  %v7371_v6 = vld [vmem:[%s10665_s1 + $0x224] sm:$0xf] }
  0xbc   :  { %791 = vmatpush.bf16.msra.mxu0 %v5342_v37  ;;  %v5450_v5 = vor.u32 %v7373_v3, %v5447_v4  ;;  %v5439_v7 = vld [vmem:[%s10665_s1 + $0x228] sm:$0xf0]  ;;  %v7369_v9 = vld [vmem:[%s10665_s1 + $0x214] sm:$0xf]  ;;  %v5431_v10 = vld [vmem:[%s10665_s1 + $0x218] sm:$0xf0] }
  0xbd   :  { %825 = vmatpush.bf16.msra.mxu1 %v5406_v38  ;;  %v5442_v8 = vor.u32 %v7371_v6, %v5439_v7  ;;  %v5434_v11 = vor.u32 %v7369_v9, %v5431_v10  ;;  %v7367_v12 = vld [vmem:[%s10665_s1 + $0x204] sm:$0xf]  ;;  %v5423_v13 = vld [vmem:[%s10665_s1 + $0x208] sm:$0xf0]  ;;  %v5277_v14 = vld [vmem:[%s10664_s0 + $0x90] sm:$0xf] }
  0xbe   :  { %893 = vmatpush.bf16.msra.mxu3 %v5346_v41  ;;  %922 = vmatpush.bf16.msrb.mxu2 %v5450_v5  ;;  %v7332_v15 = vld [vmem:[%s10664_s0 + $0x98] sm:$0xf0]  ;;  %v7331_v16 = vld [vmem:[%s10664_s0 + $0x94] sm:$0xf]  ;;  %v5279_v17 = vld [vmem:[%s10664_s0 + $0x9c] sm:$0xf0]  ;;  %v5426_v20 = vor.u32 %v7367_v12, %v5423_v13 }
  0xbf   :  { %v5297_v18 = vld [vmem:[%s10664_s0 + $0xb0] sm:$0xf]  ;;  %v7336_v19 = vld [vmem:[%s10664_s0 + $0xb8] sm:$0xf0]  ;;  %v5278_v21 = vor.u32 %v7332_v15, %v5277_v14  ;;  %v8506_v22 = vor.u32 %v7331_v16, %v5279_v17  ;;  %v7365_v24 = vld [vmem:[%s10665_s1 + $0x1f4] sm:$0xf] }
  0xc0   :  { %792 = vmatpush.bf16.msra.mxu0 %v5334_v46  ;;  %v8508_v23 = vor.u32 %v7336_v19, %v5297_v18  ;;  %v5415_v25 = vld [vmem:[%s10665_s1 + $0x1f8] sm:$0xf0]  ;;  %v5611_v27 = vld [vmem:[%s10665_s1 + $0x70] sm:$0xf]  ;;  %v7303_v29 = vld [vmem:[%s10665_s1 + $0x74] sm:$0xf0] }
  0xc1   :  { %826 = vmatpush.bf16.msra.mxu1 %v5398_v47  ;;  %v5418_v26 = vor.u32 %v7365_v24, %v5415_v25  ;;  %v5675_v30 = vld [vmem:[%s10665_s1 + $0xf0] sm:$0xf]  ;;  %v5612_v31 = vor.u32 %v7303_v29, %v5611_v27  ;;  %v7319_v32 = vld [vmem:[%s10665_s1 + $0xf4] sm:$0xf0]  ;;  %v7363_v33 = vld [vmem:[%s10665_s1 + $0x1e4] sm:$0xf] }
  0xc2   :  { %894 = vmatpush.bf16.msra.mxu3 %v5338_v50  ;;  %923 = vmatpush.bf16.msrb.mxu2 %v5442_v8  ;;  %v5407_v34 = vld [vmem:[%s10665_s1 + $0x1e8] sm:$0xf0]  ;;  %v5676_v35 = vor.u32 %v7319_v32, %v5675_v30  ;;  %v5603_v37 = vld [vmem:[%s10665_s1 + $0x60] sm:$0xf]  ;;  %v7301_v38 = vld [vmem:[%s10665_s1 + $0x64] sm:$0xf0] }
  0xc3   :  { %v5410_v36 = vor.u32 %v7363_v33, %v5407_v34  ;;  %v5667_v39 = vld [vmem:[%s10665_s1 + $0xe0] sm:$0xf]  ;;  %v5604_v40 = vor.u32 %v7301_v38, %v5603_v37  ;;  %v7317_v41 = vld [vmem:[%s10665_s1 + $0xe4] sm:$0xf0]  ;;  %v7361_v42 = vld [vmem:[%s10665_s1 + $0x1d4] sm:$0xf] }
  0xc4   :  { %793 = vmatpush.bf16.msra.mxu0 %v5326_v55  ;;  %v5399_v43 = vld [vmem:[%s10665_s1 + $0x1d8] sm:$0xf0]  ;;  %v5668_v44 = vor.u32 %v7317_v41, %v5667_v39  ;;  %v5595_v45 = vld [vmem:[%s10665_s1 + $0x50] sm:$0xf]  ;;  %v7299_v46 = vld [vmem:[%s10665_s1 + $0x54] sm:$0xf0] }
  0xc5   :  { %827 = vmatpush.bf16.msra.mxu1 %v5390_v58  ;;  %v5659_v47 = vld [vmem:[%s10665_s1 + $0xd0] sm:$0xf]  ;;  %v7315_v48 = vld [vmem:[%s10665_s1 + $0xd4] sm:$0xf0]  ;;  %v5289_v49 = vld [vmem:[%s10664_s0 + $0xa8] sm:$0xf]  ;;  %v5402_v50 = vor.u32 %v7361_v42, %v5399_v43  ;;  %v5596_v54 = vor.u32 %v7299_v46, %v5595_v45 }
  0xc6   :  { %895 = vmatpush.bf16.msra.mxu3 %v5330_v61  ;;  %924 = vmatpush.bf16.msrb.mxu2 %v5434_v11  ;;  %v7381_v51 = vld [vmem:[%s10665_s1 + $0x274] sm:$0xf]  ;;  %v5479_v52 = vld [vmem:[%s10665_s1 + $0x278] sm:$0xf0]  ;;  %v7359_v55 = vld [vmem:[%s10665_s1 + $0x1c4] sm:$0xf]  ;;  %v5660_v59 = vor.u32 %v7315_v48, %v5659_v47 }
  0xc7   :  { %794 = vmatmul.bf16.vlgmr.msra.gmra.mxu0 %v5266_v0  ;;  %v7335_v53 = vld [vmem:[%s10664_s0 + $0xb0] sm:$0xf0]  ;;  %v5391_v56 = vld [vmem:[%s10665_s1 + $0x1c8] sm:$0xf0]  ;;  %v5482_v57 = vor.u32 %v7381_v51, %v5479_v52  ;;  %v5587_v60 = vld [vmem:[%s10665_s1 + $0x40] sm:$0xf] }
  0xc8   :  { %828 = vmatmul.bf16.vlgmr.msra.gmra.mxu1 %v8457_v1  ;;  %v7334_v58 = vld [vmem:[%s10664_s0 + $0xac] sm:$0xf]  ;;  %v7297_v61 = vld [vmem:[%s10665_s1 + $0x44] sm:$0xf0]  ;;  %v5291_v62 = vld [vmem:[%s10664_s0 + $0xb4] sm:$0xf0]  ;;  %v5394_v5 = vor.u32 %v7359_v55, %v5391_v56  ;;  %v5290_v6 = vor.u32 %v7335_v53, %v5289_v49 }
  0xc9   :  { %5484 = vmatmul.msk.bf16.gmra.mxu2 %vm770_vm0, %v8459_v2  ;;  %896 = vmatmul.bf16.vlgmr.msra.gmra.mxu3 %v5266_v0  ;;  %v5651_v63 = vld [vmem:[%s10665_s1 + $0xc0] sm:$0xf]  ;;  %v7313_v0 = vld [vmem:[%s10665_s1 + $0xc4] sm:$0xf0]  ;;  %v7339_v4 = vld [vmem:[%s10664_s0 + $0xd0] sm:$0xf0]  ;;  %v5588_v7 = vor.u32 %v7297_v61, %v5587_v60  ;;  %v8609_v8 = vor.u32 %v7334_v58, %v5291_v62 }
  0xca   :  { %925 = vmatpush.bf16.msrb.mxu2 %v5426_v20  ;;  %1280 = vmatpush.bf16.msrb.mxu1 %v5612_v31  ;;  %v5309_v3 = vld [vmem:[%s10664_s0 + $0xc8] sm:$0xf]  ;;  %v5652_v9 = vor.u32 %v7313_v0, %v5651_v63  ;;  %v5579_v11 = vld [vmem:[%s10665_s1 + $0x30] sm:$0xf]  ;;  %v7295_v12 = vld [vmem:[%s10665_s1 + $0x34] sm:$0xf0] }
  0xcb   :  { %1314 = vmatpush.bf16.msrb.mxu3 %v5676_v35  ;;  %960 = vmatpush.bf16.msrb.mxu0 %v5482_v57  ;;  %v8611_v10 = vor.u32 %v7339_v4, %v5309_v3  ;;  %v5643_v13 = vld [vmem:[%s10665_s1 + $0xb0] sm:$0xf]  ;;  %v5580_v14 = vor.u32 %v7295_v12, %v5579_v11  ;;  %v7311_v15 = vld [vmem:[%s10665_s1 + $0xb4] sm:$0xf0]  ;;  %v7379_v17 = vld [vmem:[%s10665_s1 + $0x264] sm:$0xf] }
  0xcc   :  { %v5644_v16 = vor.u32 %v7311_v15, %v5643_v13  ;;  %v5471_v18 = vld [vmem:[%s10665_s1 + $0x268] sm:$0xf0]  ;;  %v5571_v19 = vld [vmem:[%s10665_s1 + $0x20] sm:$0xf]  ;;  %v7309_v25 = vld [vmem:[%s10665_s1 + $0xa4] sm:$0xf0] }
  0xcd   :  { %v5474_v20 = vor.u32 %v7379_v17, %v5471_v18  ;;  %v5635_v24 = vld [vmem:[%s10665_s1 + $0xa0] sm:$0xf]  ;;  %v7377_v27 = vld [vmem:[%s10665_s1 + $0x254] sm:$0xf]  ;;  %v5463_v29 = vld [vmem:[%s10665_s1 + $0x258] sm:$0xf0] }
  0xce   :  { %926 = vmatpush.bf16.msrb.mxu2 %v5418_v26  ;;  %1281 = vmatpush.bf16.msrb.mxu1 %v5604_v40  ;;  %v5636_v30 = vor.u32 %v7309_v25, %v5635_v24  ;;  %v5466_v31 = vor.u32 %v7377_v27, %v5463_v29  ;;  %v5563_v32 = vld [vmem:[%s10665_s1 + $0x10] sm:$0xf]  ;;  %v7291_v33 = vld [vmem:[%s10665_s1 + $0x14] sm:$0xf0]  ;;  %v5455_v37 = vld [vmem:[%s10665_s1 + $0x248] sm:$0xf0] }
  0xcf   :  { %1315 = vmatpush.bf16.msrb.mxu3 %v5668_v44  ;;  %961 = vmatpush.bf16.msrb.mxu0 %v5474_v20  ;;  %v5627_v34 = vld [vmem:[%s10665_s1 + $0x90] sm:$0xf]  ;;  %v7307_v35 = vld [vmem:[%s10665_s1 + $0x94] sm:$0xf0]  ;;  %v5301_v38 = vld [vmem:[%s10664_s0 + $0xc0] sm:$0xf]  ;;  %v5564_v40 = vor.u32 %v7291_v33, %v5563_v32 }
  0xd0   :  { %v7338_v39 = vld [vmem:[%s10664_s0 + $0xc8] sm:$0xf0]  ;;  %v7337_v41 = vld [vmem:[%s10664_s0 + $0xc4] sm:$0xf]  ;;  %v5628_v42 = vor.u32 %v7307_v35, %v5627_v34  ;;  %v5555_v44 = vld [vmem:[%s10665_s1] sm:$0xf] }
  0xd1   :  { %v7289_v45 = vld [vmem:[%s10665_s1 + $0x4] sm:$0xf0]  ;;  %v5303_v46 = vld [vmem:[%s10664_s0 + $0xcc] sm:$0xf0]  ;;  %v5619_v47 = vld [vmem:[%s10665_s1 + $0x80] sm:$0xf]  ;;  %v5302_v51 = vor.u32 %v7338_v39, %v5301_v38 }
  0xd2   :  { %927 = vmatpush.bf16.msrb.mxu2 %v5410_v36  ;;  %1282 = vmatpush.bf16.msrb.mxu1 %v5596_v54  ;;  %v7375_v36 = vld [vmem:[%s10665_s1 + $0x244] sm:$0xf]  ;;  %v7305_v48 = vld [vmem:[%s10665_s1 + $0x84] sm:$0xf0]  ;;  %v5321_v49 = vld [vmem:[%s10664_s0 + $0xe0] sm:$0xf]  ;;  %v5556_v52 = vor.u32 %v7289_v45, %v5555_v44  ;;  %v8700_v53 = vor.u32 %v7337_v41, %v5303_v46 }
  0xd3   :  { %1316 = vmatpush.bf16.msrb.mxu3 %v5660_v59  ;;  %962 = vmatpush.bf16.msrb.mxu0 %v5466_v31  ;;  %v5458_v43 = vor.u32 %v7375_v36, %v5455_v37  ;;  %v5620_v54 = vor.u32 %v7305_v48, %v5619_v47  ;;  %v5313_v56 = vld [vmem:[%s10664_s0 + $0xd8] sm:$0xf]  ;;  %v7341_v57 = vld [vmem:[%s10664_s0 + $0xe0] sm:$0xf0]  ;;  %v7340_v58 = vld [vmem:[%s10664_s0 + $0xdc] sm:$0xf] }
  0xd4   :  { %v5315_v59 = vld [vmem:[%s10664_s0 + $0xe4] sm:$0xf0]  ;;  %v5314_v60 = vor.u32 %v7341_v57, %v5313_v56  ;;  %v5495_v62 = vld [vmem:[%s10664_s0] sm:$0xf]  ;;  %v7274_v63 = vld [vmem:[%s10664_s0 + $0x8] sm:$0xf0] }
  0xd5   :  { %v8719_v61 = vor.u32 %v7340_v58, %v5315_v59  ;;  %v7273_v0 = vld [vmem:[%s10664_s0 + $0x4] sm:$0xf]  ;;  %v5497_v3 = vld [vmem:[%s10664_s0 + $0xc] sm:$0xf0]  ;;  %v8735_v4 = vor.u32 %v7274_v63, %v5495_v62  ;;  %v7327_v12 = vld [vmem:[%s10665_s1 + $0x134] sm:$0xf0] }
  0xd6   :  { %928 = vmatpush.bf16.msrb.mxu2 %v5402_v50  ;;  %1283 = vmatpush.bf16.msrb.mxu1 %v5588_v7  ;;  %v7342_v50 = vld [vmem:[%s10664_s0 + $0xe8] sm:$0xf0]  ;;  %v7276_v7 = vld [vmem:[%s10664_s0 + $0x1c] sm:$0xf]  ;;  %v5707_v11 = vld [vmem:[%s10665_s1 + $0x130] sm:$0xf] }
  0xd7   :  { %799 = vmatmul.bf16.gmra.mxu0 %v5278_v21  ;;  %1317 = vmatpush.bf16.msrb.mxu3 %v5652_v9  ;;  %v8702_v55 = vor.u32 %v7342_v50, %v5321_v49  ;;  %v5708_v13 = vor.u32 %v7327_v12, %v5707_v11  ;;  %v5613_v15 = vld [vmem:[%s10665_s1 + $0x78] sm:$0xf0]  ;;  %v7300_v20 = vld [vmem:[%s10665_s1 + $0x64] sm:$0xf]  ;;  %v5605_v24 = vld [vmem:[%s10665_s1 + $0x68] sm:$0xf0] }
  0xd8   :  { %833 = vmatmul.bf16.gmra.mxu1 %v8506_v22  ;;  %963 = vmatpush.bf16.msrb.mxu0 %v5458_v43  ;;  %v5677_v17 = vld [vmem:[%s10665_s1 + $0xf8] sm:$0xf0]  ;;  %v5608_v25 = vor.u32 %v7300_v20, %v5605_v24  ;;  %v5669_v27 = vld [vmem:[%s10665_s1 + $0xe8] sm:$0xf0]  ;;  %v7323_v31 = vld [vmem:[%s10665_s1 + $0x114] sm:$0xf0] }
  0xd9   :  { %5485 = vmatmul.msk.bf16.gmra.mxu2 %vm770_vm0, %v8508_v23  ;;  %901 = vmatmul.bf16.gmra.mxu3 %v5278_v21  ;;  %v7293_v21 = vld [vmem:[%s10665_s1 + $0x24] sm:$0xf0]  ;;  %v7298_v32 = vld [vmem:[%s10665_s1 + $0x54] sm:$0xf]  ;;  %v5597_v34 = vld [vmem:[%s10665_s1 + $0x58] sm:$0xf0] }
  0xda   :  { %929 = vmatpush.bf16.msrb.mxu2 %v5394_v5  ;;  %1284 = vmatpush.bf16.msrb.mxu1 %v5580_v14  ;;  %v5572_v26 = vor.u32 %v7293_v21, %v5571_v19  ;;  %v8737_v5 = vor.u32 %v7273_v0, %v5497_v3  ;;  %v7302_v14 = vld [vmem:[%s10665_s1 + $0x74] sm:$0xf]  ;;  %v5699_v19 = vld [vmem:[%s10665_s1 + $0x120] sm:$0xf]  ;;  %v5519_v35 = vld [vmem:[%s10664_s0 + $0x30] sm:$0xf]  ;;  %v5600_v36 = vor.u32 %v7298_v32, %v5597_v34 }
  0xdb   :  { %1318 = vmatpush.bf16.msrb.mxu3 %v5644_v16  ;;  %v7318_v16 = vld [vmem:[%s10665_s1 + $0xf4] sm:$0xf]  ;;  %v7280_v37 = vld [vmem:[%s10664_s0 + $0x38] sm:$0xf0]  ;;  %v5521_v41 = vld [vmem:[%s10664_s0 + $0x3c] sm:$0xf0] }
  0xdc   :  { %v5680_v18 = vor.u32 %v7318_v16, %v5677_v17  ;;  %v7314_v38 = vld [vmem:[%s10665_s1 + $0xd4] sm:$0xf]  ;;  %v5661_v39 = vld [vmem:[%s10665_s1 + $0xd8] sm:$0xf0]  ;;  %v5683_v43 = vld [vmem:[%s10665_s1 + $0x100] sm:$0xf]  ;;  %v8840_v46 = vor.u32 %v7280_v37, %v5519_v35 }
  0xdd   :  { %v7321_v44 = vld [vmem:[%s10665_s1 + $0x104] sm:$0xf0]  ;;  %v7296_v45 = vld [vmem:[%s10665_s1 + $0x44] sm:$0xf]  ;;  %v5589_v48 = vld [vmem:[%s10665_s1 + $0x48] sm:$0xf0] }
  0xde   :  { %1285 = vmatpush.bf16.msrb.mxu1 %v5572_v26  ;;  %1352 = vmatpush.bf16.msra.mxu2 %v5708_v13  ;;  %v7316_v26 = vld [vmem:[%s10665_s1 + $0xe4] sm:$0xf]  ;;  %v5684_v47 = vor.u32 %v7321_v44, %v5683_v43  ;;  %v5592_v50 = vor.u32 %v7296_v45, %v5589_v48  ;;  %v7294_v56 = vld [vmem:[%s10665_s1 + $0x34] sm:$0xf]  ;;  %v5581_v57 = vld [vmem:[%s10665_s1 + $0x38] sm:$0xf0] }
  0xdf   :  { %1319 = vmatpush.bf16.msrb.mxu3 %v5636_v30  ;;  %v5672_v29 = vor.u32 %v7316_v26, %v5669_v27  ;;  %v5691_v30 = vld [vmem:[%s10665_s1 + $0x110] sm:$0xf]  ;;  %v7326_v58 = vld [vmem:[%s10665_s1 + $0x134] sm:$0xf]  ;;  %v5709_v59 = vld [vmem:[%s10665_s1 + $0x138] sm:$0xf0] }
  0xe0   :  { %v5692_v33 = vor.u32 %v7323_v31, %v5691_v30  ;;  %v5645_v62 = vld [vmem:[%s10665_s1 + $0xb8] sm:$0xf0]  ;;  %v5712_v63 = vor.u32 %v7326_v58, %v5709_v59  ;;  %v5573_v3 = vld [vmem:[%s10665_s1 + $0x28] sm:$0xf0]  ;;  %v7308_v12 = vld [vmem:[%s10665_s1 + $0xa4] sm:$0xf] }
  0xe1   :  { %v5637_v13 = vld [vmem:[%s10665_s1 + $0xa8] sm:$0xf0]  ;;  %v7322_v16 = vld [vmem:[%s10665_s1 + $0x114] sm:$0xf]  ;;  %v5693_v17 = vld [vmem:[%s10665_s1 + $0x118] sm:$0xf0] }
  0xe2   :  { %1286 = vmatpush.bf16.msrb.mxu1 %v5564_v40  ;;  %v7279_v40 = vld [vmem:[%s10664_s0 + $0x34] sm:$0xf]  ;;  %v5629_v24 = vld [vmem:[%s10665_s1 + $0x98] sm:$0xf0]  ;;  %v5533_v26 = vld [vmem:[%s10664_s0 + $0x54] sm:$0xf0] }
  0xe3   :  { %1320 = vmatpush.bf16.msrb.mxu3 %v5628_v42  ;;  %v5664_v42 = vor.u32 %v7314_v38, %v5661_v39  ;;  %v8845_v49 = vor.u32 %v7279_v40, %v5521_v41  ;;  %v7283_v20 = vld [vmem:[%s10664_s0 + $0x50] sm:$0xf0]  ;;  %v5557_v30 = vld [vmem:[%s10665_s1 + $0x8] sm:$0xf0]  ;;  %v7320_v31 = vld [vmem:[%s10665_s1 + $0x104] sm:$0xf] }
  0xe4   :  { %v7304_v39 = vld [vmem:[%s10665_s1 + $0x84] sm:$0xf]  ;;  %v5621_v40 = vld [vmem:[%s10665_s1 + $0x88] sm:$0xf0]  ;;  %v7275_v58 = vld [vmem:[%s10664_s0 + $0x10] sm:$0xf0] }
  0xe5   :  { %v5624_v43 = vor.u32 %v7304_v39, %v5621_v40  ;;  %v7281_v39 = vld [vmem:[%s10664_s0 + $0x40] sm:$0xf0]  ;;  %v5877_v40 = vld [vmem:[%s10665_s1 + $0x2c0] sm:$0xf]  ;;  %vm2426_vm2 = vcmask 1043456   ;;  %vm2419_vm3 = vcmask 195584  }
  0xe6   :  { %1287 = vmatpush.bf16.msrb.mxu1 %v5556_v52  ;;  %v5653_v52 = vld [vmem:[%s10665_s1 + $0xc8] sm:$0xf0]  ;;  %vm2315_vm4 = vcmask 1046528   ;;  %vm2726_vm5 = vcmask 1045504   ;;  %vm2950_vm6 = vcmask 1044480  }
  0xe7   :  { %804 = vmatmul.bf16.gmra.mxu0 %v5290_v6  ;;  %1321 = vmatpush.bf16.msrb.mxu3 %v5620_v54 }
  0xe8   :  { %838 = vmatmul.bf16.gmra.mxu1 %v8609_v8 }
  0xe9   :  { %5486 = vmatmul.msk.bf16.gmra.mxu2 %vm770_vm0, %v8611_v10  ;;  %906 = vmatmul.bf16.gmra.mxu3 %v5290_v6  ;;  %v7277_v6 = vld [vmem:[%s10664_s0 + $0x20] sm:$0xf0] }
  0xea   :  { %1416 = vmatpush.bf16.msra.mxu1 %v5680_v18  ;;  %v5531_v18 = vld [vmem:[%s10664_s0 + $0x48] sm:$0xf] }
  0xeb   :  { %1454 = vmatpush.bf16.msra.mxu3 %v5712_v63  ;;  %v8933_v34 = vor.u32 %v7283_v20, %v5531_v18  ;;  %v7413_v20 = vld [vmem:[%s10665_s1 + $0x2f4] sm:$0xf0] }
  0xee   :  { %1417 = vmatpush.bf16.msra.mxu1 %v5672_v29  ;;  %v7288_v29 = vld [vmem:[%s10665_s1 + $0x4] sm:$0xf] }
  0xef   :  { %v5560_v35 = vor.u32 %v7288_v29, %v5557_v30 }
  0xf2   :  { %1418 = vmatpush.bf16.msra.mxu1 %v5664_v42 }
  0xf7   :  { %809 = vmatmul.bf16.gmra.mxu0 %v5302_v51 }
  0xf8   :  { %843 = vmatmul.bf16.gmra.mxu1 %v8700_v53 }
  0xf9   :  { %5487 = vmatmul.msk.bf16.gmra.mxu2 %vm770_vm0, %v8702_v55  ;;  %911 = vmatmul.bf16.gmra.mxu3 %v5302_v51  ;;  %v7312_v51 = vld [vmem:[%s10665_s1 + $0xc4] sm:$0xf] }
  0xfa   :  { %v5656_v54 = vor.u32 %v7312_v51, %v5653_v52 }
  0xfc   :  { %1419 = vmatpush.bf16.msra.mxu1 %v5656_v54  ;;  %v7285_v54 = vld [vmem:[%s10664_s0 + $0x64] sm:$0xf] }
 0x107   :  { %814 = vmatmul.bf16.gmra.mxu0 %v5314_v60 }
 0x108   :  { %848 = vmatmul.bf16.gmra.mxu1 %v8719_v61 }
 0x109   :  { %916 = vmatmul.bf16.gmra.mxu3 %v5314_v60  ;;  %930 = vmatmul.bf16.vlgmr.msrb.gmra.mxu2 %v8457_v1  ;;  %v5507_v1 = vld [vmem:[%s10664_s0 + $0x18] sm:$0xf]  ;;  %v7310_v60 = vld [vmem:[%s10665_s1 + $0xb4] sm:$0xf] }
 0x10a   :  { %v8756_v9 = vor.u32 %v7277_v6, %v5507_v1  ;;  %v5648_v0 = vor.u32 %v7310_v60, %v5645_v62  ;;  %v7324_v1 = vld [vmem:[%s10665_s1 + $0x124] sm:$0xf] }
 0x10c   :  { %1420 = vmatpush.bf16.msra.mxu1 %v5648_v0 }
 0x117   :  { %5488 = vmatmul.msk.bf16.vlgmr.msrb.gmra.mxu0 %vm770_vm0, %v8381_v28  ;;  %v5509_v28 = vld [vmem:[%s10664_s0 + $0x24] sm:$0xf0] }
 0x118   :  { %1288 = vmatmul.bf16.vlgmr.msrb.gmra.mxu1 %v8735_v4 }
 0x119   :  { %935 = vmatmul.bf16.gmra.mxu2 %v8506_v22  ;;  %1322 = vmatmul.bf16.vlgmr.msrb.gmra.mxu3 %v8737_v5  ;;  %v8758_v22 = vor.u32 %v7276_v7, %v5509_v28  ;;  %v5701_v28 = vld [vmem:[%s10665_s1 + $0x128] sm:$0xf0] }
 0x11a   :  { %v5704_v11 = vor.u32 %v7324_v1, %v5701_v28 }
 0x11c   :  { %1455 = vmatpush.bf16.msra.mxu3 %v5704_v11 }
 0x127   :  { %5489 = vmatmul.msk.bf16.gmra.mxu0 %vm770_vm0, %v8459_v2  ;;  %v5616_v2 = vor.u32 %v7302_v14, %v5613_v15  ;;  %v5640_v14 = vor.u32 %v7308_v12, %v5637_v13  ;;  %v7290_v15 = vld [vmem:[%s10665_s1 + $0x14] sm:$0xf] }
 0x128   :  { %1293 = vmatmul.bf16.gmra.mxu1 %v8756_v9 }
 0x129   :  { %940 = vmatmul.bf16.gmra.mxu2 %v8609_v8  ;;  %1327 = vmatmul.bf16.gmra.mxu3 %v8758_v22  ;;  %v7325_v8 = vld [vmem:[%s10665_s1 + $0x124] sm:$0xf0] }
 0x12a   :  { %1382 = vmatpush.bf16.msra.mxu0 %v5616_v2  ;;  %v5700_v21 = vor.u32 %v7325_v8, %v5699_v19  ;;  %v5565_v2 = vld [vmem:[%s10665_s1 + $0x18] sm:$0xf0]  ;;  %v5696_v8 = vor.u32 %v7322_v16, %v5693_v17  ;;  %1421 = vmatpush.bf16.msra.mxu1 %v5640_v14  ;;  %v7278_v14 = vld [vmem:[%s10664_s0 + $0x28] sm:$0xf0] }
 0x12b   :  { %v5568_v19 = vor.u32 %v7290_v15, %v5565_v2 }
 0x12c   :  { %1353 = vmatpush.bf16.msra.mxu2 %v5700_v21  ;;  %v7306_v21 = vld [vmem:[%s10665_s1 + $0x94] sm:$0xf]  ;;  %1456 = vmatpush.bf16.msra.mxu3 %v5696_v8  ;;  %v5901_v8 = vld [vmem:[%s10665_s1 + $0x2f0] sm:$0xf] }
 0x12d   :  { %v5632_v27 = vor.u32 %v7306_v21, %v5629_v24  ;;  %v5902_v21 = vor.u32 %v7413_v20, %v5901_v8 }
 0x12e   :  { %1383 = vmatpush.bf16.msra.mxu0 %v5608_v25  ;;  %v7282_v25 = vld [vmem:[%s10664_s0 + $0x4c] sm:$0xf] }
 0x12f   :  { %v8938_v38 = vor.u32 %v7282_v25, %v5533_v26  ;;  %1422 = vmatpush.bf16.msra.mxu1 %v5632_v27  ;;  %v7411_v25 = vld [vmem:[%s10665_s1 + $0x2e4] sm:$0xf0] }
 0x130   :  { %1354 = vmatpush.bf16.msra.mxu2 %v5692_v33 }
 0x132   :  { %1384 = vmatpush.bf16.msra.mxu0 %v5600_v36  ;;  %v5685_v36 = vld [vmem:[%s10665_s1 + $0x108] sm:$0xf0] }
 0x133   :  { %v5688_v42 = vor.u32 %v7320_v31, %v5685_v36  ;;  %1423 = vmatpush.bf16.msra.mxu1 %v5624_v43 }
 0x134   :  { %1355 = vmatpush.bf16.msra.mxu2 %v5684_v47 }
 0x135   :  { %1457 = vmatpush.bf16.msra.mxu3 %v5688_v42 }
 0x136   :  { %1385 = vmatpush.bf16.msra.mxu0 %v5592_v50 }
 0x137   :  { %5490 = vmatmul.msk.bf16.gmra.mxu0 %vm770_vm0, %v8508_v23  ;;  %v5584_v23 = vor.u32 %v7294_v56, %v5581_v57  ;;  %v5545_v56 = vld [vmem:[%s10664_s0 + $0x6c] sm:$0xf0]  ;;  %v5503_v57 = vld [vmem:[%s10664_s0 + $0x8] sm:$0xf] }
 0x138   :  { %1298 = vmatmul.bf16.gmra.mxu1 %v8840_v46  ;;  %v8979_v0 = vor.u32 %v7285_v54, %v5545_v56  ;;  %1836 = vmatpush.bf16.msrb.mxu2 %v5902_v21  ;;  %v7405_v54 = vld [vmem:[%s10665_s1 + $0x2b4] sm:$0xf0]  ;;  %v5965_v56 = vld [vmem:[%s10665_s1 + $0x370] sm:$0xf] }
 0x139   :  { %945 = vmatmul.bf16.gmra.mxu2 %v8700_v53  ;;  %1332 = vmatmul.bf16.gmra.mxu3 %v8845_v49  ;;  %v7292_v53 = vld [vmem:[%s10665_s1 + $0x24] sm:$0xf]  ;;  %v5539_v21 = vld [vmem:[%s10664_s0 + $0x50] sm:$0xf] }
 0x13a   :  { %1386 = vmatpush.bf16.msra.mxu0 %v5584_v23  ;;  %v5576_v7 = vor.u32 %v7292_v53, %v5573_v3  ;;  %v5504_v53 = vor.u32 %v7275_v58, %v5503_v57  ;;  %v7429_v58 = vld [vmem:[%s10665_s1 + $0x374] sm:$0xf0] }
 0x13c   :  { %v863_v6 = vpop.f32.mrf.mxu2 }
 0x13e   :  { %1387 = vmatpush.bf16.msra.mxu0 %v5576_v7 }
 0x142   :  { %1388 = vmatpush.bf16.msra.mxu0 %v5568_v19 }
 0x144   :  { %v865_v32 = vpop.f32.mrf.mxu2  ;;  %v795_v33 = vpop.f32.mrf.mxu0 }
 0x145   :  { %v829_v37 = vpop.f32.mrf.mxu1 }
 0x146   :  { %v830_v41 = vadd.f32 %v829_v37, %v795_v33  ;;  %1389 = vmatpush.bf16.msra.mxu0 %v5560_v35  ;;  %v7409_v33 = vld [vmem:[%s10665_s1 + $0x2d4] sm:$0xf0] }
 0x147   :  { %5491 = vmatmul.msk.bf16.gmra.mxu0 %vm770_vm0, %v8611_v10  ;;  %v5543_v10 = vld [vmem:[%s10664_s0 + $0x60] sm:$0xf]  ;;  %v5527_v37 = vld [vmem:[%s10664_s0 + $0x38] sm:$0xf] }
 0x148   :  { %1303 = vmatmul.bf16.gmra.mxu1 %v8933_v34  ;;  %v8949_v44 = vadd.f32 %v863_v6, %v830_v41  ;;  %v7407_v41 = vld [vmem:[%s10665_s1 + $0x2c4] sm:$0xf0] }
 0x149   :  { %950 = vmatmul.bf16.gmra.mxu2 %v8719_v61  ;;  %1337 = vmatmul.bf16.gmra.mxu3 %v8938_v38  ;;  %v7286_v61 = vld [vmem:[%s10664_s0 + $0x68] sm:$0xf0] }
 0x14a   :  { %v8977_v60 = vor.u32 %v7286_v61, %v5543_v10  ;;  %v5869_v61 = vld [vmem:[%s10665_s1 + $0x2b0] sm:$0xf] }
 0x14b   :  { %v5870_v57 = vor.u32 %v7405_v54, %v5869_v61  ;;  %v7419_v61 = vld [vmem:[%s10665_s1 + $0x324] sm:$0xf0] }
 0x14c   :  { %v868_v45 = vpop.f32.mrf.mxu2  ;;  %v8953_v47 = vpop.f32.mrf.mxu3 }
 0x14d   :  { %v797_v48 = vpop.f32.mrf.mxu0  ;;  %v831_v50 = vpop.f32.mrf.mxu1 }
 0x14e   :  { %v832_v51 = vadd.f32 %v831_v50, %v797_v48 }
 0x150   :  { %v8955_v52 = vadd.f32 %v865_v32, %v832_v51  ;;  %v5885_v32 = vld [vmem:[%s10665_s1 + $0x2d0] sm:$0xf]  ;;  %v5528_v51 = vor.u32 %v7281_v39, %v5527_v37 }
 0x151   :  { %v5886_v35 = vor.u32 %v7409_v33, %v5885_v32  ;;  %v7423_v32 = vld [vmem:[%s10665_s1 + $0x344] sm:$0xf0] }
 0x154   :  { %v870_v23 = vpop.f32.mrf.mxu2  ;;  %v8975_v59 = vpop.f32.mrf.mxu3 }
 0x155   :  { %v800_v62 = vpop.f32.mrf.mxu0  ;;  %v834_v63 = vpop.f32.mrf.mxu1 }
 0x156   :  { %v835_v3 = vadd.f32 %v834_v63, %v800_v62  ;;  %v5861_v62 = vld [vmem:[%s10665_s1 + $0x2a0] sm:$0xf] }
 0x157   :  { %5492 = vmatmul.msk.bf16.gmra.mxu0 %vm770_vm0, %v8702_v55  ;;  %v5515_v55 = vld [vmem:[%s10664_s0 + $0x20] sm:$0xf] }
 0x158   :  { %1308 = vmatmul.bf16.gmra.mxu1 %v8977_v60  ;;  %v8984_v1 = vadd.f32 %v868_v45, %v835_v3  ;;  %v5516_v18 = vor.u32 %v7278_v14, %v5515_v55  ;;  %v5878_v45 = vor.u32 %v7407_v41, %v5877_v40  ;;  %v5957_v63 = vld [vmem:[%s10665_s1 + $0x360] sm:$0xf]  ;;  %v5933_v41 = vld [vmem:[%s10665_s1 + $0x330] sm:$0xf] }
 0x159   :  { %1342 = vmatmul.bf16.gmra.mxu3 %v8979_v0  ;;  %5713 = vmatmul.msk.bf16.vlgmr.msra.gmra.mxu2 %vm770_vm0, %v5504_v53 }
 0x15c   :  { %v873_v6 = vpop.f32.mrf.mxu2  ;;  %v8988_v7 = vpop.f32.mrf.mxu3 }
 0x15d   :  { %v802_v28 = vpop.f32.mrf.mxu0  ;;  %v836_v11 = vpop.f32.mrf.mxu1 }
 0x15e   :  { %v837_v12 = vadd.f32 %v836_v11, %v802_v28  ;;  %v7427_v28 = vld [vmem:[%s10665_s1 + $0x364] sm:$0xf0] }
 0x15f   :  { %v5958_v55 = vor.u32 %v7427_v28, %v5957_v63 }
 0x160   :  { %v8990_v13 = vadd.f32 %v870_v23, %v837_v12  ;;  %v5966_v23 = vor.u32 %v7429_v58, %v5965_v56 }
 0x162   :  { %1870 = vmatpush.bf16.msrb.mxu0 %v5966_v23 }
 0x164   :  { %v875_v15 = vpop.f32.mrf.mxu2  ;;  %v8998_v2 = vpop.f32.mrf.mxu3 }
 0x165   :  { %v805_v16 = vpop.f32.mrf.mxu0  ;;  %v839_v17 = vpop.f32.mrf.mxu1 }
 0x166   :  { %v840_v19 = vadd.f32 %v839_v17, %v805_v16  ;;  %v7401_v16 = vld [vmem:[%s10665_s1 + $0x294] sm:$0xf0]  ;;  %v5949_v17 = vld [vmem:[%s10665_s1 + $0x350] sm:$0xf]  ;;  %1871 = vmatpush.bf16.msrb.mxu0 %v5958_v55 }
 0x167   :  { %1390 = vmatmul.bf16.vlgmr.msra.gmra.mxu0 %v8735_v4  ;;  %v5893_v4 = vld [vmem:[%s10665_s1 + $0x2e0] sm:$0xf]  ;;  %v7433_v55 = vld [vmem:[%s10665_s1 + $0x394] sm:$0xf0] }
 0x168   :  { %1424 = vmatmul.bf16.vlgmr.msra.gmra.mxu1 %v8737_v5  ;;  %v9008_v24 = vadd.f32 %v873_v6, %v840_v19  ;;  %v5894_v5 = vor.u32 %v7411_v25, %v5893_v4  ;;  %v7425_v19 = vld [vmem:[%s10665_s1 + $0x354] sm:$0xf0]  ;;  %v7284_v4 = vld [vmem:[%s10664_s0 + $0x58] sm:$0xf0]  ;;  %v5845_v25 = vld [vmem:[%s10665_s1 + $0x280] sm:$0xf] }
 0x169   :  { %5714 = vmatmul.msk.bf16.gmra.mxu2 %vm770_vm0, %v5516_v18  ;;  %5718 = vmatmul.msk.bf16.vlgmr.msra.gmra.mxu3 %vm770_vm0, %v5504_v53  ;;  %v5950_v8 = vor.u32 %v7425_v19, %v5949_v17  ;;  %v5540_v37 = vor.u32 %v7284_v4, %v5539_v21  ;;  %v5909_v17 = vld [vmem:[%s10665_s1 + $0x300] sm:$0xf] }
 0x16a   :  { %1837 = vmatpush.bf16.msrb.mxu2 %v5894_v5  ;;  %v5941_v5 = vld [vmem:[%s10665_s1 + $0x340] sm:$0xf] }
 0x16b   :  { %1872 = vmatpush.bf16.msrb.mxu0 %v5950_v8  ;;  %v5942_v39 = vor.u32 %v7423_v32, %v5941_v5 }
 0x16c   :  { %v878_v26 = vpop.f32.mrf.mxu2  ;;  %v9018_v27 = vpop.f32.mrf.mxu3 }
 0x16d   :  { %v807_v29 = vpop.f32.mrf.mxu0  ;;  %v841_v30 = vpop.f32.mrf.mxu1 }
 0x16e   :  { %v842_v31 = vadd.f32 %v841_v30, %v807_v29  ;;  %1838 = vmatpush.bf16.msrb.mxu2 %v5886_v35 }
 0x16f   :  { %1873 = vmatpush.bf16.msrb.mxu0 %v5942_v39 }
 0x170   :  { %v9026_v36 = vadd.f32 %v875_v15, %v842_v31  ;;  %v5853_v15 = vld [vmem:[%s10665_s1 + $0x290] sm:$0xf] }
 0x172   :  { %1839 = vmatpush.bf16.msrb.mxu2 %v5878_v45 }
 0x174   :  { %v880_v42 = vpop.f32.mrf.mxu2  ;;  %v9040_v43 = vpop.f32.mrf.mxu3 }
 0x175   :  { %v810_v48 = vpop.f32.mrf.mxu0  ;;  %v844_v50 = vpop.f32.mrf.mxu1 }
 0x176   :  { %v845_v10 = vadd.f32 %v844_v50, %v810_v48  ;;  %1840 = vmatpush.bf16.msrb.mxu2 %v5870_v57  ;;  %v7437_v50 = vld [vmem:[%s10665_s1 + $0x3b4] sm:$0xf0] }
 0x177   :  { %1395 = vmatmul.bf16.gmra.mxu0 %v8756_v9 }
 0x178   :  { %1429 = vmatmul.bf16.gmra.mxu1 %v8758_v22  ;;  %v9056_v9 = vadd.f32 %v878_v26, %v845_v10  ;;  %v7403_v22 = vld [vmem:[%s10665_s1 + $0x2a4] sm:$0xf0] }
 0x179   :  { %5715 = vmatmul.msk.bf16.gmra.mxu2 %vm770_vm0, %v5528_v51  ;;  %5719 = vmatmul.msk.bf16.gmra.mxu3 %vm770_vm0, %v5516_v18  ;;  %v5862_v6 = vor.u32 %v7403_v22, %v5861_v62  ;;  %v5854_v18 = vor.u32 %v7401_v16, %v5853_v15  ;;  %v7399_v26 = vld [vmem:[%s10665_s1 + $0x284] sm:$0xf0]  ;;  %v5989_v62 = vld [vmem:[%s10665_s1 + $0x3a0] sm:$0xf]  ;;  %v7287_v15 = vld [vmem:[%s10664_s0 + $0x70] sm:$0xf0] }
 0x17a   :  { %v5846_v31 = vor.u32 %v7399_v26, %v5845_v25  ;;  %v7435_v22 = vld [vmem:[%s10665_s1 + $0x3a4] sm:$0xf0] }
 0x17b   :  { %1841 = vmatpush.bf16.msrb.mxu2 %v5862_v6  ;;  %v5917_v6 = vld [vmem:[%s10665_s1 + $0x310] sm:$0xf] }
 0x17c   :  { %v883_v53 = vpop.f32.mrf.mxu2  ;;  %v9069_v3 = vpop.f32.mrf.mxu3 }
 0x17d   :  { %v812_v11 = vpop.f32.mrf.mxu0  ;;  %v846_v12 = vpop.f32.mrf.mxu1 }
 0x17e   :  { %v847_v14 = vadd.f32 %v846_v12, %v812_v11  ;;  %v5981_v12 = vld [vmem:[%s10665_s1 + $0x390] sm:$0xf] }
 0x17f   :  { %1842 = vmatpush.bf16.msrb.mxu2 %v5854_v18  ;;  %v5982_v16 = vor.u32 %v7433_v55, %v5981_v12  ;;  %v7415_v18 = vld [vmem:[%s10665_s1 + $0x304] sm:$0xf0] }
 0x180   :  { %v9086_v20 = vadd.f32 %v880_v42, %v847_v14  ;;  %v7421_v42 = vld [vmem:[%s10665_s1 + $0x334] sm:$0xf0]  ;;  %v5551_v14 = vld [vmem:[%s10664_s0 + $0x68] sm:$0xf]  ;;  %v5910_v21 = vor.u32 %v7415_v18, %v5909_v17 }
 0x181   :  { %v5934_v45 = vor.u32 %v7421_v42, %v5933_v41  ;;  %v5552_v5 = vor.u32 %v7287_v15, %v5551_v14 }
 0x183   :  { %1843 = vmatpush.bf16.msrb.mxu2 %v5846_v31  ;;  %1874 = vmatpush.bf16.msrb.mxu0 %v5934_v45  ;;  %v7431_v31 = vld [vmem:[%s10665_s1 + $0x384] sm:$0xf0] }
 0x184   :  { %v885_v29 = vpop.f32.mrf.mxu2  ;;  %v9103_v30 = vpop.f32.mrf.mxu3 }
 0x185   :  { %v815_v33 = vpop.f32.mrf.mxu0  ;;  %v849_v35 = vpop.f32.mrf.mxu1 }
 0x186   :  { %v850_v40 = vadd.f32 %v849_v35, %v815_v33 }
 0x187   :  { %1400 = vmatmul.bf16.gmra.mxu0 %v8840_v46  ;;  %v5997_v46 = vld [vmem:[%s10665_s1 + $0x3b0] sm:$0xf] }
 0x188   :  { %1434 = vmatmul.bf16.gmra.mxu1 %v8845_v49  ;;  %v9116_v48 = vadd.f32 %v883_v53, %v850_v40  ;;  %v5998_v10 = vor.u32 %v7437_v50, %v5997_v46  ;;  %v5925_v49 = vld [vmem:[%s10665_s1 + $0x320] sm:$0xf]  ;;  %v5990_v53 = vor.u32 %v7435_v22, %v5989_v62 }
 0x189   :  { %5716 = vmatmul.msk.bf16.gmra.mxu2 %vm770_vm0, %v5540_v37  ;;  %5720 = vmatmul.msk.bf16.gmra.mxu3 %vm770_vm0, %v5528_v51  ;;  %v5926_v56 = vor.u32 %v7419_v61, %v5925_v49 }
 0x18a   :  { %1908 = vmatpush.bf16.msrb.mxu1 %v5998_v10 }
 0x18b   :  { %1875 = vmatpush.bf16.msrb.mxu0 %v5926_v56 }
 0x18c   :  { %v9132_v54 = vpop.f32.mrf.mxu3  ;;  %v931_v51 = vpop.f32.mrf.mxu2 }
 0x18d   :  { %v932_v57 = vadd.f32 %v931_v51, %v8953_v47  ;;  %v817_v58 = vpop.f32.mrf.mxu0  ;;  %v851_v23 = vpop.f32.mrf.mxu1  ;;  %v7417_v47 = vld [vmem:[%s10665_s1 + $0x314] sm:$0xf0] }
 0x18e   :  { %v852_v63 = vadd.f32 %v851_v23, %v817_v58  ;;  %1909 = vmatpush.bf16.msrb.mxu1 %v5990_v53  ;;  %v5918_v28 = vor.u32 %v7417_v47, %v5917_v6  ;;  %v7387_v53 = vld [vmem:[%s10664_s0 + $0x110] sm:$0xf0] }
 0x190   :  { %v9147_v11 = vadd.f32 %v885_v29, %v852_v63  ;;  %1876 = vmatpush.bf16.msrb.mxu0 %v5918_v28  ;;  %v5973_v29 = vld [vmem:[%s10665_s1 + $0x380] sm:$0xf]  ;;  %v7385_v63 = vld [vmem:[%s10664_s0 + $0x100] sm:$0xf0] }
 0x191   :  { %v5974_v35 = vor.u32 %v7431_v31, %v5973_v29  ;;  %v7426_v29 = vld [vmem:[%s10665_s1 + $0x364] sm:$0xf] }
 0x192   :  { %1910 = vmatpush.bf16.msrb.mxu1 %v5982_v16 }
 0x194   :  { %v9167_v19 = vpop.f32.mrf.mxu3  ;;  %v933_v8 = vpop.f32.mrf.mxu2  ;;  %1877 = vmatpush.bf16.msrb.mxu0 %v5910_v21  ;;  %v5903_v21 = vld [vmem:[%s10665_s1 + $0x2f8] sm:$0xf0] }
 0x195   :  { %v934_v4 = vadd.f32 %v933_v8, %v8975_v59  ;;  %v965_v25 = vpop.f32.mrf.mxu0  ;;  %v1289_v26 = vpop.f32.mrf.mxu1  ;;  %v7412_v8 = vld [vmem:[%s10665_s1 + $0x2f4] sm:$0xf] }
 0x196   :  { %v9176_v32 = vadd.f32 %v965_v25, %v932_v57  ;;  %v1290_v33 = vadd.f32 %v1289_v26, %v8949_v44  ;;  %1911 = vmatpush.bf16.msrb.mxu1 %v5974_v35  ;;  %v7410_v26 = vld [vmem:[%s10665_s1 + $0x2e4] sm:$0xf] }
 0x197   :  { %1405 = vmatmul.bf16.gmra.mxu0 %v8933_v34 }
 0x198   :  { %1439 = vmatmul.bf16.gmra.mxu1 %v8938_v38  ;;  %v5785_v38 = vld [vmem:[%s10664_s0 + $0xf0] sm:$0xf] }
 0x199   :  { %5717 = vmatmul.msk.bf16.gmra.mxu2 %vm770_vm0, %v5552_v5  ;;  %5721 = vmatmul.msk.bf16.gmra.mxu3 %vm770_vm0, %v5540_v37  ;;  %v7384_v37 = vld [vmem:[%s10664_s0 + $0xf8] sm:$0xf0] }
 0x19a   :  { %v9200_v61 = vor.u32 %v7384_v37, %v5785_v38 }
 0x19c   :  { %v936_v59 = vpop.f32.mrf.mxu2  ;;  %v1323_v39 = vpop.f32.mrf.mxu3 }
 0x19d   :  { %v937_v40 = vadd.f32 %v936_v59, %v8988_v7  ;;  %v9184_v41 = vadd.f32 %v1323_v39, %v1290_v33  ;;  %v967_v42 = vpop.f32.mrf.mxu0  ;;  %v1291_v45 = vpop.f32.mrf.mxu1  ;;  %v5959_v59 = vld [vmem:[%s10665_s1 + $0x368] sm:$0xf0] }
 0x19e   :  { %v9186_v44 = vadd.f32 %v967_v42, %v934_v4  ;;  %v9189_v34 = vadd.f32 %v1291_v45, %v8955_v52  ;;  %v7428_v4 = vld [vmem:[%s10665_s1 + $0x374] sm:$0xf]  ;;  %v5962_v38 = vor.u32 %v7426_v29, %v5959_v59  ;;  %v5935_v29 = vld [vmem:[%s10665_s1 + $0x338] sm:$0xf0]  ;;  %v7418_v59 = vld [vmem:[%s10665_s1 + $0x324] sm:$0xf] }
 0x1a4   :  { %v938_v46 = vpop.f32.mrf.mxu2  ;;  %v9197_v50 = vpop.f32.mrf.mxu3 }
 0x1a5   :  { %v939_v7 = vadd.f32 %v938_v46, %v8998_v2  ;;  %v970_v10 = vpop.f32.mrf.mxu0  ;;  %v1294_v49 = vpop.f32.mrf.mxu1 }
 0x1a6   :  { %v9202_v51 = vadd.f32 %v970_v10, %v937_v40  ;;  %v1295_v52 = vadd.f32 %v1294_v49, %v8984_v1  ;;  %v5887_v10 = vld [vmem:[%s10665_s1 + $0x2d8] sm:$0xf0] }
 0x1a7   :  { %1410 = vmatmul.bf16.gmra.mxu0 %v8977_v60  ;;  %v7383_v60 = vld [vmem:[%s10664_s0 + $0xf4] sm:$0xf] }
 0x1a8   :  { %1444 = vmatmul.bf16.gmra.mxu1 %v8979_v0  ;;  %v5787_v0 = vld [vmem:[%s10664_s0 + $0xfc] sm:$0xf0] }
 0x1a9   :  { %5722 = vmatmul.msk.bf16.gmra.mxu3 %vm770_vm0, %v5552_v5  ;;  %1844 = vmatmul.bf16.vlgmr.msrb.gmra.mxu2 %v9200_v61  ;;  %v9235_v6 = vor.u32 %v7383_v60, %v5787_v0  ;;  %v5895_v5 = vld [vmem:[%s10665_s1 + $0x2e8] sm:$0xf0] }
 0x1aa   :  { %v5898_v35 = vor.u32 %v7410_v26, %v5895_v5  ;;  %v7390_v60 = vld [vmem:[%s10664_s0 + $0x128] sm:$0xf0]  ;;  %v5871_v26 = vld [vmem:[%s10665_s1 + $0x2b8] sm:$0xf0] }
 0x1ac   :  { %v941_v56 = vpop.f32.mrf.mxu2  ;;  %v1328_v57 = vpop.f32.mrf.mxu3 }
 0x1ad   :  { %v942_v2 = vadd.f32 %v941_v56, %v9018_v27  ;;  %v9210_v58 = vadd.f32 %v1328_v57, %v1295_v52  ;;  %v972_v23 = vpop.f32.mrf.mxu0  ;;  %v1296_v62 = vpop.f32.mrf.mxu1  ;;  %v5793_v27 = vld [vmem:[%s10664_s0 + $0xf8] sm:$0xf]  ;;  %v7386_v52 = vld [vmem:[%s10664_s0 + $0x10c] sm:$0xf] }
 0x1ae   :  { %v9212_v22 = vadd.f32 %v972_v23, %v939_v7  ;;  %v9215_v1 = vadd.f32 %v1296_v62, %v8990_v13  ;;  %v5797_v13 = vld [vmem:[%s10664_s0 + $0x108] sm:$0xf]  ;;  %v9239_v12 = vor.u32 %v7385_v63, %v5793_v27  ;;  %v7408_v7 = vld [vmem:[%s10665_s1 + $0x2d4] sm:$0xf]  ;;  %v5799_v56 = vld [vmem:[%s10664_s0 + $0x114] sm:$0xf0] }
 0x1af   :  { %v9242_v16 = vor.u32 %v7387_v53, %v5797_v13  ;;  %v5890_v49 = vor.u32 %v7408_v7, %v5887_v10  ;;  %v7388_v23 = vld [vmem:[%s10664_s0 + $0x118] sm:$0xf0]  ;;  %v5809_v62 = vld [vmem:[%s10664_s0 + $0x120] sm:$0xf]  ;;  %v9313_v0 = vor.u32 %v7386_v52, %v5799_v56  ;;  %v7406_v27 = vld [vmem:[%s10665_s1 + $0x2c4] sm:$0xf] }
 0x1b0   :  { %v5879_v63 = vld [vmem:[%s10665_s1 + $0x2c8] sm:$0xf0]  ;;  %v7422_v13 = vld [vmem:[%s10665_s1 + $0x344] sm:$0xf] }
 0x1b1   :  { %v5927_v7 = vld [vmem:[%s10665_s1 + $0x328] sm:$0xf0] }
 0x1b2   :  { %v5930_v52 = vor.u32 %v7418_v59, %v5927_v7  ;;  %v5991_v7 = vld [vmem:[%s10665_s1 + $0x3a8] sm:$0xf0] }
 0x1b4   :  { %v943_v47 = vpop.f32.mrf.mxu2  ;;  %v9237_v28 = vpop.f32.mrf.mxu3 }
 0x1b5   :  { %v944_v55 = vadd.f32 %v943_v47, %v9040_v43  ;;  %v975_v14 = vpop.f32.mrf.mxu0  ;;  %v1299_v15 = vpop.f32.mrf.mxu1  ;;  %v5906_v43 = vor.u32 %v7412_v8, %v5903_v21  ;;  %v9331_v21 = vor.u32 %v7390_v60, %v5809_v62  ;;  %v5919_v60 = vld [vmem:[%s10665_s1 + $0x318] sm:$0xf0] }
 0x1b6   :  { %v9244_v17 = vadd.f32 %v975_v14, %v942_v2  ;;  %v1300_v18 = vadd.f32 %v1299_v15, %v9008_v24  ;;  %v5967_v24 = vld [vmem:[%s10665_s1 + $0x378] sm:$0xf0]  ;;  %v5805_v2 = vld [vmem:[%s10664_s0 + $0x110] sm:$0xf]  ;;  %v5882_v14 = vor.u32 %v7406_v27, %v5879_v63  ;;  %v5943_v15 = vld [vmem:[%s10665_s1 + $0x348] sm:$0xf0] }
 0x1b7   :  { %1878 = vmatmul.bf16.vlgmr.msrb.gmra.mxu0 %v9235_v6  ;;  %v5970_v25 = vor.u32 %v7428_v4, %v5967_v24  ;;  %1938 = vmatpush.bf16.msrb.mxu3 %v5906_v43  ;;  %v5946_v43 = vor.u32 %v7422_v13, %v5943_v15  ;;  %v5817_v27 = vld [vmem:[%s10664_s0 + $0x128] sm:$0xf]  ;;  %v7391_v63 = vld [vmem:[%s10664_s0 + $0x130] sm:$0xf0] }
 0x1b8   :  { %6003 = vmatmul.msk.bf16.vlgmr.msrb.gmra.mxu1 %vm770_vm0, %v9239_v12 }
 0x1b9   :  { %1849 = vmatmul.bf16.gmra.mxu2 %v9242_v16 }
 0x1ba   :  { %1972 = vmatpush.bf16.msra.mxu2 %v5970_v25  ;;  %v7404_v25 = vld [vmem:[%s10665_s1 + $0x2b4] sm:$0xf] }
 0x1bb   :  { %1939 = vmatpush.bf16.msrb.mxu3 %v5898_v35  ;;  %v5874_v5 = vor.u32 %v7404_v25, %v5871_v26  ;;  %v5863_v35 = vld [vmem:[%s10665_s1 + $0x2a8] sm:$0xf0]  ;;  %v9415_v26 = vor.u32 %v7391_v63, %v5817_v27  ;;  %v5829_v63 = vld [vmem:[%s10664_s0 + $0x140] sm:$0xf] }
 0x1bc   :  { %v946_v31 = vpop.f32.mrf.mxu2  ;;  %v1333_v33 = vpop.f32.mrf.mxu3 }
 0x1bd   :  { %v947_v39 = vadd.f32 %v946_v31, %v9069_v3  ;;  %v9276_v40 = vadd.f32 %v1333_v33, %v1300_v18  ;;  %v977_v42 = vpop.f32.mrf.mxu0  ;;  %v1301_v45 = vpop.f32.mrf.mxu1  ;;  %v7424_v3 = vld [vmem:[%s10665_s1 + $0x354] sm:$0xf]  ;;  %v7402_v33 = vld [vmem:[%s10665_s1 + $0x2a4] sm:$0xf] }
 0x1be   :  { %v9278_v37 = vadd.f32 %v977_v42, %v944_v55  ;;  %v9281_v46 = vadd.f32 %v1301_v45, %v9026_v36  ;;  %1973 = vmatpush.bf16.msra.mxu2 %v5962_v38  ;;  %v5951_v36 = vld [vmem:[%s10665_s1 + $0x358] sm:$0xf0]  ;;  %v9326_v55 = vor.u32 %v7388_v23, %v5805_v2  ;;  %v5866_v38 = vor.u32 %v7402_v33, %v5863_v35  ;;  %v7389_v2 = vld [vmem:[%s10664_s0 + $0x124] sm:$0xf]  ;;  %v5811_v23 = vld [vmem:[%s10664_s0 + $0x12c] sm:$0xf0] }
 0x1bf   :  { %v5954_v57 = vor.u32 %v7424_v3, %v5951_v36  ;;  %1940 = vmatpush.bf16.msrb.mxu3 %v5890_v49  ;;  %v9402_v15 = vor.u32 %v7389_v2, %v5811_v23 }
 0x1c2   :  { %1974 = vmatpush.bf16.msra.mxu2 %v5954_v57  ;;  %v5855_v57 = vld [vmem:[%s10665_s1 + $0x298] sm:$0xf0] }
 0x1c3   :  { %1941 = vmatpush.bf16.msrb.mxu3 %v5882_v14  ;;  %v7393_v14 = vld [vmem:[%s10664_s0 + $0x140] sm:$0xf0] }
 0x1c4   :  { %v948_v53 = vpop.f32.mrf.mxu2  ;;  %v9324_v47 = vpop.f32.mrf.mxu3 }
 0x1c5   :  { %v980_v18 = vpop.f32.mrf.mxu0  ;;  %v1304_v8 = vpop.f32.mrf.mxu1 }
 0x1c6   :  { %v9333_v4 = vadd.f32 %v980_v18, %v947_v39  ;;  %v1305_v24 = vadd.f32 %v1304_v8, %v9056_v9  ;;  %1975 = vmatpush.bf16.msra.mxu2 %v5946_v43  ;;  %v7420_v9 = vld [vmem:[%s10665_s1 + $0x334] sm:$0xf]  ;;  %v949_v39 = vadd.f32 %v948_v53, %v9103_v30  ;;  %v5821_v53 = vld [vmem:[%s10664_s0 + $0x138] sm:$0xf]  ;;  %v7398_v18 = vld [vmem:[%s10665_s1 + $0x284] sm:$0xf] }
 0x1c7   :  { %1883 = vmatmul.bf16.gmra.mxu0 %v9313_v0  ;;  %v5938_v31 = vor.u32 %v7420_v9, %v5935_v29  ;;  %1942 = vmatpush.bf16.msrb.mxu3 %v5874_v5  ;;  %v7400_v30 = vld [vmem:[%s10665_s1 + $0x294] sm:$0xf]  ;;  %v5847_v8 = vld [vmem:[%s10665_s1 + $0x288] sm:$0xf0]  ;;  %v7414_v43 = vld [vmem:[%s10665_s1 + $0x304] sm:$0xf]  ;;  %v9420_v33 = vor.u32 %v7393_v14, %v5821_v53 }
 0x1c8   :  { %6004 = vmatmul.msk.bf16.gmra.mxu1 %vm770_vm0, %v9326_v55  ;;  %v5858_v62 = vor.u32 %v7400_v30, %v5855_v57  ;;  %v5850_v5 = vor.u32 %v7398_v18, %v5847_v8  ;;  %v5911_v9 = vld [vmem:[%s10665_s1 + $0x308] sm:$0xf0]  ;;  %v5833_v53 = vld [vmem:[%s10664_s0 + $0x150] sm:$0xf]  ;;  %v7396_v14 = vld [vmem:[%s10664_s0 + $0x158] sm:$0xf0]  ;;  %v1326_v18 = vadd.f32 %v9197_v50, %v9189_v34 }
 0x1c9   :  { %1854 = vmatmul.bf16.gmra.mxu2 %v9331_v21  ;;  %v5914_v35 = vor.u32 %v7414_v43, %v5911_v9  ;;  %v7430_v43 = vld [vmem:[%s10665_s1 + $0x384] sm:$0xf]  ;;  %v9492_v50 = vor.u32 %v7396_v14, %v5833_v53 }
 0x1ca   :  { %1976 = vmatpush.bf16.msra.mxu2 %v5938_v31 }
 0x1cb   :  { %1943 = vmatpush.bf16.msrb.mxu3 %v5866_v38 }
 0x1cc   :  { %v951_v42 = vpop.f32.mrf.mxu2  ;;  %v1338_v45 = vpop.f32.mrf.mxu3 }
 0x1cd   :  { %v952_v10 = vadd.f32 %v951_v42, %v9132_v54  ;;  %v9366_v3 = vadd.f32 %v1338_v45, %v1305_v24  ;;  %v982_v49 = vpop.f32.mrf.mxu0  ;;  %v9368_v36 = vpop.f32.mrf.mxu1  ;;  %v7416_v54 = vld [vmem:[%s10665_s1 + $0x314] sm:$0xf]  ;;  %v5999_v45 = vld [vmem:[%s10665_s1 + $0x3b8] sm:$0xf0] }
 0x1ce   :  { %v9370_v56 = vadd.f32 %v982_v49, %v949_v39  ;;  %1977 = vmatpush.bf16.msra.mxu2 %v5930_v52  ;;  %v5922_v13 = vor.u32 %v7416_v54, %v5919_v60  ;;  %v7436_v42 = vld [vmem:[%s10665_s1 + $0x3b4] sm:$0xf]  ;;  %v7392_v60 = vld [vmem:[%s10664_s0 + $0x13c] sm:$0xf] }
 0x1cf   :  { %1944 = vmatpush.bf16.msrb.mxu3 %v5858_v62  ;;  %v6002_v38 = vor.u32 %v7436_v42, %v5999_v45  ;;  %v7432_v62 = vld [vmem:[%s10665_s1 + $0x394] sm:$0xf] }
 0x1d1   :  { %2010 = vmatpush.bf16.msra.mxu0 %v6002_v38 }
 0x1d2   :  { %1978 = vmatpush.bf16.msra.mxu2 %v5922_v13  ;;  %v7394_v13 = vld [vmem:[%s10664_s0 + $0x148] sm:$0xf0] }
 0x1d3   :  { %1945 = vmatpush.bf16.msrb.mxu3 %v5850_v5 }
 0x1d4   :  { %v953_v24 = vpop.f32.mrf.mxu2  ;;  %v9413_v25 = vpop.f32.mrf.mxu3 }
 0x1d5   :  { %v985_v29 = vpop.f32.mrf.mxu0  ;;  %v1309_v31 = vpop.f32.mrf.mxu1 }
 0x1d6   :  { %v9422_v59 = vadd.f32 %v985_v29, %v952_v10  ;;  %v1310_v39 = vadd.f32 %v1309_v31, %v9116_v48  ;;  %1979 = vmatpush.bf16.msra.mxu2 %v5914_v35  ;;  %1946 = vmatmul.bf16.vlgmr.msrb.gmra.mxu3 %v9200_v61  ;;  %v7434_v48 = vld [vmem:[%s10665_s1 + $0x3a4] sm:$0xf]  ;;  %v954_v10 = vadd.f32 %v953_v24, %v9167_v19  ;;  %v5983_v19 = vld [vmem:[%s10665_s1 + $0x398] sm:$0xf0]  ;;  %v5975_v24 = vld [vmem:[%s10665_s1 + $0x388] sm:$0xf0] }
 0x1d7   :  { %1888 = vmatmul.bf16.gmra.mxu0 %v9402_v15  ;;  %v5994_v30 = vor.u32 %v7434_v48, %v5991_v7  ;;  %v5986_v27 = vor.u32 %v7432_v62, %v5983_v19  ;;  %v9488_v29 = vor.u32 %v7394_v13, %v5829_v63  ;;  %v5978_v31 = vor.u32 %v7430_v43, %v5975_v24 }
 0x1d8   :  { %6005 = vmatmul.msk.bf16.gmra.mxu1 %vm770_vm0, %v9415_v26 }
 0x1d9   :  { %1859 = vmatmul.bf16.gmra.mxu2 %v9420_v33  ;;  %2011 = vmatpush.bf16.msra.mxu0 %v5994_v30  ;;  %v7395_v30 = vld [vmem:[%s10664_s0 + $0x154] sm:$0xf] }
 0x1dc   :  { %v1343_v49 = vpop.f32.mrf.mxu3  ;;  %v1357_v52 = vpop.f32.mrf.mxu2 }
 0x1dd   :  { %v9443_v57 = vadd.f32 %v1343_v49, %v1310_v39  ;;  %v9446_v54 = vadd.f32 %v1357_v52, %v9184_v41  ;;  %v987_v2 = vpop.f32.mrf.mxu0  ;;  %v9448_v61 = vpop.f32.mrf.mxu1  ;;  %v5823_v41 = vld [vmem:[%s10664_s0 + $0x144] sm:$0xf0]  ;;  %2012 = vmatpush.bf16.msra.mxu0 %v5986_v27 }
 0x1de   :  { %v9450_v23 = vadd.f32 %v987_v2, %v954_v10  ;;  %v9478_v8 = vor.u32 %v7392_v60, %v5823_v41  ;;  %v7397_v2 = vld [vmem:[%s10664_s0 + $0x160] sm:$0xf0] }
 0x1e1   :  { %2013 = vmatpush.bf16.msra.mxu0 %v5978_v31  ;;  %v1336_v31 = vadd.f32 %v9324_v47, %v9281_v46 }
 0x1e4   :  { %v9486_v5 = vpop.f32.mrf.mxu3  ;;  %v1359_v9 = vpop.f32.mrf.mxu2 }
 0x1e5   :  { %v9490_v35 = vadd.f32 %v1359_v9, %v1326_v18  ;;  %v1391_v39 = vpop.f32.mrf.mxu0  ;;  %v1425_v34 = vpop.f32.mrf.mxu1 }
 0x1e6   :  { %v1392_v42 = vadd.f32 %v1391_v39, %v9176_v32  ;;  %1951 = vmatmul.bf16.gmra.mxu3 %v9242_v16  ;;  %v5835_v16 = vld [vmem:[%s10664_s0 + $0x15c] sm:$0xf0] }
 0x1e7   :  { %1893 = vmatmul.bf16.gmra.mxu0 %v9478_v8  ;;  %v9524_v62 = vor.u32 %v7395_v30, %v5835_v16 }
 0x1e8   :  { %v1426_v45 = vadd.f32 %v1425_v34, %v1392_v42  ;;  %6006 = vmatmul.msk.bf16.gmra.mxu1 %vm770_vm0, %v9488_v29 }
 0x1e9   :  { %1864 = vmatmul.bf16.gmra.mxu2 %v9492_v50 }
 0x1ec   :  { %v1362_v38 = vpop.f32.mrf.mxu2  ;;  %v1459_v48 = vpop.f32.mrf.mxu3 }
 0x1ed   :  { %v9501_v7 = vadd.f32 %v1362_v38, %v9210_v58  ;;  %v9503_v10 = vadd.f32 %v1459_v48, %v1426_v45  ;;  %v1393_v49 = vpop.f32.mrf.mxu0  ;;  %v9505_v32 = vpop.f32.mrf.mxu1  ;;  %v5841_v58 = vld [vmem:[%s10664_s0 + $0x158] sm:$0xf] }
 0x1ee   :  { %v9508_v52 = vadd.f32 %v1393_v49, %v9186_v44  ;;  %v1331_v44 = vadd.f32 %v9237_v28, %v9215_v1  ;;  %v9528_v41 = vor.u32 %v7397_v2, %v5841_v58 }
 0x1f4   :  { %v1364_v19 = vpop.f32.mrf.mxu2  ;;  %v9526_v60 = vpop.f32.mrf.mxu3 }
 0x1f5   :  { %v9530_v27 = vadd.f32 %v1364_v19, %v1331_v44  ;;  %v1396_v63 = vpop.f32.mrf.mxu0  ;;  %v1430_v13 = vpop.f32.mrf.mxu1 }
 0x1f6   :  { %v1397_v53 = vadd.f32 %v1396_v63, %v9202_v51  ;;  %1956 = vmatmul.bf16.gmra.mxu3 %v9331_v21 }
 0x1f7   :  { %1898 = vmatmul.bf16.gmra.mxu0 %v9524_v62 }
 0x1f8   :  { %v1431_v14 = vadd.f32 %v1430_v13, %v1397_v53  ;;  %6007 = vmatmul.msk.bf16.gmra.mxu1 %vm770_vm0, %v9528_v41 }
 0x1f9   :  { %1980 = vmatmul.bf16.vlgmr.msra.gmra.mxu2 %v9235_v6 }
 0x1fc   :  { %v1367_v1 = vpop.f32.mrf.mxu2  ;;  %v1464_v28 = vpop.f32.mrf.mxu3 }
 0x1fd   :  { %v9539_v18 = vadd.f32 %v1367_v1, %v9276_v40  ;;  %v9541_v43 = vadd.f32 %v1464_v28, %v1431_v14  ;;  %v1398_v24 = vpop.f32.mrf.mxu0  ;;  %v9543_v9 = vpop.f32.mrf.mxu1 }
 0x1fe   :  { %v9546_v51 = vadd.f32 %v1398_v24, %v9212_v22 }
 0x204   :  { %v1369_v39 = vpop.f32.mrf.mxu2  ;;  %v9550_v6 = vpop.f32.mrf.mxu3 }
 0x205   :  { %v9552_v21 = vadd.f32 %v1369_v39, %v1336_v31  ;;  %v1401_v34 = vpop.f32.mrf.mxu0  ;;  %v1435_v42 = vpop.f32.mrf.mxu1 }
 0x206   :  { %v1402_v40 = vadd.f32 %v1401_v34, %v9244_v17  ;;  %1961 = vmatmul.bf16.gmra.mxu3 %v9420_v33 }
 0x207   :  { %6008 = vmatmul.msk.bf16.vlgmr.msra.gmra.mxu0 %vm770_vm0, %v9239_v12 }
 0x208   :  { %v1436_v45 = vadd.f32 %v1435_v42, %v1402_v40 }
 0x209   :  { %1985 = vmatmul.bf16.gmra.mxu2 %v9313_v0 }
 0x20c   :  { %v1372_v22 = vpop.f32.mrf.mxu2  ;;  %v1469_v38 = vpop.f32.mrf.mxu3 }
 0x20d   :  { %v9560_v46 = vadd.f32 %v1372_v22, %v9366_v3  ;;  %v9562_v47 = vadd.f32 %v1469_v38, %v1436_v45  ;;  %v1403_v48 = vpop.f32.mrf.mxu0  ;;  %v9564_v49 = vpop.f32.mrf.mxu1 }
 0x20e   :  { %v9567_v17 = vadd.f32 %v1403_v48, %v9278_v37 }
 0x214   :  { %v9569_v30 = vpop.f32.mrf.mxu2  ;;  %v9571_v12 = vpop.f32.mrf.mxu3 }
 0x215   :  { %v1406_v0 = vpop.f32.mrf.mxu0  ;;  %v1440_v16 = vpop.f32.mrf.mxu1 }
 0x216   :  { %v1407_v33 = vadd.f32 %v1406_v0, %v9333_v4  ;;  %1966 = vmatmul.bf16.gmra.mxu3 %v9492_v50 }
 0x217   :  { %6009 = vmatmul.msk.bf16.gmra.mxu0 %vm770_vm0, %v9326_v55 }
 0x218   :  { %v1441_v3 = vadd.f32 %v1440_v16, %v1407_v33 }
 0x219   :  { %1990 = vmatmul.bf16.gmra.mxu2 %v9402_v15 }
 0x21c   :  { %v1377_v58 = vpop.f32.mrf.mxu2  ;;  %v1474_v2 = vpop.f32.mrf.mxu3 }
 0x21d   :  { %v9579_v37 = vadd.f32 %v1377_v58, %v9443_v57  ;;  %v9581_v44 = vadd.f32 %v1474_v2, %v1441_v3  ;;  %v9583_v19 = vpop.f32.mrf.mxu0  ;;  %v9585_v63 = vpop.f32.mrf.mxu1 }
 0x224   :  { %v9587_v4 = vpop.f32.mrf.mxu2  ;;  %v9589_v13 = vpop.f32.mrf.mxu3 }
 0x225   :  { %v1411_v55 = vpop.f32.mrf.mxu0  ;;  %v1445_v53 = vpop.f32.mrf.mxu1 }
 0x226   :  { %v1412_v15 = vadd.f32 %v1411_v55, %v9422_v59 }
 0x227   :  { %6010 = vmatmul.msk.bf16.gmra.mxu0 %vm770_vm0, %v9415_v26 }
 0x228   :  { %v1446_v50 = vadd.f32 %v1445_v53, %v1412_v15 }
 0x229   :  { %1995 = vmatmul.bf16.gmra.mxu2 %v9478_v8 }
 0x22c   :  { %v1479_v57 = vpop.f32.mrf.mxu3  ;;  %v1845_v14 = vpop.f32.mrf.mxu2 }
 0x22d   :  { %v9595_v1 = vadd.f32 %v1479_v57, %v1446_v50  ;;  %v9597_v28 = vpop.f32.mrf.mxu0  ;;  %v9599_v24 = vpop.f32.mrf.mxu1 }
 0x234   :  { %v1847_v31 = vpop.f32.mrf.mxu2 }
 0x235   :  { %v1879_v39 = vpop.f32.mrf.mxu0  ;;  %v1913_v34 = vpop.f32.mrf.mxu1 }
 0x236   :  { %v1880_v42 = vadd.f32 %v1879_v39, %v1845_v14 }
 0x237   :  { %6011 = vmatmul.msk.bf16.gmra.mxu0 %vm770_vm0, %v9488_v29 }
 0x238   :  { %v1914_v59 = vadd.f32 %v1913_v34, %v1880_v42 }
 0x239   :  { %2000 = vmatmul.bf16.gmra.mxu2 %v9524_v62 }
 0x23a   :  { %v2040_v26 = vadd.f32 %v1914_v59, %v9446_v54 }
 0x23c   :  { %v1850_v8 = vpop.f32.mrf.mxu2  ;;  %v2060_v0 = vmax.f32 %v2040_v26, 0.0 }
 0x23d   :  { %v1881_v40 = vpop.f32.mrf.mxu0  ;;  %v1915_v45 = vpop.f32.mrf.mxu1 }
 0x23e   :  { %v1882_v22 = vadd.f32 %v1881_v40, %v1847_v31 }
 0x240   :  { %v1916_v38 = vadd.f32 %v1915_v45, %v1882_v22 }
 0x242   :  { %v2042_v48 = vadd.f32 %v1916_v38, %v9490_v35 }
 0x244   :  { %v2062_v16 = vmax.f32 %v2042_v48, 0.0  ;;  %v1852_v33 = vpop.f32.mrf.mxu2 }
 0x245   :  { %v1884_v3 = vpop.f32.mrf.mxu0  ;;  %v1918_v58 = vpop.f32.mrf.mxu1 }
 0x246   :  { %v1885_v2 = vadd.f32 %v1884_v3, %v1850_v8  ;;  %v9606_v55 = vpack.c.bf16 %v2062_v16, %v2060_v0 }
 0x247   :  { %6012 = vmatmul.msk.bf16.gmra.mxu0 %vm770_vm0, %v9528_v41 }
 0x248   :  { %v1919_v29 = vadd.f32 %v1918_v58, %v1885_v2  ;;  %v9616_v58 = vpop.f32.mrf.mxu3 }
 0x24a   :  { %v2044_v54 = vadd.f32 %v1919_v29, %v9501_v7 }
 0x24c   :  { %v1855_v62 = vpop.f32.mrf.mxu2  ;;  %v2064_v14 = vmax.f32 %v2044_v54, 0.0  ;;  %v1307_v54 = vadd.f32 %v9368_v36, %v9086_v20 }
 0x24d   :  { %v1886_v53 = vpop.f32.mrf.mxu0  ;;  %v1920_v15 = vpop.f32.mrf.mxu1 }
 0x24e   :  { %v1887_v50 = vadd.f32 %v1886_v53, %v1852_v33 }
 0x250   :  { %v1921_v57 = vadd.f32 %v1920_v15, %v1887_v50 }
 0x252   :  { %v2046_v35 = vadd.f32 %v1921_v57, %v9530_v27 }
 0x254   :  { %v2066_v31 = vmax.f32 %v2046_v35, 0.0  ;;  %v1857_v39 = vpop.f32.mrf.mxu2 }
 0x255   :  { %v1889_v34 = vpop.f32.mrf.mxu0  ;;  %v1923_v42 = vpop.f32.mrf.mxu1 }
 0x256   :  { %v9612_v59 = vpack.c.bf16 %v2066_v31, %v2064_v14  ;;  %v1890_v26 = vadd.f32 %v1889_v34, %v1855_v62 }
 0x258   :  { %v1924_v8 = vadd.f32 %v1923_v42, %v1890_v26 }
 0x25a   :  { %v2048_v22 = vadd.f32 %v1924_v8, %v9539_v18  ;;  %v1341_v18 = vadd.f32 %v9413_v25, %v1307_v54 }
 0x25c   :  { %v1860_v41 = vpop.f32.mrf.mxu2  ;;  %v2068_v0 = vmax.f32 %v2048_v22, 0.0  ;;  %v1375_v35 = vadd.f32 %v9569_v30, %v1341_v18 }
 0x25d   :  { %v1891_v40 = vpop.f32.mrf.mxu0  ;;  %v1925_v45 = vpop.f32.mrf.mxu1 }
 0x25e   :  { %v1892_v7 = vadd.f32 %v1891_v40, %v1857_v39 }
 0x260   :  { %v1926_v38 = vadd.f32 %v1925_v45, %v1892_v7  ;;  %v1312_v45 = vadd.f32 %v9448_v61, %v9147_v11 }
 0x262   :  { %v2050_v48 = vadd.f32 %v1926_v38, %v9552_v21  ;;  %v1947_v21 = vpop.f32.mrf.mxu3 }
 0x264   :  { %v2070_v27 = vmax.f32 %v2050_v48, 0.0  ;;  %v1862_v16 = vpop.f32.mrf.mxu2 }
 0x265   :  { %v1894_v33 = vpop.f32.mrf.mxu0  ;;  %v1928_v3 = vpop.f32.mrf.mxu1 }
 0x266   :  { %v2084_v2 = vpack.c.bf16 %v2070_v27, %v2068_v0  ;;  %v1895_v29 = vadd.f32 %v1894_v33, %v1860_v41 }
 0x268   :  { %v1929_v62 = vadd.f32 %v1928_v3, %v1895_v29 }
 0x26a   :  { %v2052_v14 = vadd.f32 %v1929_v62, %v9560_v46  ;;  %v1949_v40 = vpop.f32.mrf.mxu3  ;;  %v1346_v46 = vadd.f32 %v9486_v5, %v1312_v45  ;;  %v1428_v5 = vadd.f32 %v9505_v32, %v9508_v52 }
 0x26c   :  { %v1865_v53 = vpop.f32.mrf.mxu2  ;;  %v2072_v34 = vmax.f32 %v2052_v14, 0.0  ;;  %v1380_v0 = vadd.f32 %v9587_v4, %v1346_v46 }
 0x26d   :  { %v1896_v15 = vpop.f32.mrf.mxu0  ;;  %v1930_v50 = vpop.f32.mrf.mxu1 }
 0x26e   :  { %v1897_v57 = vadd.f32 %v1896_v15, %v1862_v16 }
 0x270   :  { %v1931_v31 = vadd.f32 %v1930_v50, %v1897_v57 }
 0x272   :  { %v2054_v39 = vadd.f32 %v1931_v31, %v1375_v35  ;;  %v1952_v3 = vpop.f32.mrf.mxu3 }
 0x274   :  { %v2074_v42 = vmax.f32 %v2054_v39, 0.0  ;;  %v1867_v26 = vpop.f32.mrf.mxu2 }
 0x275   :  { %v1899_v8 = vpop.f32.mrf.mxu0  ;;  %v1933_v41 = vpop.f32.mrf.mxu1 }
 0x276   :  { %v2086_v20 = vpack.c.bf16 %v2074_v42, %v2072_v34  ;;  %v1900_v36 = vadd.f32 %v1899_v8, %v1865_v53 }
 0x278   :  { %v1934_v25 = vadd.f32 %v1933_v41, %v1900_v36 }
 0x27a   :  { %v2056_v27 = vadd.f32 %v1934_v25, %v9579_v37  ;;  %v1954_v4 = vpop.f32.mrf.mxu3 }
 0x27c   :  { %v1981_v7 = vpop.f32.mrf.mxu2  ;;  %v2076_v29 = vmax.f32 %v2056_v27, 0.0 }
 0x27d   :  { %v1982_v22 = vadd.f32 %v1981_v7, %v1947_v21  ;;  %v1901_v38 = vpop.f32.mrf.mxu0  ;;  %v1935_v30 = vpop.f32.mrf.mxu1  ;;  %v1462_v21 = vadd.f32 %v9526_v60, %v1428_v5  ;;  %v1433_v60 = vadd.f32 %v9543_v9, %v9546_v51 }
 0x27e   :  { %v1902_v48 = vadd.f32 %v1901_v38, %v1867_v26 }
 0x280   :  { %v1936_v16 = vadd.f32 %v1935_v30, %v1902_v48 }
 0x282   :  { %v2058_v33 = vadd.f32 %v1936_v16, %v1380_v0  ;;  %v1957_v52 = vpop.f32.mrf.mxu3 }
 0x284   :  { %v2078_v54 = vmax.f32 %v2058_v33, 0.0  ;;  %v1983_v62 = vpop.f32.mrf.mxu2 }
 0x285   :  { %v2015_v53 = vpop.f32.mrf.mxu0  ;;  %v1984_v50 = vadd.f32 %v1983_v62, %v1949_v40 }
 0x286   :  { %v2088_v11 = vpack.c.bf16 %v2078_v54, %v2076_v29  ;;  %v2016_v61 = vadd.f32 %v2015_v53, %v1982_v22 }
 0x288   :  { %v2041_v15 = vadd.f32 %v2016_v61, %v9503_v10  ;;  %2164 = vmatpush.bf16.msra.mxu1 %v2088_v11  ;;  %v1409_v61 = vadd.f32 %v9583_v19, %v9370_v56  ;;  %v7438_v56 = vld [vmem:[%s10667_s3] sm:$0xff]  ;;  %v1414_v19 = vadd.f32 %v9597_v28, %v9450_v23  ;;  %v7439_v23 = vld [vmem:[%s10667_s3 + $0x8] sm:$0xff]  ;;  %v7440_v28 = vld [vmem:[%s10667_s3 + $0x10] sm:$0xff] }
 0x28a   :  { %v2061_v31 = vmax.f32 %v2041_v15, 0.0 }
 0x28c   :  { %v1986_v18 = vpop.f32.mrf.mxu2  ;;  %2165 = vmatpush.bf16.msra.mxu1 %v2086_v20  ;;  %v1467_v20 = vadd.f32 %v9550_v6, %v1433_v60 }
 0x28d   :  { %v1987_v37 = vadd.f32 %v1986_v18, %v1952_v3  ;;  %v2017_v57 = vpop.f32.mrf.mxu0 }
 0x28e   :  { %v2018_v35 = vadd.f32 %v2017_v57, %v1984_v50 }
 0x290   :  { %v2043_v14 = vadd.f32 %v2018_v35, %v1462_v21  ;;  %2166 = vmatpush.bf16.msra.mxu1 %v2084_v2 }
 0x292   :  { %v2063_v39 = vmax.f32 %v2043_v14, 0.0 }
 0x294   :  { %v1988_v34 = vpop.f32.mrf.mxu2  ;;  %2167 = vmatpush.bf16.msra.mxu1 %v9612_v59  ;;  %v9633_v10 = vpack.c.bf16 %v2063_v39, %v2061_v31  ;;  %v1959_v59 = vpop.f32.mrf.mxu3  ;;  %v1448_v39 = vadd.f32 %v9599_v24, %v1414_v19  ;;  %v7442_v24 = vld [vmem:[%s10667_s3 + $0x20] sm:$0xff] }
 0x295   :  { %v2020_v42 = vpop.f32.mrf.mxu0  ;;  %v1989_v8 = vadd.f32 %v1988_v34, %v1954_v4  ;;  %v7472_v19 = vld [vmem:[%s10666_s2 + $0xdc] sm:$0xf0] }
 0x296   :  { %v2021_v32 = vadd.f32 %v2020_v42, %v1987_v37 }
 0x298   :  { %v2045_v26 = vadd.f32 %v2021_v32, %v9541_v43  ;;  %2168 = vmatpush.bf16.msra.mxu1 %v9606_v55  ;;  %v1438_v55 = vadd.f32 %v9564_v49, %v9567_v17  ;;  %v1443_v17 = vadd.f32 %v9585_v63, %v1409_v61  ;;  %v1482_v32 = vadd.f32 %v9616_v58, %v1448_v39  ;;  %v7443_v58 = vld [vmem:[%s10667_s3 + $0x28] sm:$0xff]  ;;  %v6303_v39 = vld [vmem:[%s10666_s2 + $0x1a0] sm:$0xf] }
 0x299   :  { %v6132_v61 = vld [vmem:[%s10666_s2 + $0x108] sm:$0xf] }
 0x29a   :  { %v2065_v45 = vmax.f32 %v2045_v26, 0.0  ;;  %v1472_v0 = vadd.f32 %v9571_v12, %v1438_v55  ;;  %v1477_v12 = vadd.f32 %v9589_v13, %v1443_v17  ;;  %v7444_v55 = vld [vmem:[%s10667_s3 + $0x30] sm:$0x30] }
 0x29b   :  { %6041 = vmatmul.msk.bf16.vlgmr.msra.gmra.mxu1 %vm2139_vm1, %v7438_v56 }
 0x29c   :  { %v1991_v41 = vpop.f32.mrf.mxu2  ;;  %v1962_v46 = vpop.f32.mrf.mxu3 }
 0x29d   :  { %v2022_v2 = vpop.f32.mrf.mxu0  ;;  %v1992_v30 = vadd.f32 %v1991_v41, %v1957_v52 }
 0x29e   :  { %v2023_v36 = vadd.f32 %v2022_v2, %v1989_v8 }
 0x2a0   :  { %v2047_v40 = vadd.f32 %v2023_v36, %v1467_v20  ;;  %v7460_v20 = vld [vmem:[%s10666_s2 + $0x74] sm:$0xf0] }
 0x2a2   :  { %v2067_v25 = vmax.f32 %v2047_v40, 0.0  ;;  %v6200_v40 = vld [vmem:[%s10666_s2 + $0x60] sm:$0xf] }
 0x2a4   :  { %v1993_v7 = vpop.f32.mrf.mxu2  ;;  %v2083_v22 = vpack.c.bf16 %v2067_v25, %v2065_v45  ;;  %v1964_v29 = vpop.f32.mrf.mxu3  ;;  %v6192_v25 = vld [vmem:[%s10666_s2 + $0x50] sm:$0xf] }
 0x2a5   :  { %v2025_v38 = vpop.f32.mrf.mxu0  ;;  %v1994_v9 = vadd.f32 %v1993_v7, %v1959_v59  ;;  %v7458_v59 = vld [vmem:[%s10666_s2 + $0x64] sm:$0xf0]  ;;  %v7456_v7 = vld [vmem:[%s10666_s2 + $0x54] sm:$0xf0] }
 0x2a6   :  { %v2026_v43 = vadd.f32 %v2025_v38, %v1992_v30  ;;  %v6201_v45 = vor.u32 %v7458_v59, %v6200_v40  ;;  %v6184_v38 = vld [vmem:[%s10666_s2 + $0x40] sm:$0xf]  ;;  %v7454_v30 = vld [vmem:[%s10666_s2 + $0x44] sm:$0xf0] }
 0x2a7   :  { %v7492_v59 = vld [vmem:[%s10666_s2 + $0x184] sm:$0xf0] }
 0x2a8   :  { %v2049_v6 = vadd.f32 %v2026_v43, %v9562_v47  ;;  %v6185_v43 = vor.u32 %v7454_v30, %v6184_v38  ;;  %v6140_v38 = vld [vmem:[%s10666_s2 + $0x118] sm:$0xf] }
 0x2aa   :  { %v2069_v33 = vmax.f32 %v2049_v6, 0.0  ;;  %v6168_v6 = vld [vmem:[%s10666_s2 + $0x20] sm:$0xf] }
 0x2ab   :  { %6042 = vmatmul.msk.bf16.gmra.mxu1 %vm2139_vm1, %v7439_v23 }
 0x2ac   :  { %v1996_v51 = vpop.f32.mrf.mxu2  ;;  %v1967_v18 = vpop.f32.mrf.mxu3 }
 0x2ad   :  { %v2027_v48 = vpop.f32.mrf.mxu0  ;;  %v1997_v11 = vadd.f32 %v1996_v51, %v1962_v46  ;;  %v6039_v46 = vld [vmem:[%s10667_s3 + $0x30] sm:$0xf] }
 0x2ae   :  { %v2028_v27 = vadd.f32 %v2027_v48, %v1994_v9  ;;  %v6040_v9 = vor.u32 %v7444_v55, %v6039_v46  ;;  %v6176_v51 = vld [vmem:[%s10666_s2 + $0x30] sm:$0xf]  ;;  %v7452_v48 = vld [vmem:[%s10666_s2 + $0x34] sm:$0xf0]  ;;  %v7480_v46 = vld [vmem:[%s10666_s2 + $0x11c] sm:$0xf0] }
 0x2af   :  { %v6279_v55 = vld [vmem:[%s10666_s2 + $0x170] sm:$0xf] }
 0x2b0   :  { %v2051_v16 = vadd.f32 %v2028_v27, %v1472_v0  ;;  %v6177_v0 = vor.u32 %v7452_v48, %v6176_v51  ;;  %v7450_v27 = vld [vmem:[%s10666_s2 + $0x24] sm:$0xf0]  ;;  %v6141_v51 = vor.u32 %v7480_v46, %v6140_v38  ;;  %v7465_v46 = vld [vmem:[%s10666_s2 + $0xac] sm:$0xf] }
 0x2b2   :  { %v2071_v3 = vmax.f32 %v2051_v16, 0.0  ;;  %v9732_v16 = vld [vmem:[%s10666_s2 + $0x90] sm:$0xff] }
 0x2b4   :  { %v2085_v54 = vpack.c.bf16 %v2071_v3, %v2069_v33  ;;  %v1998_v62 = vpop.f32.mrf.mxu2  ;;  %v6169_v33 = vor.u32 %v7450_v27, %v6168_v6  ;;  %v2572_v3 = vunpack.c.l.b16 %v9732_v16 }
 0x2b5   :  { %v2030_v53 = vpop.f32.mrf.mxu0  ;;  %v1999_v15 = vadd.f32 %v1998_v62, %v1964_v29  ;;  %v7448_v62 = vld [vmem:[%s10666_s2 + $0x14] sm:$0xf0] }
 0x2b6   :  { %v2031_v49 = vadd.f32 %v2030_v53, %v1997_v11  ;;  %v2592_v29 = vpack.c.b16 %v2572_v3, %v2572_v3  ;;  %v6134_v3 = vld [vmem:[%s10666_s2 + $0x110] sm:$0xf0] }
 0x2b8   :  { %v2053_v47 = vadd.f32 %v2031_v49, %v9581_v44  ;;  %v1969_v44 = vpop.f32.mrf.mxu3  ;;  %v2619_v11 = vsel %vm2426_vm2, %v2592_v29, 0  ;;  %v7478_v49 = vld [vmem:[%s10666_s2 + $0x10c] sm:$0xf0] }
 0x2b9   :  { %v6133_v17 = vor.u32 %v7478_v49, %v6132_v61 }
 0x2ba   :  { %v2073_v57 = vmax.f32 %v2053_v47, 0.0 }
 0x2bb   :  { %6043 = vmatmul.msk.bf16.gmra.mxu1 %vm2139_vm1, %v7440_v28  ;;  %2433 = vmatpush.bf16.msrb.mxu2 %v6133_v17 }
 0x2bc   :  { %v2001_v4 = vpop.f32.mrf.mxu2 }
 0x2bd   :  { %v2032_v5 = vpop.f32.mrf.mxu0  ;;  %v2002_v31 = vadd.f32 %v2001_v4, %v1967_v18  ;;  %v6124_v4 = vld [vmem:[%s10666_s2 + $0xf8] sm:$0xf] }
 0x2be   :  { %v2033_v50 = vadd.f32 %v2032_v5, %v1999_v15  ;;  %v6216_v15 = vld [vmem:[%s10666_s2 + $0x80] sm:$0xf]  ;;  %v7462_v5 = vld [vmem:[%s10666_s2 + $0x84] sm:$0xf0] }
 0x2bf   :  { %v6217_v47 = vor.u32 %v7462_v5, %v6216_v15 }
 0x2c0   :  { %v2055_v37 = vadd.f32 %v2033_v50, %v1477_v12  ;;  %v6152_v12 = vld [vmem:[%s10666_s2] sm:$0xf]  ;;  %v7446_v50 = vld [vmem:[%s10666_s2 + $0x4] sm:$0xf0] }
 0x2c1   :  { %v6153_v18 = vor.u32 %v7446_v50, %v6152_v12  ;;  %v7475_v12 = vld [vmem:[%s10666_s2 + $0xfc] sm:$0xf]  ;;  %v6263_v50 = vld [vmem:[%s10666_s2 + $0x150] sm:$0xf] }
 0x2c2   :  { %v2075_v21 = vmax.f32 %v2055_v37, 0.0  ;;  %v7476_v37 = vld [vmem:[%s10666_s2 + $0xfc] sm:$0xf0] }
 0x2c4   :  { %v2087_v35 = vpack.c.bf16 %v2075_v21, %v2073_v57  ;;  %v2003_v63 = vpop.f32.mrf.mxu2  ;;  %v6125_v57 = vor.u32 %v7476_v37, %v6124_v4  ;;  %v6116_v21 = vld [vmem:[%s10666_s2 + $0xe8] sm:$0xf]  ;;  %v9867_v4 = vld [vmem:[%s10666_s2 + $0x1c0] sm:$0xff]  ;;  %v7486_v37 = vld [vmem:[%s10666_s2 + $0x154] sm:$0xf0] }
 0x2c5   :  { %v2035_v14 = vpop.f32.mrf.mxu0  ;;  %v2004_v34 = vadd.f32 %v2003_v63, %v1969_v44  ;;  %v6100_v63 = vld [vmem:[%s10666_s2 + $0xc8] sm:$0xf] }
 0x2c6   :  { %v2036_v13 = vadd.f32 %v2035_v14, %v2002_v31  ;;  %2434 = vmatpush.bf16.msrb.mxu2 %v6125_v57  ;;  %v2790_v57 = vunpack.c.l.b16 %v9867_v4 }
 0x2c8   :  { %v2057_v52 = vadd.f32 %v2036_v13, %v9595_v1  ;;  %v7441_v1 = vld [vmem:[%s10667_s3 + $0x18] sm:$0xff]  ;;  %v7470_v13 = vld [vmem:[%s10666_s2 + $0xcc] sm:$0xf0] }
 0x2ca   :  { %v2077_v8 = vmax.f32 %v2057_v52, 0.0  ;;  %v6092_v52 = vld [vmem:[%s10666_s2 + $0xb8] sm:$0xf] }
 0x2cb   :  { %6044 = vmatmul.msk.bf16.gmra.mxu1 %vm2139_vm1, %v7441_v1 }
 0x2cd   :  { %v2037_v42 = vpop.f32.mrf.mxu0 }
 0x2ce   :  { %v2038_v26 = vadd.f32 %v2037_v42, %v2004_v34  ;;  %v6101_v34 = vor.u32 %v7470_v13, %v6100_v63  ;;  %v7496_v42 = vld [vmem:[%s10666_s2 + $0x1a4] sm:$0xf0] }
 0x2cf   :  { %v7484_v13 = vld [vmem:[%s10666_s2 + $0x144] sm:$0xf0] }
 0x2d0   :  { %v2059_v60 = vadd.f32 %v2038_v26, %v1482_v32  ;;  %v6304_v32 = vor.u32 %v7496_v42, %v6303_v39  ;;  %v7468_v26 = vld [vmem:[%s10666_s2 + $0xbc] sm:$0xf0] }
 0x2d2   :  { %v2079_v41 = vmax.f32 %v2059_v60, 0.0  ;;  %v6295_v60 = vld [vmem:[%s10666_s2 + $0x190] sm:$0xf] }
 0x2d4   :  { %v2089_v2 = vpack.c.bf16 %v2079_v41, %v2077_v8  ;;  %v9802_v41 = vld [vmem:[%s10666_s2 + $0x128] sm:$0xff] }
 0x2d6   :  { %2208 = vmatpush.bf16.msra.mxu3 %v2089_v2  ;;  %v6093_v2 = vor.u32 %v7468_v26, %v6092_v52  ;;  %v6110_v52 = vld [vmem:[%s10666_s2 + $0xe0] sm:$0xf0]  ;;  %v6311_v26 = vld [vmem:[%s10666_s2 + $0x1b0] sm:$0xf] }
 0x2da   :  { %2209 = vmatpush.bf16.msra.mxu3 %v2087_v35  ;;  %v7474_v35 = vld [vmem:[%s10666_s2 + $0xec] sm:$0xf0] }
 0x2db   :  { %6045 = vmatmul.msk.bf16.gmra.mxu1 %vm2139_vm1, %v7442_v24  ;;  %v6117_v14 = vor.u32 %v7474_v35, %v6116_v21  ;;  %v6264_v21 = vor.u32 %v7486_v37, %v6263_v50  ;;  %v7510_v50 = vld [vmem:[%s10666_s2 + $0x21c] sm:$0xf0] }
 0x2dd   :  { %2435 = vmatpush.bf16.msrb.mxu2 %v6117_v14  ;;  %v7473_v14 = vld [vmem:[%s10666_s2 + $0xec] sm:$0xf] }
 0x2de   :  { %2210 = vmatpush.bf16.msra.mxu3 %v2085_v54  ;;  %v6160_v54 = vld [vmem:[%s10666_s2 + $0x10] sm:$0xf] }
 0x2df   :  { %v6161_v53 = vor.u32 %v7448_v62, %v6160_v54  ;;  %v6271_v62 = vld [vmem:[%s10666_s2 + $0x160] sm:$0xf] }
 0x2e2   :  { %2211 = vmatpush.bf16.msra.mxu3 %v2083_v22  ;;  %v6193_v22 = vor.u32 %v7456_v7, %v6192_v25  ;;  %v6076_v7 = vld [vmem:[%s10666_s2 + $0x98] sm:$0xf] }
 0x2e6   :  { %2212 = vmatpush.bf16.msra.mxu3 %v9633_v10  ;;  %v6208_v10 = vld [vmem:[%s10666_s2 + $0x70] sm:$0xf] }
 0x2e7   :  { %v6209_v36 = vor.u32 %v7460_v20, %v6208_v10  ;;  %v6084_v10 = vld [vmem:[%s10666_s2 + $0xa8] sm:$0xf]  ;;  %v7466_v20 = vld [vmem:[%s10666_s2 + $0xac] sm:$0xf0] }
 0x2e8   :  { %v6085_v40 = vor.u32 %v7466_v20, %v6084_v10  ;;  %v7469_v20 = vld [vmem:[%s10666_s2 + $0xcc] sm:$0xf] }
 0x2e9   :  { %6048 = vmatmul.msk.bf16.vlgmr.msra.gmra.mxu3 %vm2139_vm1, %v7438_v56  ;;  %2624 = vmatpush.bf16.msrb.mxu1 %v6209_v36  ;;  %v6108_v56 = vld [vmem:[%s10666_s2 + $0xd8] sm:$0xf]  ;;  %v6287_v36 = vld [vmem:[%s10666_s2 + $0x180] sm:$0xf] }
 0x2ea   :  { %2648 = vmatpush.bf16.msrb.mxu3 %v2619_v11  ;;  %v6109_v44 = vor.u32 %v7472_v19, %v6108_v56  ;;  %v6288_v25 = vor.u32 %v7492_v59, %v6287_v36  ;;  %v2810_v56 = vpack.c.b16 %v2790_v57, %v2790_v57  ;;  %v6255_v19 = vld [vmem:[%s10666_s2 + $0x140] sm:$0xf]  ;;  %v6102_v36 = vld [vmem:[%s10666_s2 + $0xd0] sm:$0xf0] }
 0x2eb   :  { %6046 = vmatmul.msk.bf16.gmra.mxu1 %vm2139_vm1, %v7443_v58 }
 0x2ec   :  { %2436 = vmatpush.bf16.msrb.mxu2 %v6109_v44  ;;  %v2837_v39 = vsel %vm2426_vm2, %v2810_v56, 0 }
 0x2ed   :  { %2625 = vmatpush.bf16.msrb.mxu1 %v6201_v45 }
 0x2ee   :  { %2649 = vmatpush.bf16.msrb.mxu3 %v6217_v47  ;;  %v6126_v47 = vld [vmem:[%s10666_s2 + $0x100] sm:$0xf0] }
 0x2f0   :  { %2437 = vmatpush.bf16.msrb.mxu2 %v6101_v34  ;;  %v6256_v34 = vor.u32 %v7484_v13, %v6255_v19 }
 0x2f1   :  { %2626 = vmatpush.bf16.msrb.mxu1 %v6193_v22  ;;  %v7464_v22 = vld [vmem:[%s10666_s2 + $0x9c] sm:$0xf0] }
 0x2f2   :  { %2866 = vmatpush.bf16.msra.mxu3 %v2837_v39 }
 0x2f4   :  { %2438 = vmatpush.bf16.msrb.mxu2 %v6093_v2  ;;  %v6247_v2 = vld [vmem:[%s10666_s2 + $0x130] sm:$0xf] }
 0x2f5   :  { %2627 = vmatpush.bf16.msrb.mxu1 %v6185_v43  ;;  %v6077_v43 = vor.u32 %v7464_v22, %v6076_v7  ;;  %v6398_v7 = vld [vmem:[%s10666_s2 + $0x238] sm:$0xf]  ;;  %v2380_v22 = vunpack.c.h.b16 %v9802_v41 }
 0x2f8   :  { %2439 = vmatpush.bf16.msrb.mxu2 %v6085_v40  ;;  %v6105_v40 = vor.u32 %v7469_v20, %v6102_v36  ;;  %v7506_v36 = vld [vmem:[%s10666_s2 + $0x1fc] sm:$0xf0] }
 0x2f9   :  { %6049 = vmatmul.msk.bf16.gmra.mxu3 %vm2139_vm1, %v7439_v23  ;;  %2628 = vmatpush.bf16.msrb.mxu1 %v6177_v0  ;;  %v7494_v23 = vld [vmem:[%s10666_s2 + $0x194] sm:$0xf0] }
 0x2fb   :  { %6047 = vmatmul.msk.bf16.gmra.mxu1 %vm2139_vm1, %v6040_v9 }
 0x2fc   :  { %2440 = vmatpush.bf16.msrb.mxu2 %v6077_v43  ;;  %v7514_v43 = vld [vmem:[%s10666_s2 + $0x23c] sm:$0xf0] }
 0x2fd   :  { %2629 = vmatpush.bf16.msrb.mxu1 %v6169_v33  ;;  %v7477_v33 = vld [vmem:[%s10666_s2 + $0x10c] sm:$0xf] }
 0x2fe   :  { %v6137_v54 = vor.u32 %v7477_v33, %v6134_v3  ;;  %v6142_v33 = vld [vmem:[%s10666_s2 + $0x120] sm:$0xf0] }
 0x300   :  { %2469 = vmatpush.bf16.msra.mxu2 %v6137_v54 }
 0x301   :  { %2630 = vmatpush.bf16.msrb.mxu1 %v6161_v53  ;;  %v7488_v53 = vld [vmem:[%s10666_s2 + $0x164] sm:$0xf0] }
 0x302   :  { %v6272_v17 = vor.u32 %v7488_v53, %v6271_v62 }
 0x305   :  { %2631 = vmatpush.bf16.msrb.mxu1 %v6153_v18  ;;  %v6129_v18 = vor.u32 %v7475_v12, %v6126_v47  ;;  %v6382_v47 = vld [vmem:[%s10666_s2 + $0x218] sm:$0xf] }
 0x307   :  { %2470 = vmatpush.bf16.msra.mxu2 %v6129_v18 }
 0x309   :  { %6050 = vmatmul.msk.bf16.gmra.mxu3 %vm2139_vm1, %v7440_v28  ;;  %2842 = vmatpush.bf16.msra.mxu1 %v6304_v32  ;;  %v2379_v28 = vunpack.c.l.b16 %v9802_v41  ;;  %v7471_v32 = vld [vmem:[%s10666_s2 + $0xdc] sm:$0xf]  ;;  %v6086_v41 = vld [vmem:[%s10666_s2 + $0xb0] sm:$0xf0] }
 0x30a   :  { %v6089_v62 = vor.u32 %v7465_v46, %v6086_v41  ;;  %v7504_v46 = vld [vmem:[%s10666_s2 + $0x1ec] sm:$0xf0] }
 0x318   :  { %v2170_v31 = vpop.f32.mrf.mxu1 }
 0x319   :  { %6051 = vmatmul.msk.bf16.gmra.mxu3 %vm2139_vm1, %v7441_v1  ;;  %v6296_v1 = vor.u32 %v7494_v23, %v6295_v60  ;;  %v6113_v60 = vor.u32 %v7471_v32, %v6110_v52  ;;  %v7482_v23 = vld [vmem:[%s10666_s2 + $0x134] sm:$0xf0]  ;;  %v7459_v52 = vld [vmem:[%s10666_s2 + $0x74] sm:$0xf] }
 0x31b   :  { %2843 = vmatpush.bf16.msra.mxu1 %v6296_v1  ;;  %v6248_v1 = vor.u32 %v7482_v23, %v6247_v2  ;;  %v6374_v2 = vld [vmem:[%s10666_s2 + $0x208] sm:$0xf]  ;;  %v7508_v23 = vld [vmem:[%s10666_s2 + $0x20c] sm:$0xf0] }
 0x31f   :  { %2844 = vmatpush.bf16.msra.mxu1 %v6288_v25  ;;  %v6094_v25 = vld [vmem:[%s10666_s2 + $0xc0] sm:$0xf0] }
 0x320   :  { %v2172_v8 = vpop.f32.mrf.mxu1 }
 0x328   :  { %v2175_v6 = vpop.f32.mrf.mxu1 }
 0x329   :  { %6052 = vmatmul.msk.bf16.gmra.mxu3 %vm2139_vm1, %v7442_v24 }
 0x330   :  { %v2177_v44 = vpop.f32.mrf.mxu1 }
 0x338   :  { %v2180_v38 = vpop.f32.mrf.mxu1 }
 0x339   :  { %6053 = vmatmul.msk.bf16.gmra.mxu3 %vm2139_vm1, %v7443_v58  ;;  %v2399_v58 = vpack.c.b16 %v2379_v28, %v2379_v28 }
 0x33b   :  { %v2428_v45 = vsel %vm2426_vm2, %v2399_v58, 0 }
 0x33c   :  { %2457 = vmatpush.bf16.msrb.mxu0 %v2428_v45  ;;  %v7467_v45 = vld [vmem:[%s10666_s2 + $0xbc] sm:$0xf] }
 0x340   :  { %2458 = vmatpush.bf16.msrb.mxu0 %v6141_v51  ;;  %v6399_v51 = vor.u32 %v7514_v43, %v6398_v7  ;;  %v2182_v19 = vpop.f32.mrf.mxu1  ;;  %v6358_v43 = vld [vmem:[%s10666_s2 + $0x1e8] sm:$0xf] }
 0x349   :  { %6054 = vmatmul.msk.bf16.gmra.mxu3 %vm2139_vm1, %v6040_v9  ;;  %v7490_v9 = vld [vmem:[%s10666_s2 + $0x174] sm:$0xf0] }
 0x34a   :  { %v6280_v48 = vor.u32 %v7490_v9, %v6279_v55 }
 0x34c   :  { %2845 = vmatpush.bf16.msra.mxu1 %v6280_v48  ;;  %v6390_v48 = vld [vmem:[%s10666_s2 + $0x228] sm:$0xf] }
 0x350   :  { %2846 = vmatpush.bf16.msra.mxu1 %v6272_v17  ;;  %v6078_v17 = vld [vmem:[%s10666_s2 + $0xa0] sm:$0xf0] }
 0x354   :  { %2847 = vmatpush.bf16.msra.mxu1 %v6264_v21 }
 0x358   :  { %2848 = vmatpush.bf16.msra.mxu1 %v6256_v34 }
 0x35c   :  { %2849 = vmatpush.bf16.msra.mxu1 %v6248_v1  ;;  %v6375_v1 = vor.u32 %v7508_v23, %v6374_v2  ;;  %v6170_v23 = vld [vmem:[%s10666_s2 + $0x28] sm:$0xf0] }
 0x36c   :  { %v2214_v24 = vpop.f32.mrf.mxu3 }
 0x36d   :  { %v2249_v30 = vpack.c.bf16 %v2214_v24, %v2170_v31  ;;  %v6118_v31 = vld [vmem:[%s10666_s2 + $0xf0] sm:$0xf0] }
 0x36e   :  { %v6121_v63 = vor.u32 %v7473_v14, %v6118_v31  ;;  %v6383_v14 = vor.u32 %v7510_v50, %v6382_v47  ;;  %v6350_v47 = vld [vmem:[%s10666_s2 + $0x1d8] sm:$0xf]  ;;  %v7502_v50 = vld [vmem:[%s10666_s2 + $0x1dc] sm:$0xf0] }
 0x36f   :  { %v2507_v29 = vunpack.c.l.b16 %v2249_v30  ;;  %v2508_v11 = vunpack.c.h.b16 %v2249_v30  ;;  %v6097_v30 = vor.u32 %v7467_v45, %v6094_v25  ;;  %v2185_v25 = vpop.f32.mrf.mxu1 }
 0x370   :  { %2471 = vmatpush.bf16.msra.mxu2 %v6121_v63 }
 0x374   :  { %v2216_v0 = vpop.f32.mrf.mxu3  ;;  %2472 = vmatpush.bf16.msra.mxu2 %v6113_v60 }
 0x375   :  { %v2250_v27 = vpack.c.bf16 %v2216_v0, %v2172_v8  ;;  %v7498_v8 = vld [vmem:[%s10666_s2 + $0x1b4] sm:$0xf0]  ;;  %v7512_v0 = vld [vmem:[%s10666_s2 + $0x22c] sm:$0xf0] }
 0x376   :  { %v6312_v28 = vor.u32 %v7498_v8, %v6311_v26  ;;  %v6210_v26 = vld [vmem:[%s10666_s2 + $0x78] sm:$0xf0] }
 0x377   :  { %v2509_v61 = vunpack.c.l.b16 %v2250_v27  ;;  %v2510_v49 = vunpack.c.h.b16 %v2250_v27  ;;  %v7479_v27 = vld [vmem:[%s10666_s2 + $0x11c] sm:$0xf]  ;;  %v6213_v60 = vor.u32 %v7459_v52, %v6210_v26  ;;  %v6342_v52 = vld [vmem:[%s10666_s2 + $0x1c8] sm:$0xf]  ;;  %v7500_v26 = vld [vmem:[%s10666_s2 + $0x1cc] sm:$0xf0] }
 0x378   :  { %2867 = vmatpush.bf16.msra.mxu3 %v6312_v28  ;;  %2473 = vmatpush.bf16.msra.mxu2 %v6105_v40  ;;  %v6145_v12 = vor.u32 %v7479_v27, %v6142_v33  ;;  %v7457_v28 = vld [vmem:[%s10666_s2 + $0x64] sm:$0xf]  ;;  %v7455_v40 = vld [vmem:[%s10666_s2 + $0x54] sm:$0xf]  ;;  %v6343_v2 = vor.u32 %v7500_v26, %v6342_v52 }
 0x379   :  { %v9851_v15 = vpack.c.b16 %v2509_v61, %v2507_v29  ;;  %v9853_v5 = vpack.c.b16 %v2510_v49, %v2508_v11  ;;  %v6391_v11 = vor.u32 %v7512_v0, %v6390_v48  ;;  %v7463_v61 = vld [vmem:[%s10666_s2 + $0x9c] sm:$0xf]  ;;  %v7516_v0 = vld [vmem:[%s10666_s2 + $0x24c] sm:$0xf0]  ;;  %v7453_v33 = vld [vmem:[%s10666_s2 + $0x44] sm:$0xf] }
 0x37b   :  { %6222 = vmatmul.msk.bf16.vlgmr.msrb.gmra.mxu3 %vm2419_vm3, %v9853_v5  ;;  %2632 = vmatmul.bf16.vlgmr.msrb.gmra.mxu1 %v9851_v15 }
 0x37c   :  { %v2219_v35 = vpop.f32.mrf.mxu3  ;;  %2474 = vmatpush.bf16.msra.mxu2 %v6097_v30  ;;  %3066 = vmatpush.bf16.msrb.mxu1 %v6399_v51  ;;  %v6406_v51 = vld [vmem:[%s10666_s2 + $0x248] sm:$0xf] }
 0x37d   :  { %v2251_v42 = vpack.c.bf16 %v2219_v35, %v2175_v6  ;;  %v2400_v6 = vpack.c.b16 %v2380_v22, %v2380_v22  ;;  %v6081_v35 = vor.u32 %v7463_v61, %v6078_v17 }
 0x37f   :  { %v2305_v58 = vunpack.c.l.b16 %v2251_v42  ;;  %v2306_v10 = vunpack.c.h.b16 %v2251_v42  ;;  %v2431_v53 = vsel %vm2426_vm2, %v2400_v6, 0 }
 0x380   :  { %2493 = vmatpush.bf16.msra.mxu0 %v2431_v53  ;;  %2475 = vmatpush.bf16.msra.mxu2 %v6089_v62 }
 0x381   :  { %v9929_v55 = vpack.c.b16 %v2306_v10, %v2306_v10  ;;  %v9931_v9 = vpack.c.b16 %v2305_v58, %v2305_v58  ;;  %3067 = vmatpush.bf16.msrb.mxu1 %v6391_v11 }
 0x384   :  { %v2221_v24 = vpop.f32.mrf.mxu3  ;;  %2494 = vmatpush.bf16.msra.mxu0 %v6145_v12  ;;  %2476 = vmatpush.bf16.msra.mxu2 %v6081_v35  ;;  %v6351_v35 = vor.u32 %v7502_v50, %v6350_v47 }
 0x385   :  { %v2252_v59 = vpack.c.bf16 %v2221_v24, %v2177_v44  ;;  %3068 = vmatpush.bf16.msrb.mxu1 %v6383_v14  ;;  %v6202_v24 = vld [vmem:[%s10666_s2 + $0x68] sm:$0xf0] }
 0x386   :  { %v6205_v20 = vor.u32 %v7457_v28, %v6202_v24  ;;  %v6493_v28 = vld [vmem:[%s10666_s2 + $0x2d0] sm:$0xf] }
 0x387   :  { %v2307_v3 = vunpack.c.l.b16 %v2252_v59  ;;  %v2308_v29 = vunpack.c.h.b16 %v2252_v59  ;;  %v6194_v59 = vld [vmem:[%s10666_s2 + $0x58] sm:$0xf0] }
 0x388   :  { %v6197_v48 = vor.u32 %v7455_v40, %v6194_v59  ;;  %v6485_v40 = vld [vmem:[%s10666_s2 + $0x2c0] sm:$0xf]  ;;  %v7530_v59 = vld [vmem:[%s10666_s2 + $0x2c4] sm:$0xf0] }
 0x389   :  { %v2311_v18 = vpack.c.b16 %v2307_v3, %v2305_v58  ;;  %v2312_v37 = vpack.c.b16 %v2308_v29, %v2306_v10  ;;  %v6366_v58 = vld [vmem:[%s10666_s2 + $0x1f8] sm:$0xf]  ;;  %3069 = vmatpush.bf16.msrb.mxu1 %v6375_v1  ;;  %v6186_v3 = vld [vmem:[%s10666_s2 + $0x48] sm:$0xf0]  ;;  %v6359_v29 = vor.u32 %v7504_v46, %v6358_v43 }
 0x38a   :  { %v10003_v10 = vld [vmem:[%s10666_s2 + $0x258] sm:$0xff]  ;;  %v6367_v7 = vor.u32 %v7506_v36, %v6366_v58  ;;  %v6154_v43 = vld [vmem:[%s10666_s2 + $0x8] sm:$0xf0] }
 0x38b   :  { %6223 = vmatmul.msk.bf16.gmra.mxu3 %vm2419_vm3, %v9929_v55  ;;  %2637 = vmatmul.bf16.gmra.mxu1 %v9931_v9  ;;  %v2316_v44 = vrot.slane %v2311_v18, 1  ;;  %v2319_v63 = vrot.slane %v2312_v37, 1  ;;  %v3014_v45 = vunpack.c.l.b16 %v10003_v10  ;;  %v7532_v1 = vld [vmem:[%s10666_s2 + $0x2d4] sm:$0xf0] }
 0x38c   :  { %v2224_v54 = vpop.f32.mrf.mxu3  ;;  %v6494_v58 = vor.u32 %v7532_v1, %v6493_v28 }
 0x38d   :  { %v2253_v49 = vpack.c.bf16 %v2224_v54, %v2180_v38  ;;  %v3034_v30 = vpack.c.b16 %v3014_v45, %v3014_v45  ;;  %3070 = vmatpush.bf16.msrb.mxu1 %v6367_v7  ;;  %v6407_v54 = vor.u32 %v7516_v0, %v6406_v51  ;;  %v7461_v45 = vld [vmem:[%s10666_s2 + $0x84] sm:$0xf]  ;;  %v6477_v51 = vld [vmem:[%s10666_s2 + $0x2b0] sm:$0xf] }
 0x38f   :  { %v2309_v57 = vunpack.c.l.b16 %v2253_v49  ;;  %v2310_v21 = vunpack.c.h.b16 %v2253_v49  ;;  %v3061_v27 = vsel %vm2426_vm2, %v3034_v30, 0  ;;  %v6189_v49 = vor.u32 %v7453_v33, %v6186_v3  ;;  %v7445_v30 = vld [vmem:[%s10666_s2 + $0x4] sm:$0xf] }
 0x390   :  { %3090 = vmatpush.bf16.msrb.mxu3 %v3061_v27 }
 0x391   :  { %v2313_v31 = vpack.c.b16 %v2309_v57, %v2309_v57  ;;  %v2314_v56 = vpack.c.b16 %v2310_v21, %v2310_v21  ;;  %3071 = vmatpush.bf16.msrb.mxu1 %v6359_v29  ;;  %v7495_v29 = vld [vmem:[%s10666_s2 + $0x1a4] sm:$0xf] }
 0x393   :  { %v9964_v13 = vrot.slane %v2313_v31, 1  ;;  %v9966_v39 = vrot.slane %v2314_v56, 1  ;;  %v7451_v56 = vld [vmem:[%s10666_s2 + $0x34] sm:$0xf] }
 0x394   :  { %v2226_v34 = vpop.f32.mrf.mxu3  ;;  %3091 = vmatpush.bf16.msrb.mxu3 %v6407_v54  ;;  %v6305_v54 = vld [vmem:[%s10666_s2 + $0x1a8] sm:$0xf0] }
 0x395   :  { %v9970_v42 = vsel %vm2315_vm4, %v2316_v44, %v9964_v13  ;;  %v9974_v32 = vsel %vm2315_vm4, %v2319_v63, %v9966_v39  ;;  %v2254_v8 = vpack.c.bf16 %v2226_v34, %v2182_v19  ;;  %v6178_v19 = vld [vmem:[%s10666_s2 + $0x38] sm:$0xf0]  ;;  %v2187_v63 = vpop.f32.mrf.mxu1  ;;  %3072 = vmatpush.bf16.msrb.mxu1 %v6351_v35  ;;  %v7524_v35 = vld [vmem:[%s10666_s2 + $0x294] sm:$0xf0] }
 0x396   :  { %2441 = vmatmul.bf16.vlgmr.msrb.gmra.mxu2 %v9970_v42  ;;  %6146 = vmatmul.msk.bf16.vlgmr.msrb.gmra.mxu0 %vm2419_vm3, %v9974_v32  ;;  %v6181_v44 = vor.u32 %v7451_v56, %v6178_v19  ;;  %v7491_v19 = vld [vmem:[%s10666_s2 + $0x184] sm:$0xf] }
 0x397   :  { %2660 = vmatpush.bf16.msrb.mxu2 %v6213_v60  ;;  %v2718_v22 = vunpack.c.l.b16 %v2254_v8  ;;  %v2719_v38 = vunpack.c.h.b16 %v2254_v8  ;;  %v7449_v60 = vld [vmem:[%s10666_s2 + $0x24] sm:$0xf]  ;;  %v2573_v8 = vunpack.c.h.b16 %v9732_v16  ;;  %v7447_v16 = vld [vmem:[%s10666_s2 + $0x14] sm:$0xf] }
 0x398   :  { %v6173_v24 = vor.u32 %v7449_v60, %v6170_v23 }
 0x399   :  { %v2722_v62 = vpack.c.b16 %v2718_v22, %v2309_v57  ;;  %v2723_v53 = vpack.c.b16 %v2719_v38, %v2310_v21  ;;  %v2593_v36 = vpack.c.b16 %v2573_v8, %v2573_v8  ;;  %3073 = vmatpush.bf16.msrb.mxu1 %v6343_v2  ;;  %v6486_v38 = vor.u32 %v7530_v59, %v6485_v40  ;;  %v6453_v8 = vld [vmem:[%s10666_s2 + $0x280] sm:$0xf]  ;;  %v7522_v2 = vld [vmem:[%s10666_s2 + $0x284] sm:$0xf0] }
 0x39b   :  { %2661 = vmatpush.bf16.msrb.mxu2 %v6205_v20  ;;  %v2727_v18 = vrot.slane %v2722_v62, 2  ;;  %v2730_v37 = vrot.slane %v2723_v53, 2  ;;  %v6162_v20 = vld [vmem:[%s10666_s2 + $0x18] sm:$0xf0]  ;;  %v2622_v22 = vsel %vm2426_vm2, %v2593_v36, 0  ;;  %v6308_v62 = vor.u32 %v7495_v29, %v6305_v54 }
 0x39c   :  { %v2229_v41 = vpop.f32.mrf.mxu3  ;;  %v6165_v7 = vor.u32 %v7447_v16, %v6162_v20  ;;  %2684 = vmatpush.bf16.msrb.mxu0 %v2622_v22  ;;  %v6281_v16 = vld [vmem:[%s10666_s2 + $0x178] sm:$0xf0]  ;;  %v6454_v36 = vor.u32 %v7522_v2, %v6453_v8  ;;  %v6588_v54 = vld [vmem:[%s10666_s2 + $0x368] sm:$0xf] }
 0x39d   :  { %v2255_v6 = vpack.c.bf16 %v2229_v41, %v2185_v25  ;;  %v6218_v25 = vld [vmem:[%s10666_s2 + $0x88] sm:$0xf0]  ;;  %v7528_v41 = vld [vmem:[%s10666_s2 + $0x2b4] sm:$0xf0]  ;;  %v2190_v0 = vpop.f32.mrf.mxu1  ;;  %v6265_v29 = vld [vmem:[%s10666_s2 + $0x158] sm:$0xf0] }
 0x39e   :  { %v6221_v46 = vor.u32 %v7461_v45, %v6218_v25  ;;  %v6478_v27 = vor.u32 %v7528_v41, %v6477_v51  ;;  %v7487_v41 = vld [vmem:[%s10666_s2 + $0x164] sm:$0xf] }
 0x39f   :  { %v10034_v11 = vunpack.c.l.b16 %v2255_v6  ;;  %v10036_v61 = vunpack.c.h.b16 %v2255_v6  ;;  %2662 = vmatpush.bf16.msrb.mxu2 %v6197_v48  ;;  %v6157_v48 = vor.u32 %v7445_v30, %v6154_v43  ;;  %v7520_v30 = vld [vmem:[%s10666_s2 + $0x274] sm:$0xf0] }
 0x3a0   :  { %2685 = vmatpush.bf16.msrb.mxu0 %v6221_v46 }
 0x3a1   :  { %v2724_v17 = vpack.c.b16 %v10034_v11, %v10034_v11  ;;  %v2725_v12 = vpack.c.b16 %v10036_v61, %v10036_v61 }
 0x3a3   :  { %v10048_v57 = vrot.slane %v2724_v17, 2  ;;  %v10050_v21 = vrot.slane %v2725_v12, 2  ;;  %2663 = vmatpush.bf16.msrb.mxu2 %v6189_v49  ;;  %v6469_v17 = vld [vmem:[%s10666_s2 + $0x2a0] sm:$0xf]  ;;  %v7526_v12 = vld [vmem:[%s10666_s2 + $0x2a4] sm:$0xf0] }
 0x3a4   :  { %v2231_v34 = vpop.f32.mrf.mxu3  ;;  %v6470_v50 = vor.u32 %v7526_v12, %v6469_v17  ;;  %v6257_v17 = vld [vmem:[%s10666_s2 + $0x148] sm:$0xf0] }
 0x3a5   :  { %v10053_v14 = vsel %vm2726_vm5, %v2730_v37, %v10050_v21  ;;  %v10056_v31 = vsel %vm2726_vm5, %v2727_v18, %v10048_v57  ;;  %v2256_v33 = vpack.c.bf16 %v2231_v34, %v2187_v63  ;;  %v6297_v18 = vld [vmem:[%s10666_s2 + $0x198] sm:$0xf0]  ;;  %v6461_v37 = vld [vmem:[%s10666_s2 + $0x290] sm:$0xf] }
 0x3a6   :  { %2446 = vmatmul.bf16.gmra.mxu2 %v9964_v13  ;;  %6147 = vmatmul.msk.bf16.gmra.mxu0 %vm2419_vm3, %v9966_v39  ;;  %v10159_v63 = vld [vmem:[%s10666_s2 + $0x2f0] sm:$0xff]  ;;  %v6462_v34 = vor.u32 %v7524_v35, %v6461_v37  ;;  %v6313_v37 = vld [vmem:[%s10666_s2 + $0x1b8] sm:$0xf0] }
 0x3a7   :  { %6317 = vmatmul.msk.bf16.vlgmr.msra.gmra.mxu3 %vm2419_vm3, %v10053_v14  ;;  %2850 = vmatmul.bf16.vlgmr.msra.gmra.mxu1 %v10056_v31  ;;  %v2942_v53 = vunpack.c.l.b16 %v2256_v33  ;;  %v2943_v49 = vunpack.c.h.b16 %v2256_v33  ;;  %v3234_v52 = vunpack.c.l.b16 %v10159_v63  ;;  %v7518_v33 = vld [vmem:[%s10666_s2 + $0x264] sm:$0xf0] }
 0x3a8   :  { %2664 = vmatpush.bf16.msrb.mxu2 %v6181_v44  ;;  %3286 = vmatpush.bf16.msra.mxu1 %v6494_v58  ;;  %v6289_v44 = vld [vmem:[%s10666_s2 + $0x188] sm:$0xf0]  ;;  %v6501_v58 = vld [vmem:[%s10666_s2 + $0x2e0] sm:$0xf] }
 0x3a9   :  { %v2946_v26 = vpack.c.b16 %v2942_v53, %v10034_v11  ;;  %v2947_v60 = vpack.c.b16 %v2943_v49, %v10036_v61  ;;  %v6292_v1 = vor.u32 %v7491_v19, %v6289_v44  ;;  %v7534_v11 = vld [vmem:[%s10666_s2 + $0x2e4] sm:$0xf0]  ;;  %v7489_v61 = vld [vmem:[%s10666_s2 + $0x174] sm:$0xf]  ;;  %v6249_v44 = vld [vmem:[%s10666_s2 + $0x138] sm:$0xf0] }
 0x3aa   :  { %v6502_v59 = vor.u32 %v7534_v11, %v6501_v58  ;;  %v6284_v22 = vor.u32 %v7489_v61, %v6281_v16  ;;  %v7481_v19 = vld [vmem:[%s10666_s2 + $0x134] sm:$0xf]  ;;  %v6564_v58 = vld [vmem:[%s10666_s2 + $0x338] sm:$0xf]  ;;  %v7544_v11 = vld [vmem:[%s10666_s2 + $0x33c] sm:$0xf0] }
 0x3ab   :  { %v2951_v40 = vrot.slane %v2946_v26, 3  ;;  %v2954_v45 = vrot.slane %v2947_v60, 3  ;;  %v7546_v26 = vld [vmem:[%s10666_s2 + $0x34c] sm:$0xf0]  ;;  %v6252_v8 = vor.u32 %v7481_v19, %v6249_v44  ;;  %v6392_v61 = vld [vmem:[%s10666_s2 + $0x230] sm:$0xf0] }
 0x3ac   :  { %2665 = vmatpush.bf16.msrb.mxu2 %v6173_v24  ;;  %v2234_v6 = vpop.f32.mrf.mxu3  ;;  %3287 = vmatpush.bf16.msra.mxu1 %v6486_v38  ;;  %v3254_v24 = vpack.c.b16 %v3234_v52, %v3234_v52  ;;  %v6445_v38 = vld [vmem:[%s10666_s2 + $0x270] sm:$0xf]  ;;  %v6572_v52 = vld [vmem:[%s10666_s2 + $0x348] sm:$0xf]  ;;  %v6368_v19 = vld [vmem:[%s10666_s2 + $0x200] sm:$0xf0] }
 0x3ad   :  { %v2257_v3 = vpack.c.bf16 %v2234_v6, %v2190_v0  ;;  %v6446_v51 = vor.u32 %v7520_v30, %v6445_v38  ;;  %v10208_v0 = vpop.f32.mrf.mxu1  ;;  %v6573_v2 = vor.u32 %v7546_v26, %v6572_v52  ;;  %v6556_v16 = vld [vmem:[%s10666_s2 + $0x328] sm:$0xf]  ;;  %v7536_v52 = vld [vmem:[%s10666_s2 + $0x2fc] sm:$0xf0]  ;;  %v6360_v26 = vld [vmem:[%s10666_s2 + $0x1f0] sm:$0xf0] }
 0x3ae   :  { %v3281_v20 = vsel %vm2426_vm2, %v3254_v24, 0 }
 0x3af   :  { %v2945_v47 = vunpack.c.h.b16 %v2257_v3  ;;  %3310 = vmatpush.bf16.msra.mxu3 %v3281_v20  ;;  %v7542_v20 = vld [vmem:[%s10666_s2 + $0x32c] sm:$0xf0] }
 0x3b0   :  { %2666 = vmatpush.bf16.msrb.mxu2 %v6165_v7  ;;  %3288 = vmatpush.bf16.msra.mxu1 %v6478_v27  ;;  %v6437_v27 = vld [vmem:[%s10666_s2 + $0x260] sm:$0xf]  ;;  %v6557_v38 = vor.u32 %v7542_v20, %v6556_v16  ;;  %v7499_v16 = vld [vmem:[%s10666_s2 + $0x1cc] sm:$0xf]  ;;  %v6344_v20 = vld [vmem:[%s10666_s2 + $0x1d0] sm:$0xf0] }
 0x3b1   :  { %v2949_v28 = vpack.c.b16 %v2945_v47, %v2945_v47 }
 0x3b3   :  { %v10185_v7 = vrot.slane %v2949_v28, 3  ;;  %3311 = vmatpush.bf16.msra.mxu3 %v6502_v59  ;;  %v7513_v28 = vld [vmem:[%s10666_s2 + $0x23c] sm:$0xf]  ;;  %v6384_v59 = vld [vmem:[%s10666_s2 + $0x220] sm:$0xf0] }
 0x3b4   :  { %2667 = vmatpush.bf16.msrb.mxu2 %v6157_v48  ;;  %3289 = vmatpush.bf16.msra.mxu1 %v6470_v50  ;;  %v6273_v48 = vld [vmem:[%s10666_s2 + $0x168] sm:$0xf0]  ;;  %v2236_v47 = vpop.f32.mrf.mxu3 }
 0x3b5   :  { %v10194_v43 = vsel %vm2950_vm6, %v2954_v45, %v10185_v7  ;;  %v6276_v6 = vor.u32 %v7487_v41, %v6273_v48  ;;  %v2195_v60 = vpop.f32.mrf.mxu1  ;;  %v10302_v45 = vld [vmem:[%s10666_s2 + $0x388] sm:$0xff]  ;;  %v6548_v48 = vld [vmem:[%s10666_s2 + $0x318] sm:$0xf] }
 0x3b6   :  { %2477 = vmatmul.bf16.vlgmr.msra.gmra.mxu2 %v9970_v42  ;;  %6148 = vmatmul.msk.bf16.vlgmr.msra.gmra.mxu0 %vm2419_vm3, %v9974_v32  ;;  %v7493_v42 = vld [vmem:[%s10666_s2 + $0x194] sm:$0xf]  ;;  %v2944_v32 = vunpack.c.l.b16 %v2257_v3  ;;  %v6438_v3 = vor.u32 %v7518_v33, %v6437_v27  ;;  %v3457_v30 = vunpack.c.l.b16 %v10302_v45 }
 0x3b7   :  { %6318 = vmatmul.msk.bf16.gmra.mxu3 %vm2419_vm3, %v10050_v21  ;;  %2855 = vmatmul.bf16.gmra.mxu1 %v10048_v57  ;;  %v6300_v56 = vor.u32 %v7493_v42, %v6297_v18  ;;  %v6580_v42 = vld [vmem:[%s10666_s2 + $0x358] sm:$0xf]  ;;  %v7497_v18 = vld [vmem:[%s10666_s2 + $0x1b4] sm:$0xf] }
 0x3b8   :  { %2878 = vmatpush.bf16.msra.mxu2 %v6308_v62  ;;  %v2948_v23 = vpack.c.b16 %v2944_v32, %v2944_v32  ;;  %3290 = vmatpush.bf16.msra.mxu1 %v6462_v34  ;;  %v7550_v62 = vld [vmem:[%s10666_s2 + $0x36c] sm:$0xf0]  ;;  %v7548_v32 = vld [vmem:[%s10666_s2 + $0x35c] sm:$0xf0]  ;;  %v6316_v34 = vor.u32 %v7497_v18, %v6313_v37  ;;  %v3477_v33 = vpack.c.b16 %v3457_v30, %v3457_v30 }
 0x3b9   :  { %v6589_v49 = vor.u32 %v7550_v62, %v6588_v54 }
 0x3ba   :  { %v10183_v25 = vrot.slane %v2948_v23, 3  ;;  %v3504_v54 = vsel %vm2426_vm2, %v3477_v33, 0 }
 0x3bc   :  { %2879 = vmatpush.bf16.msra.mxu2 %v6300_v56  ;;  %3291 = vmatpush.bf16.msra.mxu1 %v6454_v36  ;;  %v10197_v46 = vsel %vm2950_vm6, %v2951_v40, %v10183_v25  ;;  %v6581_v56 = vor.u32 %v7548_v32, %v6580_v42  ;;  %v2239_v23 = vpop.f32.mrf.mxu3  ;;  %v7509_v40 = vld [vmem:[%s10666_s2 + $0x21c] sm:$0xf]  ;;  %v6540_v32 = vld [vmem:[%s10666_s2 + $0x308] sm:$0xf] }
 0x3bd   :  { %v2259_v41 = vpack.c.bf16 %v2239_v23, %v2195_v60  ;;  %v6387_v27 = vor.u32 %v7509_v40, %v6384_v59  ;;  %v6352_v23 = vld [vmem:[%s10666_s2 + $0x1e0] sm:$0xf0]  ;;  %v6408_v40 = vld [vmem:[%s10666_s2 + $0x250] sm:$0xf0] }
 0x3c0   :  { %2880 = vmatpush.bf16.msra.mxu2 %v6292_v1  ;;  %3292 = vmatpush.bf16.msra.mxu1 %v6446_v51  ;;  %v6400_v1 = vld [vmem:[%s10666_s2 + $0x240] sm:$0xf0]  ;;  %v2258_v51 = vpack.c.bf16 %v2236_v47, %v10208_v0  ;;  %v7552_v0 = vld [vmem:[%s10666_s2 + $0x37c] sm:$0xf0]  ;;  %v7538_v47 = vld [vmem:[%s10666_s2 + $0x30c] sm:$0xf0] }
 0x3c1   :  { %v6403_v24 = vor.u32 %v7513_v28, %v6400_v1  ;;  %v3015_v1 = vunpack.c.h.b16 %v10003_v10  ;;  %v7515_v10 = vld [vmem:[%s10666_s2 + $0x24c] sm:$0xf] }
 0x3c2   :  { %v6411_v30 = vor.u32 %v7515_v10, %v6408_v40 }
 0x3c4   :  { %2881 = vmatpush.bf16.msra.mxu2 %v6284_v22  ;;  %3293 = vmatpush.bf16.msra.mxu1 %v6438_v3  ;;  %v2197_v22 = vpop.f32.mrf.mxu1  ;;  %v6376_v3 = vld [vmem:[%s10666_s2 + $0x210] sm:$0xf0] }
 0x3c6   :  { %2482 = vmatmul.bf16.gmra.mxu2 %v9964_v13  ;;  %6149 = vmatmul.msk.bf16.gmra.mxu0 %vm2419_vm3, %v9966_v39  ;;  %v7485_v13 = vld [vmem:[%s10666_s2 + $0x154] sm:$0xf]  ;;  %v2791_v39 = vunpack.c.h.b16 %v9867_v4  ;;  %v7483_v4 = vld [vmem:[%s10666_s2 + $0x144] sm:$0xf] }
 0x3c7   :  { %6412 = vmatmul.msk.bf16.vlgmr.msrb.gmra.mxu3 %vm2419_vm3, %v10194_v43  ;;  %3074 = vmatmul.bf16.vlgmr.msrb.gmra.mxu1 %v10197_v46  ;;  %v6268_v53 = vor.u32 %v7485_v13, %v6265_v29  ;;  %v6260_v35 = vor.u32 %v7483_v4, %v6257_v17  ;;  %v6596_v13 = vld [vmem:[%s10666_s2 + $0x378] sm:$0xf]  ;;  %v3167_v29 = vunpack.c.l.b16 %v2258_v51  ;;  %v3170_v4 = vunpack.c.h.b16 %v2259_v41  ;;  %v2241_v17 = vpop.f32.mrf.mxu3 }
 0x3c8   :  { %2882 = vmatpush.bf16.msra.mxu2 %v6276_v6  ;;  %v2811_v12 = vpack.c.b16 %v2791_v39, %v2791_v39  ;;  %3509 = vmatpush.bf16.msrb.mxu1 %v6589_v49  ;;  %v7540_v6 = vld [vmem:[%s10666_s2 + $0x31c] sm:$0xf0]  ;;  %v7507_v39 = vld [vmem:[%s10666_s2 + $0x20c] sm:$0xf]  ;;  %v3169_v49 = vunpack.c.l.b16 %v2259_v41  ;;  %v2260_v28 = vpack.c.bf16 %v2241_v17, %v2197_v22  ;;  %v6479_v17 = vld [vmem:[%s10666_s2 + $0x2b8] sm:$0xf0] }
 0x3c9   :  { %v6549_v62 = vor.u32 %v7540_v6, %v6548_v48  ;;  %3533 = vmatpush.bf16.msrb.mxu3 %v3504_v54  ;;  %v6379_v42 = vor.u32 %v7507_v39, %v6376_v3  ;;  %v7531_v48 = vld [vmem:[%s10666_s2 + $0x2d4] sm:$0xf]  ;;  %v6495_v6 = vld [vmem:[%s10666_s2 + $0x2d8] sm:$0xf0] }
 0x3ca   :  { %v2840_v50 = vsel %vm2426_vm2, %v2811_v12, 0  ;;  %v6597_v12 = vor.u32 %v7552_v0, %v6596_v13 }
 0x3cb   :  { %2902 = vmatpush.bf16.msra.mxu0 %v2840_v50  ;;  %v10331_v50 = vpack.c.b16 %v3169_v49, %v3167_v29 }
 0x3cc   :  { %2883 = vmatpush.bf16.msra.mxu2 %v6268_v53  ;;  %3510 = vmatpush.bf16.msrb.mxu1 %v6581_v56  ;;  %v3168_v53 = vunpack.c.h.b16 %v2258_v51  ;;  %v2200_v37 = vpop.f32.mrf.mxu1  ;;  %v7505_v56 = vld [vmem:[%s10666_s2 + $0x1fc] sm:$0xf] }
 0x3cd   :  { %3534 = vmatpush.bf16.msrb.mxu3 %v6597_v12  ;;  %v6371_v44 = vor.u32 %v7505_v56, %v6368_v19  ;;  %v7525_v19 = vld [vmem:[%s10666_s2 + $0x2a4] sm:$0xf] }
 0x3ce   :  { %v10333_v18 = vpack.c.b16 %v3170_v4, %v3168_v53  ;;  %v7527_v4 = vld [vmem:[%s10666_s2 + $0x2b4] sm:$0xf] }
 0x3cf   :  { %2903 = vmatpush.bf16.msra.mxu0 %v6316_v34  ;;  %v6532_v34 = vld [vmem:[%s10666_s2 + $0x2f8] sm:$0xf]  ;;  %v2244_v60 = vpop.f32.mrf.mxu3  ;;  %v6482_v12 = vor.u32 %v7527_v4, %v6479_v17 }
 0x3d0   :  { %2884 = vmatpush.bf16.msra.mxu2 %v6260_v35  ;;  %3511 = vmatpush.bf16.msrb.mxu1 %v6573_v2  ;;  %v6541_v35 = vor.u32 %v7538_v47, %v6540_v32  ;;  %v7501_v2 = vld [vmem:[%s10666_s2 + $0x1dc] sm:$0xf]  ;;  %v2261_v51 = vpack.c.bf16 %v2244_v60, %v2200_v37 }
 0x3d2   :  { %v3386_v33 = vunpack.c.l.b16 %v2261_v51  ;;  %v3387_v13 = vunpack.c.h.b16 %v2261_v51  ;;  %v6590_v51 = vld [vmem:[%s10666_s2 + $0x370] sm:$0xf0] }
 0x3d4   :  { %2885 = vmatpush.bf16.msra.mxu2 %v6252_v8 }
 0x3d6   :  { %2668 = vmatmul.bf16.vlgmr.msrb.gmra.mxu2 %v9851_v15  ;;  %6224 = vmatmul.msk.bf16.vlgmr.msrb.gmra.mxu0 %vm2419_vm3, %v9853_v5  ;;  %v7511_v15 = vld [vmem:[%s10666_s2 + $0x22c] sm:$0xf]  ;;  %v6565_v5 = vor.u32 %v7544_v11, %v6564_v58  ;;  %v3035_v58 = vpack.c.b16 %v3015_v1, %v3015_v1  ;;  %v2202_v11 = vpop.f32.mrf.mxu1  ;;  %v7519_v1 = vld [vmem:[%s10666_s2 + $0x274] sm:$0xf] }
 0x3d7   :  { %6413 = vmatmul.msk.bf16.gmra.mxu3 %vm2419_vm3, %v10185_v7  ;;  %3079 = vmatmul.bf16.gmra.mxu1 %v10183_v25  ;;  %v6395_v36 = vor.u32 %v7511_v15, %v6392_v61  ;;  %v3171_v15 = vunpack.c.l.b16 %v2260_v28  ;;  %v2246_v22 = vpop.f32.mrf.mxu3 }
 0x3d8   :  { %3102 = vmatpush.bf16.msrb.mxu2 %v6403_v24  ;;  %3512 = vmatpush.bf16.msrb.mxu1 %v6565_v5  ;;  %v6355_v24 = vor.u32 %v7501_v2, %v6352_v23  ;;  %v3172_v5 = vunpack.c.h.b16 %v2260_v28  ;;  %v3064_v61 = vsel %vm2426_vm2, %v3035_v58, 0  ;;  %v2262_v41 = vpack.c.bf16 %v2246_v22, %v2202_v11  ;;  %v7521_v23 = vld [vmem:[%s10666_s2 + $0x284] sm:$0xf] }
 0x3d9   :  { %3126 = vmatpush.bf16.msrb.mxu0 %v3064_v61  ;;  %v3390_v54 = vpack.c.b16 %v3386_v33, %v3171_v15  ;;  %v3235_v28 = vunpack.c.h.b16 %v10159_v63  ;;  %v7517_v63 = vld [vmem:[%s10666_s2 + $0x264] sm:$0xf] }
 0x3da   :  { %v10379_v59 = vpack.c.b16 %v3172_v5, %v3172_v5  ;;  %v3388_v0 = vunpack.c.l.b16 %v2262_v41  ;;  %v3389_v39 = vunpack.c.h.b16 %v2262_v41 }
 0x3db   :  { %v3394_v32 = vrot.slane %v3390_v54, 1  ;;  %v3255_v58 = vpack.c.b16 %v3235_v28, %v3235_v28  ;;  %v7537_v28 = vld [vmem:[%s10666_s2 + $0x30c] sm:$0xf] }
 0x3dc   :  { %3103 = vmatpush.bf16.msrb.mxu2 %v6395_v36  ;;  %3513 = vmatpush.bf16.msrb.mxu1 %v6557_v38  ;;  %v6347_v36 = vor.u32 %v7499_v16, %v6344_v20  ;;  %v10381_v38 = vpack.c.b16 %v3171_v15, %v3171_v15  ;;  %v3392_v53 = vpack.c.b16 %v3388_v0, %v3388_v0  ;;  %v6439_v16 = vld [vmem:[%s10666_s2 + $0x268] sm:$0xf0]  ;;  %v7533_v20 = vld [vmem:[%s10666_s2 + $0x2e4] sm:$0xf] }
 0x3dd   :  { %3127 = vmatpush.bf16.msrb.mxu0 %v6411_v30  ;;  %v3393_v49 = vpack.c.b16 %v3389_v39, %v3389_v39  ;;  %v6442_v10 = vor.u32 %v7517_v63, %v6439_v16  ;;  %v7549_v30 = vld [vmem:[%s10666_s2 + $0x36c] sm:$0xf]  ;;  %v7551_v63 = vld [vmem:[%s10666_s2 + $0x37c] sm:$0xf] }
 0x3de   :  { %v10411_v37 = vrot.slane %v3392_v53, 1  ;;  %v7545_v39 = vld [vmem:[%s10666_s2 + $0x34c] sm:$0xf] }
 0x3e0   :  { %3104 = vmatpush.bf16.msrb.mxu2 %v6387_v27  ;;  %3514 = vmatpush.bf16.msrb.mxu1 %v6549_v62  ;;  %v6498_v27 = vor.u32 %v7531_v48, %v6495_v6  ;;  %v3391_v62 = vpack.c.b16 %v3387_v13, %v3172_v5  ;;  %v3284_v5 = vsel %vm2426_vm2, %v3255_v58, 0  ;;  %v6593_v48 = vor.u32 %v7549_v30, %v6590_v51 }
 0x3e2   :  { %v3397_v47 = vrot.slane %v3391_v62, 1  ;;  %v7543_v62 = vld [vmem:[%s10666_s2 + $0x33c] sm:$0xf] }
 0x3e4   :  { %3105 = vmatpush.bf16.msrb.mxu2 %v6379_v42  ;;  %3515 = vmatpush.bf16.msrb.mxu1 %v6541_v35  ;;  %v10413_v35 = vrot.slane %v3393_v49, 1 }
 0x3e6   :  { %2673 = vmatmul.bf16.gmra.mxu2 %v9931_v9  ;;  %6225 = vmatmul.msk.bf16.gmra.mxu0 %vm2419_vm3, %v9929_v55  ;;  %v7503_v9 = vld [vmem:[%s10666_s2 + $0x1ec] sm:$0xf]  ;;  %v6533_v55 = vor.u32 %v7536_v52, %v6532_v34  ;;  %v10425_v52 = vsel %vm2315_vm4, %v3397_v47, %v10413_v35 }
 0x3e7   :  { %6507 = vmatmul.msk.bf16.vlgmr.msra.gmra.mxu3 %vm2419_vm3, %v10333_v18  ;;  %3294 = vmatmul.bf16.vlgmr.msra.gmra.mxu1 %v10331_v50  ;;  %v6363_v8 = vor.u32 %v7503_v9, %v6360_v26  ;;  %v10429_v9 = vsel %vm2315_vm4, %v3394_v32, %v10411_v37  ;;  %v6463_v26 = vld [vmem:[%s10666_s2 + $0x298] sm:$0xf0]  ;;  %v6558_v32 = vld [vmem:[%s10666_s2 + $0x330] sm:$0xf0] }
 0x3e8   :  { %3106 = vmatpush.bf16.msrb.mxu2 %v6371_v44  ;;  %3516 = vmatpush.bf16.msrb.mxu1 %v6533_v55  ;;  %v6471_v44 = vld [vmem:[%s10666_s2 + $0x2a8] sm:$0xf0]  ;;  %v7523_v55 = vld [vmem:[%s10666_s2 + $0x294] sm:$0xf] }
 0x3e9   :  { %v6474_v34 = vor.u32 %v7525_v19, %v6471_v44  ;;  %v7539_v44 = vld [vmem:[%s10666_s2 + $0x31c] sm:$0xf] }
 0x3ec   :  { %3107 = vmatpush.bf16.msrb.mxu2 %v6363_v8  ;;  %v6466_v8 = vor.u32 %v7523_v55, %v6463_v26 }
 0x3f0   :  { %3108 = vmatpush.bf16.msrb.mxu2 %v6355_v24  ;;  %v6447_v24 = vld [vmem:[%s10666_s2 + $0x278] sm:$0xf0] }
 0x3f1   :  { %v6450_v15 = vor.u32 %v7519_v1, %v6447_v24  ;;  %v6542_v1 = vld [vmem:[%s10666_s2 + $0x310] sm:$0xf0] }
 0x3f4   :  { %3109 = vmatpush.bf16.msrb.mxu2 %v6347_v36  ;;  %v6503_v36 = vld [vmem:[%s10666_s2 + $0x2e8] sm:$0xf0] }
 0x3f5   :  { %v6506_v22 = vor.u32 %v7533_v20, %v6503_v36  ;;  %v6598_v20 = vld [vmem:[%s10666_s2 + $0x380] sm:$0xf0] }
 0x3f6   :  { %2886 = vmatmul.bf16.vlgmr.msra.gmra.mxu2 %v10056_v31  ;;  %6319 = vmatmul.msk.bf16.vlgmr.msra.gmra.mxu0 %vm2419_vm3, %v10053_v14  ;;  %v7529_v31 = vld [vmem:[%s10666_s2 + $0x2c4] sm:$0xf]  ;;  %v6487_v14 = vld [vmem:[%s10666_s2 + $0x2c8] sm:$0xf0] }
 0x3f7   :  { %6508 = vmatmul.msk.bf16.gmra.mxu3 %vm2419_vm3, %v10379_v59  ;;  %3299 = vmatmul.bf16.gmra.mxu1 %v10381_v38  ;;  %v6490_v29 = vor.u32 %v7529_v31, %v6487_v14  ;;  %v6574_v31 = vld [vmem:[%s10666_s2 + $0x350] sm:$0xf0] }
 0x3f8   :  { %v10395_v3 = vpop.f32.mrf.mxu1  ;;  %3322 = vmatpush.bf16.msra.mxu2 %v6498_v27  ;;  %3346 = vmatpush.bf16.msra.mxu0 %v3284_v5  ;;  %v7547_v27 = vld [vmem:[%s10666_s2 + $0x35c] sm:$0xf] }
 0x3fc   :  { %3323 = vmatpush.bf16.msra.mxu2 %v6490_v29  ;;  %3347 = vmatpush.bf16.msra.mxu0 %v6506_v22  ;;  %v6577_v29 = vor.u32 %v7545_v39, %v6574_v31 }
 0x3fe   :  { %v10409_v42 = vpop.f32.mrf.mxu3 }
 0x400   :  { %v10415_v56 = vpop.f32.mrf.mxu1  ;;  %3324 = vmatpush.bf16.msra.mxu2 %v6482_v12 }
 0x404   :  { %3325 = vmatpush.bf16.msra.mxu2 %v6474_v34  ;;  %v6550_v34 = vld [vmem:[%s10666_s2 + $0x320] sm:$0xf0] }
 0x406   :  { %2891 = vmatmul.bf16.gmra.mxu2 %v10048_v57  ;;  %6320 = vmatmul.msk.bf16.gmra.mxu0 %vm2419_vm3, %v10050_v21  ;;  %v10440_v60 = vpop.f32.mrf.mxu3  ;;  %v6455_v57 = vld [vmem:[%s10666_s2 + $0x288] sm:$0xf0] }
 0x407   :  { %6602 = vmatmul.msk.bf16.vlgmr.msrb.gmra.mxu3 %vm2419_vm3, %v10425_v52  ;;  %3517 = vmatmul.bf16.vlgmr.msrb.gmra.mxu1 %v10429_v9  ;;  %v6458_v21 = vor.u32 %v7521_v23, %v6455_v57 }
 0x408   :  { %v10445_v2 = vpop.f32.mrf.mxu1  ;;  %3326 = vmatpush.bf16.msra.mxu2 %v6466_v8  ;;  %v6553_v8 = vor.u32 %v7539_v44, %v6550_v34 }
 0x40c   :  { %3327 = vmatpush.bf16.msra.mxu2 %v6458_v21 }
 0x40e   :  { %v10460_v11 = vpop.f32.mrf.mxu3 }
 0x410   :  { %v2640_v61 = vpop.f32.mrf.mxu1  ;;  %3328 = vmatpush.bf16.msra.mxu2 %v6450_v15  ;;  %v6545_v15 = vor.u32 %v7537_v28, %v6542_v1 }
 0x411   :  { %v6534_v61 = vld [vmem:[%s10666_s2 + $0x300] sm:$0xf0] }
 0x413   :  { %v2460_v40 = vpop.f32.mrf.mxu0 }
 0x414   :  { %3329 = vmatpush.bf16.msra.mxu2 %v6442_v10 }
 0x416   :  { %3110 = vmatmul.bf16.vlgmr.msrb.gmra.mxu2 %v10197_v46  ;;  %6414 = vmatmul.msk.bf16.vlgmr.msrb.gmra.mxu0 %vm2419_vm3, %v10194_v43  ;;  %v2658_v41 = vpop.f32.mrf.mxu3  ;;  %v6582_v46 = vld [vmem:[%s10666_s2 + $0x360] sm:$0xf0] }
 0x417   :  { %6603 = vmatmul.msk.bf16.gmra.mxu3 %vm2419_vm3, %v10413_v35  ;;  %3522 = vmatmul.bf16.gmra.mxu1 %v10411_v37  ;;  %v6585_v13 = vor.u32 %v7547_v27, %v6582_v46 }
 0x418   :  { %3545 = vmatpush.bf16.msrb.mxu2 %v6593_v48 }
 0x419   :  { %v2442_v6 = vpop.f32.mrf.mxu2 }
 0x41a   :  { %v2461_v33 = vadd.f32 %v2460_v40, %v2442_v6  ;;  %v6601_v40 = vor.u32 %v7551_v63, %v6598_v20 }
 0x41b   :  { %v2462_v43 = vpop.f32.mrf.mxu0 }
 0x41c   :  { %v2634_v0 = vadd.f32 %v10395_v3, %v2461_v33  ;;  %3546 = vmatpush.bf16.msrb.mxu2 %v6585_v13  ;;  %v6566_v3 = vld [vmem:[%s10666_s2 + $0x340] sm:$0xf0] }
 0x41d   :  { %v6569_v49 = vor.u32 %v7543_v62, %v6566_v3 }
 0x41e   :  { %v2652_v14 = vadd.f32 %v10409_v42, %v2634_v0  ;;  %v7541_v42 = vld [vmem:[%s10666_s2 + $0x32c] sm:$0xf] }
 0x41f   :  { %v6561_v19 = vor.u32 %v7541_v42, %v6558_v32 }
 0x420   :  { %3547 = vmatpush.bf16.msrb.mxu2 %v6577_v29 }
 0x421   :  { %v2444_v54 = vpop.f32.mrf.mxu2 }
 0x422   :  { %v2463_v53 = vadd.f32 %v2462_v43, %v2444_v54 }
 0x423   :  { %v2465_v4 = vpop.f32.mrf.mxu0 }
 0x424   :  { %v2636_v17 = vadd.f32 %v10415_v56, %v2463_v53  ;;  %v2851_v12 = vpop.f32.mrf.mxu1  ;;  %3548 = vmatpush.bf16.msrb.mxu2 %v6569_v49 }
 0x426   :  { %3115 = vmatmul.bf16.gmra.mxu2 %v10183_v25  ;;  %6415 = vmatmul.msk.bf16.gmra.mxu0 %vm2419_vm3, %v10185_v7  ;;  %v2654_v47 = vadd.f32 %v10440_v60, %v2636_v17  ;;  %v3458_v7 = vunpack.c.h.b16 %v10302_v45 }
 0x428   :  { %3549 = vmatpush.bf16.msrb.mxu2 %v6561_v19  ;;  %v3478_v24 = vpack.c.b16 %v3458_v7, %v3458_v7 }
 0x429   :  { %v2447_v56 = vpop.f32.mrf.mxu2 }
 0x42a   :  { %v2466_v55 = vadd.f32 %v2465_v4, %v2447_v56  ;;  %v2869_v26 = vpop.f32.mrf.mxu3  ;;  %v3507_v5 = vsel %vm2426_vm2, %v3478_v24, 0 }
 0x42b   :  { %v2870_v25 = vadd.f32 %v2869_v26, %v2851_v12  ;;  %v2467_v23 = vpop.f32.mrf.mxu0  ;;  %3569 = vmatpush.bf16.msrb.mxu0 %v3507_v5 }
 0x42c   :  { %v2639_v60 = vadd.f32 %v10445_v2, %v2466_v55  ;;  %v2853_v57 = vpop.f32.mrf.mxu1  ;;  %3550 = vmatpush.bf16.msrb.mxu2 %v6553_v8  ;;  %v7535_v2 = vld [vmem:[%s10666_s2 + $0x2fc] sm:$0xf] }
 0x42d   :  { %v2914_v21 = vadd.f32 %v2870_v25, %v2652_v14 }
 0x42e   :  { %v2657_v58 = vadd.f32 %v10460_v11, %v2639_v60  ;;  %v6537_v11 = vor.u32 %v7535_v2, %v6534_v61 }
 0x42f   :  { %3570 = vmatpush.bf16.msrb.mxu0 %v6601_v40 }
 0x430   :  { %3551 = vmatpush.bf16.msrb.mxu2 %v6545_v15 }
 0x431   :  { %v2449_v45 = vpop.f32.mrf.mxu2 }
 0x432   :  { %v2871_v16 = vpop.f32.mrf.mxu3 }
 0x433   :  { %v2872_v10 = vadd.f32 %v2871_v16, %v2853_v57  ;;  %v2496_v36 = vpop.f32.mrf.mxu0 }
 0x434   :  { %v2856_v22 = vpop.f32.mrf.mxu1  ;;  %3552 = vmatpush.bf16.msrb.mxu2 %v6537_v11 }
 0x435   :  { %v2916_v30 = vadd.f32 %v2872_v10, %v2654_v47 }
 0x436   :  { %3330 = vmatmul.bf16.vlgmr.msra.gmra.mxu2 %v10331_v50  ;;  %6509 = vmatmul.msk.bf16.vlgmr.msra.gmra.mxu0 %vm2419_vm3, %v10333_v18 }
 0x439   :  { %v2478_v51 = vpop.f32.mrf.mxu2 }
 0x43a   :  { %v2497_v41 = vadd.f32 %v2496_v36, %v2478_v51  ;;  %v2874_v48 = vpop.f32.mrf.mxu3 }
 0x43b   :  { %v2875_v6 = vadd.f32 %v2874_v48, %v2856_v22  ;;  %v2498_v27 = vpop.f32.mrf.mxu0 }
 0x43c   :  { %v2858_v46 = vpop.f32.mrf.mxu1 }
 0x43d   :  { %v2918_v33 = vadd.f32 %v2875_v6, %v2657_v58 }
 0x441   :  { %v2480_v13 = vpop.f32.mrf.mxu2 }
 0x442   :  { %v2499_v43 = vadd.f32 %v2498_v27, %v2480_v13  ;;  %v2876_v0 = vpop.f32.mrf.mxu3 }
 0x443   :  { %v2501_v39 = vpop.f32.mrf.mxu0 }
 0x444   :  { %v3075_v31 = vpop.f32.mrf.mxu1 }
 0x446   :  { %3335 = vmatmul.bf16.gmra.mxu2 %v10381_v38  ;;  %6510 = vmatmul.msk.bf16.gmra.mxu0 %vm2419_vm3, %v10379_v59 }
 0x449   :  { %v2483_v50 = vpop.f32.mrf.mxu2 }
 0x44a   :  { %v2502_v14 = vadd.f32 %v2501_v39, %v2483_v50  ;;  %v3093_v18 = vpop.f32.mrf.mxu3 }
 0x44b   :  { %v3094_v29 = vadd.f32 %v3093_v18, %v3075_v31  ;;  %v2503_v54 = vpop.f32.mrf.mxu0 }
 0x44c   :  { %v3077_v62 = vpop.f32.mrf.mxu1 }
 0x44d   :  { %v3138_v3 = vadd.f32 %v3094_v29, %v2914_v21 }
 0x451   :  { %v2485_v53 = vpop.f32.mrf.mxu2 }
 0x452   :  { %v3095_v49 = vpop.f32.mrf.mxu3 }
 0x453   :  { %v3096_v4 = vadd.f32 %v3095_v49, %v3077_v62  ;;  %v2687_v17 = vpop.f32.mrf.mxu0 }
 0x454   :  { %v3080_v12 = vpop.f32.mrf.mxu1 }
 0x455   :  { %v3140_v42 = vadd.f32 %v3096_v4, %v2916_v30 }
 0x456   :  { %3553 = vmatmul.bf16.vlgmr.msrb.gmra.mxu2 %v10429_v9  ;;  %6604 = vmatmul.msk.bf16.vlgmr.msrb.gmra.mxu0 %vm2419_vm3, %v10425_v52 }
 0x459   :  { %v2669_v38 = vpop.f32.mrf.mxu2 }
 0x45a   :  { %v2670_v59 = vadd.f32 %v2669_v38, %v2497_v41  ;;  %v3098_v32 = vpop.f32.mrf.mxu3 }
 0x45b   :  { %v3099_v47 = vadd.f32 %v3098_v32, %v3080_v12  ;;  %v2689_v19 = vpop.f32.mrf.mxu0 }
 0x45c   :  { %v2688_v56 = vadd.f32 %v2687_v17, %v2670_v59  ;;  %v3082_v44 = vpop.f32.mrf.mxu1 }
 0x45d   :  { %v3142_v34 = vadd.f32 %v3099_v47, %v2918_v33 }
 0x461   :  { %v2671_v55 = vpop.f32.mrf.mxu2 }
 0x462   :  { %v2672_v26 = vadd.f32 %v2671_v55, %v2499_v43  ;;  %v3100_v8 = vpop.f32.mrf.mxu3 }
 0x463   :  { %v2692_v25 = vpop.f32.mrf.mxu0 }
 0x464   :  { %v2690_v23 = vadd.f32 %v2689_v19, %v2672_v26  ;;  %v3295_v7 = vpop.f32.mrf.mxu1 }
 0x466   :  { %3558 = vmatmul.bf16.gmra.mxu2 %v10411_v37  ;;  %6605 = vmatmul.msk.bf16.gmra.mxu0 %vm2419_vm3, %v10413_v35 }
 0x469   :  { %v2674_v52 = vpop.f32.mrf.mxu2 }
 0x46a   :  { %v2675_v9 = vadd.f32 %v2674_v52, %v2502_v14  ;;  %v3313_v60 = vpop.f32.mrf.mxu3 }
 0x46b   :  { %v3314_v57 = vadd.f32 %v3313_v60, %v3295_v7  ;;  %v2694_v21 = vpop.f32.mrf.mxu0 }
 0x46c   :  { %v2693_v28 = vadd.f32 %v2692_v25, %v2675_v9  ;;  %v3297_v1 = vpop.f32.mrf.mxu1 }
 0x46d   :  { %v3358_v24 = vadd.f32 %v3314_v57, %v3138_v3 }
 0x471   :  { %v2676_v58 = vpop.f32.mrf.mxu2 }
 0x472   :  { %v3315_v15 = vpop.f32.mrf.mxu3 }
 0x473   :  { %v3316_v5 = vadd.f32 %v3315_v15, %v3297_v1  ;;  %v2905_v45 = vpop.f32.mrf.mxu0 }
 0x474   :  { %v3300_v2 = vpop.f32.mrf.mxu1 }
 0x475   :  { %v3360_v61 = vadd.f32 %v3316_v5, %v3140_v42 }
 0x479   :  { %v2887_v63 = vpop.f32.mrf.mxu2 }
 0x47a   :  { %v2906_v16 = vadd.f32 %v2905_v45, %v2887_v63  ;;  %v3318_v37 = vpop.f32.mrf.mxu3 }
 0x47b   :  { %v3319_v11 = vadd.f32 %v3318_v37, %v3300_v2  ;;  %v2907_v20 = vpop.f32.mrf.mxu0 }
 0x47c   :  { %v2915_v35 = vadd.f32 %v2906_v16, %v2688_v56  ;;  %v3302_v10 = vpop.f32.mrf.mxu1 }
 0x47d   :  { %v3362_v36 = vadd.f32 %v3319_v11, %v3142_v34 }
 0x481   :  { %v2889_v40 = vpop.f32.mrf.mxu2 }
 0x482   :  { %v2908_v22 = vadd.f32 %v2907_v20, %v2889_v40  ;;  %v3320_v30 = vpop.f32.mrf.mxu3 }
 0x483   :  { %v2910_v51 = vpop.f32.mrf.mxu0 }
 0x484   :  { %v2917_v41 = vadd.f32 %v2908_v22, %v2690_v23  ;;  %v3518_v48 = vpop.f32.mrf.mxu1 }
 0x489   :  { %v2892_v6 = vpop.f32.mrf.mxu2 }
 0x48a   :  { %v2911_v27 = vadd.f32 %v2910_v51, %v2892_v6  ;;  %v3536_v46 = vpop.f32.mrf.mxu3 }
 0x48b   :  { %v3537_v33 = vadd.f32 %v3536_v46, %v3518_v48  ;;  %v2912_v13 = vpop.f32.mrf.mxu0 }
 0x48c   :  { %v2919_v43 = vadd.f32 %v2911_v27, %v2693_v28  ;;  %v3520_v0 = vpop.f32.mrf.mxu1  ;;  %v3587_v28 = vld [vmem:[%s10668_s4] sm:$0x3] }
 0x48d   :  { %v3581_v39 = vadd.f32 %v3537_v33, %v3358_v24  ;;  %v3589_v24 = vperm.slane %v3587_v28, 0  ;;  %v3590_v45 = vperm.slane %v3587_v28, 1 }
 0x491   :  { %v2894_v31 = vpop.f32.mrf.mxu2 }
 0x492   :  { %v3538_v50 = vpop.f32.mrf.mxu3 }
 0x493   :  { %v3539_v14 = vadd.f32 %v3538_v50, %v3520_v0  ;;  %v3129_v18 = vpop.f32.mrf.mxu0 }
 0x494   :  { %v3523_v29 = vpop.f32.mrf.mxu1 }
 0x495   :  { %v3583_v54 = vadd.f32 %v3539_v14, %v3360_v61  ;;  %v3593_v61 = vadd.f32 %v3589_v24, %v3581_v39 }
 0x497   :  { %v3599_v11 = vmax.f32 %v3593_v61, 0.0  ;;  %v3595_v30 = vadd.f32 %v3589_v24, %v3583_v54 }
 0x499   :  { %v3111_v62 = vpop.f32.mrf.mxu2  ;;  %v3601_v6 = vmax.f32 %v3595_v30, 0.0 }
 0x49a   :  { %v3130_v3 = vadd.f32 %v3129_v18, %v3111_v62  ;;  %v3541_v53 = vpop.f32.mrf.mxu3 }
 0x49b   :  { %v3542_v49 = vadd.f32 %v3541_v53, %v3523_v29  ;;  %v3131_v4 = vpop.f32.mrf.mxu0 }
 0x49c   :  { %v3139_v17 = vadd.f32 %v3130_v3, %v2915_v35  ;;  %v3525_v12 = vpop.f32.mrf.mxu1 }
 0x49d   :  { %v3585_v42 = vadd.f32 %v3542_v49, %v3362_v36 }
 0x49f   :  { %v3597_v39 = vadd.f32 %v3589_v24, %v3585_v42 }
 0x4a1   :  { %v3113_v38 = vpop.f32.mrf.mxu2  ;;  %v3603_v14 = vmax.f32 %v3597_v39, 0.0 }
 0x4a2   :  { %v3132_v59 = vadd.f32 %v3131_v4, %v3113_v38  ;;  %v3543_v32 = vpop.f32.mrf.mxu3 }
 0x4a3   :  { %v3134_v47 = vpop.f32.mrf.mxu0 }
 0x4a4   :  { %v3141_v19 = vadd.f32 %v3132_v59, %v2917_v41 }
 0x4a9   :  { %v3116_v56 = vpop.f32.mrf.mxu2 }
 0x4aa   :  { %v3135_v44 = vadd.f32 %v3134_v47, %v3116_v56 }
 0x4ab   :  { %v3136_v34 = vpop.f32.mrf.mxu0 }
 0x4ac   :  { %v3143_v55 = vadd.f32 %v3135_v44, %v2919_v43 }
 0x4b1   :  { %v3118_v26 = vpop.f32.mrf.mxu2 }
 0x4b3   :  { %v3349_v8 = vpop.f32.mrf.mxu0 }
 0x4b9   :  { %v3331_v25 = vpop.f32.mrf.mxu2 }
 0x4ba   :  { %v3350_v1 = vadd.f32 %v3349_v8, %v3331_v25 }
 0x4bb   :  { %v3351_v23 = vpop.f32.mrf.mxu0 }
 0x4bc   :  { %v3359_v15 = vadd.f32 %v3350_v1, %v3139_v17 }
 0x4c1   :  { %v3333_v7 = vpop.f32.mrf.mxu2 }
 0x4c2   :  { %v3352_v16 = vadd.f32 %v3351_v23, %v3333_v7 }
 0x4c3   :  { %v3354_v52 = vpop.f32.mrf.mxu0 }
 0x4c4   :  { %v3361_v10 = vadd.f32 %v3352_v16, %v3141_v19 }
 0x4c9   :  { %v3336_v9 = vpop.f32.mrf.mxu2 }
 0x4ca   :  { %v3355_v41 = vadd.f32 %v3354_v52, %v3336_v9 }
 0x4cb   :  { %v3356_v60 = vpop.f32.mrf.mxu0 }
 0x4cc   :  { %v3363_v33 = vadd.f32 %v3355_v41, %v3143_v55 }
 0x4d1   :  { %v3338_v57 = vpop.f32.mrf.mxu2 }
 0x4d3   :  { %v3572_v21 = vpop.f32.mrf.mxu0 }
 0x4d9   :  { %v3554_v58 = vpop.f32.mrf.mxu2 }
 0x4da   :  { %v3573_v5 = vadd.f32 %v3572_v21, %v3554_v58 }
 0x4db   :  { %v3574_v2 = vpop.f32.mrf.mxu0 }
 0x4dc   :  { %v3582_v63 = vadd.f32 %v3573_v5, %v3359_v15 }
 0x4de   :  { %v3594_v37 = vadd.f32 %v3590_v45, %v3582_v63 }
 0x4e0   :  { %v3600_v20 = vmax.f32 %v3594_v37, 0.0 }
 0x4e1   :  { %v3556_v35 = vpop.f32.mrf.mxu2 }
 0x4e2   :  { %v10561_v36 = vpack.c.bf16 %v3600_v20, %v3599_v11  ;;  %v3575_v40 = vadd.f32 %v3574_v2, %v3556_v35 }
 0x4e3   :  { %v3577_v22 = vpop.f32.mrf.mxu0 }
 0x4e4   :  { %v3584_v51 = vadd.f32 %v3575_v40, %v3361_v10 }
 0x4e6   :  { %v3596_v48 = vadd.f32 %v3590_v45, %v3584_v51 }
 0x4e8   :  { %v3602_v27 = vmax.f32 %v3596_v48, 0.0 }
 0x4e9   :  { %v3559_v46 = vpop.f32.mrf.mxu2 }
 0x4ea   :  { %v10563_v13 = vpack.c.bf16 %v3602_v27, %v3601_v6  ;;  %v3578_v43 = vadd.f32 %v3577_v22, %v3559_v46 }
 0x4eb   :  { %v3579_v0 = vpop.f32.mrf.mxu0 }
 0x4ec   :  { %v3586_v31 = vadd.f32 %v3578_v43, %v3363_v33 }
 0x4ee   :  { %v3598_v50 = vadd.f32 %v3590_v45, %v3586_v31 }
 0x4f0   :  { %v3604_v18 = vmax.f32 %v3598_v50, 0.0 }
 0x4f1   :  { %v3561_v29 = vpop.f32.mrf.mxu2 }
 0x4f2   :  { %v10565_v62 = vpack.c.bf16 %v3604_v18, %v3603_v14 }
 0x4f3   :  { %7720 = dma.done.wait [#allocation3], 20736 }
 0x4f4   :  { %7721 = vsyncadd [#allocation3], 4294946560  ;;  %v3652_v54 = vunpack.c.h.b16 %v10561_v36  ;;  %vm3748_vm7 = vcmask 130048   ;;  %v6664_v49 = vld [vmem:[#allocation2 + $0x100] sm:$0xf]  ;;  %vm5157_vm8 = vcmask 1041408  }
 0x4f5   :  { %v7586_v4 = vld [vmem:[#allocation2 + $0x104] sm:$0xf0]  ;;  %v7585_v17 = vld [vmem:[#allocation2 + $0x104] sm:$0xf]  ;;  %v6666_v42 = vld [vmem:[#allocation2 + $0x108] sm:$0xf0] }
 0x4f6   :  { %v10568_v3 = vpack.c.b16 %v3652_v54, %v3652_v54  ;;  %v6665_v12 = vor.u32 %v7586_v4, %v6664_v49  ;;  %v6738_v38 = vld [vmem:[#allocation2 + $0x70] sm:$0xf]  ;;  %v7568_v59 = vld [vmem:[#allocation2 + $0x74] sm:$0xf0]  ;;  %v6669_v32 = vor.u32 %v7585_v17, %v6666_v42  ;;  %v7583_v44 = vld [vmem:[#allocation2 + $0xf4] sm:$0xf] }
 0x4f7   :  { %v6739_v47 = vor.u32 %v7568_v59, %v6738_v38  ;;  %v6656_v19 = vld [vmem:[#allocation2 + $0xf0] sm:$0xf]  ;;  %v7584_v56 = vld [vmem:[#allocation2 + $0xf4] sm:$0xf0]  ;;  %v6658_v55 = vld [vmem:[#allocation2 + $0xf8] sm:$0xf0] }
 0x4f8   :  { %v3656_v53 = vrot.slane %v10568_v3, 1  ;;  %3752 = vmatpush.bf16.msra.mxu1 %v6665_v12  ;;  %v6657_v34 = vor.u32 %v7584_v56, %v6656_v19  ;;  %v6730_v26 = vld [vmem:[#allocation2 + $0x60] sm:$0xf]  ;;  %v7566_v8 = vld [vmem:[#allocation2 + $0x64] sm:$0xf0]  ;;  %3778 = vmatpush.bf16.msra.mxu2 %v6669_v32  ;;  %v6661_v25 = vor.u32 %v7583_v44, %v6658_v55  ;;  %vm5187_vm12 = vcmask 1024  }
 0x4f9   :  { %3898 = vmatpush.bf16.msra.mxu0 %v6739_v47  ;;  %v6731_v23 = vor.u32 %v7566_v8, %v6730_v26  ;;  %v6672_v7 = vld [vmem:[#allocation2 + $0x110] sm:$0xf]  ;;  %v7588_v52 = vld [vmem:[#allocation2 + $0x114] sm:$0xf0]  ;;  %v6648_v9 = vld [vmem:[#allocation2 + $0xe0] sm:$0xf]  ;;  %v3651_v8 = vunpack.c.l.b16 %v10561_v36 }
 0x4fa   :  { %v6673_v60 = vor.u32 %v7588_v52, %v6672_v7  ;;  %v7582_v57 = vld [vmem:[#allocation2 + $0xe4] sm:$0xf0]  ;;  %v7581_v21 = vld [vmem:[#allocation2 + $0xe4] sm:$0xf]  ;;  %v6650_v28 = vld [vmem:[#allocation2 + $0xe8] sm:$0xf0] }
 0x4fb   :  { %v6722_v1 = vld [vmem:[#allocation2 + $0x50] sm:$0xf]  ;;  %v7564_v24 = vld [vmem:[#allocation2 + $0x54] sm:$0xf0]  ;;  %v6746_v58 = vld [vmem:[#allocation2 + $0x80] sm:$0xf]  ;;  %v6649_v15 = vor.u32 %v7582_v57, %v6648_v9  ;;  %v6653_v61 = vor.u32 %v7581_v21, %v6650_v28 }
 0x4fc   :  { %3753 = vmatpush.bf16.msra.mxu1 %v6657_v34  ;;  %3772 = vmatpush.bf16.msra.mxu3 %v6673_v60  ;;  %v7570_v5 = vld [vmem:[#allocation2 + $0x84] sm:$0xf0]  ;;  %v6812_v45 = vld [vmem:[#allocation2 + $0x190] sm:$0xf]  ;;  %v7604_v2 = vld [vmem:[#allocation2 + $0x194] sm:$0xf0]  ;;  %v6723_v63 = vor.u32 %v7564_v24, %v6722_v1 }
 0x4fd   :  { %3779 = vmatpush.bf16.msra.mxu2 %v6661_v25  ;;  %3899 = vmatpush.bf16.msra.mxu0 %v6731_v23  ;;  %v6747_v16 = vor.u32 %v7570_v5, %v6746_v58  ;;  %v6640_v37 = vld [vmem:[#allocation2 + $0xd0] sm:$0xf]  ;;  %v7580_v11 = vld [vmem:[#allocation2 + $0xd4] sm:$0xf0]  ;;  %v7579_v20 = vld [vmem:[#allocation2 + $0xd4] sm:$0xf]  ;;  %v6813_v35 = vor.u32 %v7604_v2, %v6812_v45  ;;  %v10575_v5 = vpack.c.b16 %v3651_v8, %v3651_v8 }
 0x4fe   :  { %v6642_v10 = vld [vmem:[#allocation2 + $0xd8] sm:$0xf0]  ;;  %v6714_v40 = vld [vmem:[#allocation2 + $0x40] sm:$0xf]  ;;  %v7562_v22 = vld [vmem:[#allocation2 + $0x44] sm:$0xf0]  ;;  %v6641_v41 = vor.u32 %v7580_v11, %v6640_v37 }
 0x4ff   :  { %6678 = vmatmul.msk.bf16.vlgmr.msra.gmra.mxu3 %vm3748_vm7, %v3656_v53  ;;  %v6804_v30 = vld [vmem:[#allocation2 + $0x180] sm:$0xf]  ;;  %v7602_v51 = vld [vmem:[#allocation2 + $0x184] sm:$0xf0]  ;;  %v6645_v48 = vor.u32 %v7579_v20, %v6642_v10  ;;  %v6715_v6 = vor.u32 %v7562_v22, %v6714_v40  ;;  %v7577_v33 = vld [vmem:[#allocation2 + $0xc4] sm:$0xf] }
 0x500   :  { %3754 = vmatpush.bf16.msra.mxu1 %v6649_v15  ;;  %3918 = vmatpush.bf16.msrb.mxu3 %v6747_v16  ;;  %v6632_v27 = vld [vmem:[#allocation2 + $0xc0] sm:$0xf]  ;;  %v7578_v46 = vld [vmem:[#allocation2 + $0xc4] sm:$0xf0]  ;;  %v6805_v43 = vor.u32 %v7602_v51, %v6804_v30  ;;  %v6634_v0 = vld [vmem:[#allocation2 + $0xc8] sm:$0xf0] }
 0x501   :  { %3780 = vmatpush.bf16.msra.mxu2 %v6653_v61  ;;  %3900 = vmatpush.bf16.msra.mxu0 %v6723_v63  ;;  %v6706_v39 = vld [vmem:[#allocation2 + $0x30] sm:$0xf]  ;;  %v7560_v31 = vld [vmem:[#allocation2 + $0x34] sm:$0xf0]  ;;  %v6633_v18 = vor.u32 %v7578_v46, %v6632_v27  ;;  %v6637_v29 = vor.u32 %v7577_v33, %v6634_v0  ;;  %v7575_v17 = vld [vmem:[#allocation2 + $0xb4] sm:$0xf] }
 0x502   :  { %v6796_v50 = vld [vmem:[#allocation2 + $0x170] sm:$0xf]  ;;  %v7600_v14 = vld [vmem:[#allocation2 + $0x174] sm:$0xf0]  ;;  %v6707_v54 = vor.u32 %v7560_v31, %v6706_v39  ;;  %v6626_v42 = vld [vmem:[#allocation2 + $0xb8] sm:$0xf0] }
 0x503   :  { %v6624_v49 = vld [vmem:[#allocation2 + $0xb0] sm:$0xf]  ;;  %v7576_v4 = vld [vmem:[#allocation2 + $0xb4] sm:$0xf0]  ;;  %v6797_v12 = vor.u32 %v7600_v14, %v6796_v50  ;;  %v6698_v38 = vld [vmem:[#allocation2 + $0x20] sm:$0xf]  ;;  %v6629_v56 = vor.u32 %v7575_v17, %v6626_v42 }
 0x504   :  { %4065 = vmatpush.bf16.msra.mxu3 %v6813_v35  ;;  %3755 = vmatpush.bf16.msra.mxu1 %v6641_v41  ;;  %v7558_v59 = vld [vmem:[#allocation2 + $0x24] sm:$0xf0]  ;;  %v6788_v32 = vld [vmem:[#allocation2 + $0x160] sm:$0xf]  ;;  %v6625_v19 = vor.u32 %v7576_v4, %v6624_v49  ;;  %v7573_v26 = vld [vmem:[#allocation2 + $0xa4] sm:$0xf] }
 0x505   :  { %3781 = vmatpush.bf16.msra.mxu2 %v6645_v48  ;;  %3901 = vmatpush.bf16.msra.mxu0 %v6715_v6  ;;  %v7598_v47 = vld [vmem:[#allocation2 + $0x164] sm:$0xf0]  ;;  %v6699_v44 = vor.u32 %v7558_v59, %v6698_v38  ;;  %v6616_v34 = vld [vmem:[#allocation2 + $0xa0] sm:$0xf]  ;;  %v6618_v23 = vld [vmem:[#allocation2 + $0xa8] sm:$0xf0] }
 0x506   :  { %v7574_v55 = vld [vmem:[#allocation2 + $0xa4] sm:$0xf0]  ;;  %v6789_v25 = vor.u32 %v7598_v47, %v6788_v32  ;;  %v6690_v7 = vld [vmem:[#allocation2 + $0x10] sm:$0xf]  ;;  %v7556_v52 = vld [vmem:[#allocation2 + $0x14] sm:$0xf0]  ;;  %v6621_v28 = vor.u32 %v7573_v26, %v6618_v23 }
 0x507   :  { %v6780_v9 = vld [vmem:[#allocation2 + $0x150] sm:$0xf]  ;;  %v7596_v60 = vld [vmem:[#allocation2 + $0x154] sm:$0xf0]  ;;  %v6617_v57 = vor.u32 %v7574_v55, %v6616_v34  ;;  %v6691_v1 = vor.u32 %v7556_v52, %v6690_v7  ;;  %v7571_v58 = vld [vmem:[#allocation2 + $0x94] sm:$0xf] }
 0x508   :  { %4066 = vmatpush.bf16.msra.mxu3 %v6805_v43  ;;  %3756 = vmatpush.bf16.msra.mxu1 %v6633_v18  ;;  %v6608_v21 = vld [vmem:[#allocation2 + $0x90] sm:$0xf]  ;;  %v7572_v24 = vld [vmem:[#allocation2 + $0x94] sm:$0xf0]  ;;  %v6610_v15 = vld [vmem:[#allocation2 + $0x98] sm:$0xf0]  ;;  %v6781_v36 = vor.u32 %v7596_v60, %v6780_v9 }
 0x509   :  { %3782 = vmatpush.bf16.msra.mxu2 %v6637_v29  ;;  %3902 = vmatpush.bf16.msra.mxu0 %v6707_v54  ;;  %v6682_v45 = vld [vmem:[#allocation2] sm:$0xf]  ;;  %v7554_v2 = vld [vmem:[#allocation2 + $0x4] sm:$0xf0]  ;;  %v7587_v16 = vld [vmem:[#allocation2 + $0x114] sm:$0xf]  ;;  %v6609_v11 = vor.u32 %v7572_v24, %v6608_v21  ;;  %v6613_v10 = vor.u32 %v7571_v58, %v6610_v15 }
 0x50a   :  { %v6772_v61 = vld [vmem:[#allocation2 + $0x140] sm:$0xf]  ;;  %v7594_v63 = vld [vmem:[#allocation2 + $0x144] sm:$0xf0]  ;;  %v6674_v37 = vld [vmem:[#allocation2 + $0x118] sm:$0xf0]  ;;  %v6683_v40 = vor.u32 %v7554_v2, %v6682_v45 }
 0x50b   :  { %v7569_v20 = vld [vmem:[#allocation2 + $0x84] sm:$0xf]  ;;  %v6748_v35 = vld [vmem:[#allocation2 + $0x88] sm:$0xf0]  ;;  %v3655_v22 = vrot.slane %v10575_v5, 1  ;;  %v6773_v41 = vor.u32 %v7594_v63, %v6772_v61  ;;  %v6677_v48 = vor.u32 %v7587_v16, %v6674_v37  ;;  %v3969_v26 = vrot.slane %v10575_v5, 2 }
 0x50c   :  { %4067 = vmatpush.bf16.msra.mxu3 %v6797_v12  ;;  %3757 = vmatpush.bf16.msra.mxu1 %v6625_v19  ;;  %v7567_v30 = vld [vmem:[#allocation2 + $0x74] sm:$0xf]  ;;  %v6740_v51 = vld [vmem:[#allocation2 + $0x78] sm:$0xf0]  ;;  %v6764_v46 = vld [vmem:[#allocation2 + $0x130] sm:$0xf]  ;;  %v6751_v33 = vor.u32 %v7569_v20, %v6748_v35 }
 0x50d   :  { %3783 = vmatpush.bf16.msra.mxu2 %v6629_v56  ;;  %3903 = vmatpush.bf16.msra.mxu0 %v6699_v44  ;;  %v7603_v6 = vld [vmem:[#allocation2 + $0x194] sm:$0xf]  ;;  %v6814_v27 = vld [vmem:[#allocation2 + $0x198] sm:$0xf0]  ;;  %v7592_v43 = vld [vmem:[#allocation2 + $0x134] sm:$0xf0]  ;;  %v6743_v31 = vor.u32 %v7567_v30, %v6740_v51 }
 0x50e   :  { %v6820_v0 = vld [vmem:[#allocation2 + $0x1a0] sm:$0xf]  ;;  %v7606_v39 = vld [vmem:[#allocation2 + $0x1a4] sm:$0xf0]  ;;  %v6817_v50 = vor.u32 %v7603_v6, %v6814_v27  ;;  %v7565_v14 = vld [vmem:[#allocation2 + $0x64] sm:$0xf]  ;;  %v6765_v54 = vor.u32 %v7592_v43, %v6764_v46 }
 0x50f   :  { %6752 = vmatmul.msk.bf16.vlgmr.msrb.gmra.mxu3 %vm3748_vm7, %v10568_v3  ;;  %v6732_v18 = vld [vmem:[#allocation2 + $0x68] sm:$0xf0]  ;;  %v7601_v29 = vld [vmem:[#allocation2 + $0x184] sm:$0xf]  ;;  %v6821_v4 = vor.u32 %v7606_v39, %v6820_v0  ;;  %v6756_v42 = vld [vmem:[#allocation2 + $0x120] sm:$0xf] }
 0x510   :  { %4068 = vmatpush.bf16.msra.mxu3 %v6789_v25  ;;  %3758 = vmatpush.bf16.msra.mxu1 %v6617_v57  ;;  %v6806_v49 = vld [vmem:[#allocation2 + $0x188] sm:$0xf0]  ;;  %v7605_v17 = vld [vmem:[#allocation2 + $0x1a4] sm:$0xf]  ;;  %v7590_v38 = vld [vmem:[#allocation2 + $0x124] sm:$0xf0]  ;;  %v6735_v32 = vor.u32 %v7565_v14, %v6732_v18 }
 0x511   :  { %3784 = vmatpush.bf16.msra.mxu2 %v6621_v28  ;;  %3904 = vmatpush.bf16.msra.mxu0 %v6691_v1  ;;  %v6822_v12 = vld [vmem:[#allocation2 + $0x1a8] sm:$0xf0]  ;;  %v6809_v47 = vor.u32 %v7601_v29, %v6806_v49  ;;  %v7563_v19 = vld [vmem:[#allocation2 + $0x54] sm:$0xf]  ;;  %v6757_v56 = vor.u32 %v7590_v38, %v6756_v42  ;;  %v6724_v44 = vld [vmem:[#allocation2 + $0x58] sm:$0xf0] }
 0x512   :  { %v6825_v59 = vor.u32 %v7605_v17, %v6822_v12  ;;  %v7599_v34 = vld [vmem:[#allocation2 + $0x174] sm:$0xf]  ;;  %v6798_v55 = vld [vmem:[#allocation2 + $0x178] sm:$0xf0]  ;;  %v6894_v8 = vld [vmem:[#allocation2 + $0x230] sm:$0xf]  ;;  %v6727_v23 = vor.u32 %v7563_v19, %v6724_v44 }
 0x513   :  { %v7624_v25 = vld [vmem:[#allocation2 + $0x234] sm:$0xf0]  ;;  %v6801_v7 = vor.u32 %v7599_v34, %v6798_v55  ;;  %v7561_v52 = vld [vmem:[#allocation2 + $0x44] sm:$0xf]  ;;  %v6716_v9 = vld [vmem:[#allocation2 + $0x48] sm:$0xf0] }
 0x514   :  { %4069 = vmatpush.bf16.msra.mxu3 %v6781_v36  ;;  %3759 = vmatpush.bf16.msra.mxu1 %v6609_v11  ;;  %v6895_v60 = vor.u32 %v7624_v25, %v6894_v8  ;;  %v6960_v57 = vld [vmem:[#allocation2 + $0x2b0] sm:$0xf]  ;;  %v7597_v21 = vld [vmem:[#allocation2 + $0x164] sm:$0xf]  ;;  %v6790_v28 = vld [vmem:[#allocation2 + $0x168] sm:$0xf0]  ;;  %v6719_v36 = vor.u32 %v7561_v52, %v6716_v9 }
 0x515   :  { %3785 = vmatpush.bf16.msra.mxu2 %v6613_v10  ;;  %3905 = vmatpush.bf16.msra.mxu0 %v6683_v40  ;;  %v7640_v1 = vld [vmem:[#allocation2 + $0x2b4] sm:$0xf0]  ;;  %v6952_v58 = vld [vmem:[#allocation2 + $0x2a0] sm:$0xf]  ;;  %v7638_v15 = vld [vmem:[#allocation2 + $0x2a4] sm:$0xf0]  ;;  %v6793_v45 = vor.u32 %v7597_v21, %v6790_v28 }
 0x516   :  { %v6961_v24 = vor.u32 %v7640_v1, %v6960_v57  ;;  %v7559_v2 = vld [vmem:[#allocation2 + $0x34] sm:$0xf]  ;;  %v6708_v61 = vld [vmem:[#allocation2 + $0x38] sm:$0xf0]  ;;  %v7621_v37 = vld [vmem:[#allocation2 + $0x224] sm:$0xf]  ;;  %v6953_v20 = vor.u32 %v7638_v15, %v6952_v58 }
 0x517   :  { %3760 = vmatmul.bf16.vlgmr.msra.gmra.mxu1 %v3655_v22  ;;  %v7595_v63 = vld [vmem:[#allocation2 + $0x154] sm:$0xf]  ;;  %v6782_v16 = vld [vmem:[#allocation2 + $0x158] sm:$0xf0]  ;;  %v6888_v11 = vld [vmem:[#allocation2 + $0x228] sm:$0xf0] }
 0x518   :  { %4070 = vmatpush.bf16.msra.mxu3 %v6773_v41  ;;  %3798 = vmatpush.bf16.msrb.mxu1 %v6677_v48  ;;  %v3970_v35 = vrot.slane %v10568_v3, 2  ;;  %v6944_v10 = vld [vmem:[#allocation2 + $0x290] sm:$0xf]  ;;  %v7636_v40 = vld [vmem:[#allocation2 + $0x294] sm:$0xf0]  ;;  %v6785_v30 = vor.u32 %v7595_v63, %v6782_v16  ;;  %v6891_v27 = vor.u32 %v7621_v37, %v6888_v11  ;;  %v4139_v8 = vrot.slane %v10568_v3, 3 }
 0x519   :  { %3944 = vmatpush.bf16.msrb.mxu2 %v6751_v33  ;;  %3906 = vmatmul.bf16.vlgmr.msra.gmra.mxu0 %v10575_v5  ;;  %v7557_v51 = vld [vmem:[#allocation2 + $0x24] sm:$0xf]  ;;  %v6700_v41 = vld [vmem:[#allocation2 + $0x28] sm:$0xf0]  ;;  %v7619_v46 = vld [vmem:[#allocation2 + $0x214] sm:$0xf]  ;;  %v6945_v43 = vor.u32 %v7636_v40, %v6944_v10 }
 0x51a   :  { %3786 = vmatmul.bf16.vlgmr.msra.gmra.mxu2 %v3655_v22  ;;  %4085 = vmatpush.bf16.msrb.mxu0 %v6821_v4  ;;  %v6711_v22 = vor.u32 %v7559_v2, %v6708_v61  ;;  %v7593_v48 = vld [vmem:[#allocation2 + $0x144] sm:$0xf]  ;;  %v6774_v6 = vld [vmem:[#allocation2 + $0x148] sm:$0xf0]  ;;  %v6880_v33 = vld [vmem:[#allocation2 + $0x218] sm:$0xf0] }
 0x51b   :  { %v6936_v0 = vld [vmem:[#allocation2 + $0x280] sm:$0xf]  ;;  %v7634_v39 = vld [vmem:[#allocation2 + $0x284] sm:$0xf0]  ;;  %v7555_v14 = vld [vmem:[#allocation2 + $0x14] sm:$0xf] }
 0x51c   :  { %3924 = vmatpush.bf16.msra.mxu1 %v6743_v31  ;;  %4071 = vmatpush.bf16.msra.mxu3 %v6765_v54  ;;  %v6703_v31 = vor.u32 %v7557_v51, %v6700_v41  ;;  %v7591_v18 = vld [vmem:[#allocation2 + $0x134] sm:$0xf]  ;;  %v6766_v29 = vld [vmem:[#allocation2 + $0x138] sm:$0xf0]  ;;  %v6883_v54 = vor.u32 %v7619_v46, %v6880_v33  ;;  %v7617_v49 = vld [vmem:[#allocation2 + $0x204] sm:$0xf]  ;;  %v6937_v17 = vor.u32 %v7634_v39, %v6936_v0 }
 0x51d   :  { %4091 = vmatpush.bf16.msra.mxu2 %v6817_v50  ;;  %v6777_v50 = vor.u32 %v7593_v48, %v6774_v6  ;;  %v6872_v4 = vld [vmem:[#allocation2 + $0x208] sm:$0xf0]  ;;  %v7553_v12 = vld [vmem:[#allocation2 + $0x4] sm:$0xf]  ;;  %v6928_v42 = vld [vmem:[#allocation2 + $0x270] sm:$0xf] }
 0x51e   :  { %4111 = vmatpush.bf16.msra.mxu0 %v6825_v59  ;;  %v7632_v38 = vld [vmem:[#allocation2 + $0x274] sm:$0xf0]  ;;  %v7589_v19 = vld [vmem:[#allocation2 + $0x124] sm:$0xf]  ;;  %v6886_v44 = vld [vmem:[#allocation2 + $0x220] sm:$0xf]  ;;  %v6875_v55 = vor.u32 %v7617_v49, %v6872_v4 }
 0x51f   :  { %v7622_v34 = vld [vmem:[#allocation2 + $0x224] sm:$0xf0]  ;;  %v7623_v25 = vld [vmem:[#allocation2 + $0x234] sm:$0xf]  ;;  %v6929_v52 = vor.u32 %v7632_v38, %v6928_v42  ;;  %v6864_v9 = vld [vmem:[#allocation2 + $0x1f8] sm:$0xf0] }
 0x520   :  { %3925 = vmatpush.bf16.msra.mxu1 %v6735_v32  ;;  %4072 = vmatpush.bf16.msra.mxu3 %v6757_v56  ;;  %v6769_v32 = vor.u32 %v7591_v18, %v6766_v29  ;;  %v6758_v56 = vld [vmem:[#allocation2 + $0x128] sm:$0xf0]  ;;  %v7630_v57 = vld [vmem:[#allocation2 + $0x264] sm:$0xf0]  ;;  %v6887_v1 = vor.u32 %v7622_v34, %v6886_v44  ;;  %v7639_v58 = vld [vmem:[#allocation2 + $0x2b4] sm:$0xf] }
 0x521   :  { %4092 = vmatpush.bf16.msra.mxu2 %v6809_v47  ;;  %v6684_v47 = vld [vmem:[#allocation2 + $0x8] sm:$0xf0]  ;;  %v6761_v28 = vor.u32 %v7589_v19, %v6758_v56  ;;  %v6962_v15 = vld [vmem:[#allocation2 + $0x2b8] sm:$0xf0]  ;;  %v7613_v61 = vld [vmem:[#allocation2 + $0x1e4] sm:$0xf] }
 0x522   :  { %v6687_v21 = vor.u32 %v7553_v12, %v6684_v47  ;;  %v6856_v16 = vld [vmem:[#allocation2 + $0x1e8] sm:$0xf0]  ;;  %v6912_v37 = vld [vmem:[#allocation2 + $0x250] sm:$0xf]  ;;  %v7628_v11 = vld [vmem:[#allocation2 + $0x254] sm:$0xf0] }
 0x523   :  { %4073 = vmatmul.bf16.vlgmr.msra.gmra.mxu3 %v3969_v26  ;;  %v7637_v40 = vld [vmem:[#allocation2 + $0x2a4] sm:$0xf]  ;;  %v7618_v51 = vld [vmem:[#allocation2 + $0x204] sm:$0xf0]  ;;  %v6859_v41 = vor.u32 %v7613_v61, %v6856_v16  ;;  %v7611_v48 = vld [vmem:[#allocation2 + $0x1d4] sm:$0xf]  ;;  %v6913_v6 = vor.u32 %v7628_v11, %v6912_v37 }
 0x524   :  { %4254 = vmatpush.bf16.msrb.mxu3 %v6895_v60  ;;  %3926 = vmatpush.bf16.msra.mxu1 %v6727_v23  ;;  %v6896_v23 = vld [vmem:[#allocation2 + $0x238] sm:$0xf0]  ;;  %v6920_v60 = vld [vmem:[#allocation2 + $0x260] sm:$0xf]  ;;  %v7626_v33 = vld [vmem:[#allocation2 + $0x244] sm:$0xf0] }
 0x525   :  { %4093 = vmatpush.bf16.msra.mxu2 %v6801_v7  ;;  %v7615_v7 = vld [vmem:[#allocation2 + $0x1f4] sm:$0xf]  ;;  %v6921_v63 = vor.u32 %v7630_v57, %v6920_v60  ;;  %v6904_v46 = vld [vmem:[#allocation2 + $0x240] sm:$0xf]  ;;  %v7042_v0 = vld [vmem:[#allocation2 + $0x350] sm:$0xf] }
 0x526   :  { %v6867_v2 = vor.u32 %v7615_v7, %v6864_v9  ;;  %v7660_v39 = vld [vmem:[#allocation2 + $0x354] sm:$0xf0]  ;;  %v6862_v18 = vld [vmem:[#allocation2 + $0x1f0] sm:$0xf]  ;;  %v6905_v49 = vor.u32 %v7626_v33, %v6904_v46  ;;  %v6840_v4 = vld [vmem:[#allocation2 + $0x1c8] sm:$0xf0] }
 0x527   :  { %6679 = vmatmul.msk.bf16.vlgmr.msrb.gmra.mxu1 %vm3748_vm7, %v3656_v53  ;;  %v6692_v53 = vld [vmem:[#allocation2 + $0x18] sm:$0xf0]  ;;  %v7108_v12 = vld [vmem:[#allocation2 + $0x3d0] sm:$0xf]  ;;  %v6854_v19 = vld [vmem:[#allocation2 + $0x1e0] sm:$0xf] }
 0x528   :  { %4406 = vmatpush.bf16.msra.mxu3 %v6961_v24  ;;  %3927 = vmatpush.bf16.msra.mxu1 %v6719_v36  ;;  %v6695_v59 = vor.u32 %v7555_v14, %v6692_v53  ;;  %v6899_v24 = vor.u32 %v7623_v25, %v6896_v23  ;;  %v6878_v36 = vld [vmem:[#allocation2 + $0x210] sm:$0xf]  ;;  %v6946_v14 = vld [vmem:[#allocation2 + $0x298] sm:$0xf0]  ;;  %v4308_v53 = vunpack.c.l.b16 %v10563_v13  ;;  %v7614_v56 = vld [vmem:[#allocation2 + $0x1e4] sm:$0xf0] }
 0x529   :  { %4094 = vmatpush.bf16.msra.mxu2 %v6793_v45  ;;  %6826 = vmatmul.msk.bf16.vlgmr.msrb.gmra.mxu0 %vm3748_vm7, %v3970_v35  ;;  %v7620_v45 = vld [vmem:[#allocation2 + $0x214] sm:$0xf0]  ;;  %v7607_v34 = vld [vmem:[#allocation2 + $0x1b4] sm:$0xf]  ;;  %v6832_v25 = vld [vmem:[#allocation2 + $0x1b8] sm:$0xf0]  ;;  %v6855_v57 = vor.u32 %v7614_v56, %v6854_v19 }
 0x52a   :  { %6753 = vmatmul.msk.bf16.vlgmr.msrb.gmra.mxu2 %vm3748_vm7, %v10568_v3  ;;  %4260 = vmatpush.bf16.msrb.mxu0 %v6891_v27  ;;  %v6879_v10 = vor.u32 %v7620_v45, %v6878_v36  ;;  %v6848_v27 = vld [vmem:[#allocation2 + $0x1d8] sm:$0xf0]  ;;  %v10604_v47 = vpack.c.b16 %v4308_v53, %v4308_v53  ;;  %v7100_v23 = vld [vmem:[#allocation2 + $0x3c0] sm:$0xf]  ;;  %v7674_v7 = vld [vmem:[#allocation2 + $0x3c4] sm:$0xf0] }
 0x52b   :  { %v6851_v29 = vor.u32 %v7611_v48, %v6848_v27  ;;  %v7641_v9 = vld [vmem:[#allocation2 + $0x2c4] sm:$0xf]  ;;  %v6970_v60 = vld [vmem:[#allocation2 + $0x2c8] sm:$0xf0]  ;;  %v7101_v36 = vor.u32 %v7674_v7, %v7100_v23  ;;  %v7092_v61 = vld [vmem:[#allocation2 + $0x3b0] sm:$0xf] }
 0x52c   :  { %4407 = vmatpush.bf16.msra.mxu3 %v6953_v20  ;;  %3928 = vmatpush.bf16.msra.mxu1 %v6711_v22  ;;  %v6965_v20 = vor.u32 %v7639_v58, %v6962_v15  ;;  %v6954_v22 = vld [vmem:[#allocation2 + $0x2a8] sm:$0xf0]  ;;  %v6835_v58 = vor.u32 %v7607_v34, %v6832_v25  ;;  %v7657_v15 = vld [vmem:[#allocation2 + $0x344] sm:$0xf]  ;;  %v6973_v45 = vor.u32 %v7641_v9, %v6970_v60  ;;  %v4138_v11 = vrot.slane %v10575_v5, 3 }
 0x52d   :  { %4095 = vmatpush.bf16.msra.mxu2 %v6785_v30  ;;  %v6870_v30 = vld [vmem:[#allocation2 + $0x200] sm:$0xf]  ;;  %v7028_v48 = vld [vmem:[#allocation2 + $0x338] sm:$0xf0]  ;;  %v7670_v46 = vld [vmem:[#allocation2 + $0x3a4] sm:$0xf0] }
 0x52e   :  { %4261 = vmatpush.bf16.msrb.mxu0 %v6883_v54  ;;  %v7609_v54 = vld [vmem:[#allocation2 + $0x1c4] sm:$0xf]  ;;  %v7084_v27 = vld [vmem:[#allocation2 + $0x3a0] sm:$0xf]  ;;  %v7608_v3 = vld [vmem:[#allocation2 + $0x1b4] sm:$0xf0] }
 0x52f   :  { %v6843_v44 = vor.u32 %v7609_v54, %v6840_v4  ;;  %v7642_v53 = vld [vmem:[#allocation2 + $0x2c4] sm:$0xf0]  ;;  %v7625_v54 = vld [vmem:[#allocation2 + $0x244] sm:$0xf]  ;;  %v7668_v4 = vld [vmem:[#allocation2 + $0x394] sm:$0xf0] }
 0x530   :  { %4408 = vmatpush.bf16.msra.mxu3 %v6945_v43  ;;  %3929 = vmatpush.bf16.msra.mxu1 %v6703_v31  ;;  %v6957_v43 = vor.u32 %v7637_v40, %v6954_v22  ;;  %v6871_v31 = vor.u32 %v7618_v51, %v6870_v30  ;;  %v6838_v40 = vld [vmem:[#allocation2 + $0x1c0] sm:$0xf]  ;;  %v7610_v22 = vld [vmem:[#allocation2 + $0x1c4] sm:$0xf0]  ;;  %v7655_v51 = vld [vmem:[#allocation2 + $0x334] sm:$0xf] }
 0x531   :  { %4096 = vmatpush.bf16.msra.mxu2 %v6777_v50  ;;  %v7635_v50 = vld [vmem:[#allocation2 + $0x294] sm:$0xf]  ;;  %v7044_v56 = vld [vmem:[#allocation2 + $0x358] sm:$0xf0]  ;;  %v7068_v23 = vld [vmem:[#allocation2 + $0x380] sm:$0xf] }
 0x532   :  { %4262 = vmatpush.bf16.msrb.mxu0 %v6875_v55  ;;  %v6949_v42 = vor.u32 %v7635_v50, %v6946_v14  ;;  %v7031_v50 = vor.u32 %v7655_v51, %v7028_v48  ;;  %v7085_v14 = vor.u32 %v7670_v46, %v7084_v27  ;;  %v7659_v19 = vld [vmem:[#allocation2 + $0x354] sm:$0xf]  ;;  %v7012_v34 = vld [vmem:[#allocation2 + $0x318] sm:$0xf0]  ;;  %v7666_v7 = vld [vmem:[#allocation2 + $0x384] sm:$0xf0] }
 0x533   :  { %6900 = vmatmul.msk.bf16.vlgmr.msrb.gmra.mxu3 %vm3748_vm7, %v4139_v8  ;;  %v7047_v9 = vor.u32 %v7659_v19, %v7044_v56  ;;  %v7675_v60 = vld [vmem:[#allocation2 + $0x3d4] sm:$0xf]  ;;  %v7052_v51 = vld [vmem:[#allocation2 + $0x360] sm:$0xf]  ;;  %v7190_v27 = vld [vmem:[#allocation2 + $0x470] sm:$0xf] }
 0x534   :  { %4409 = vmatpush.bf16.msra.mxu3 %v6937_v17  ;;  %3930 = vmatpush.bf16.msra.mxu1 %v6695_v59  ;;  %v7043_v17 = vor.u32 %v7660_v39, %v7042_v0  ;;  %v7633_v59 = vld [vmem:[#allocation2 + $0x284] sm:$0xf]  ;;  %v7627_v0 = vld [vmem:[#allocation2 + $0x254] sm:$0xf]  ;;  %v6914_v39 = vld [vmem:[#allocation2 + $0x258] sm:$0xf0] }
 0x535   :  { %4097 = vmatpush.bf16.msra.mxu2 %v6769_v32  ;;  %v6938_v32 = vld [vmem:[#allocation2 + $0x288] sm:$0xf0]  ;;  %v7696_v46 = vld [vmem:[#allocation2 + $0x474] sm:$0xf0]  ;;  %v7677_v19 = vld [vmem:[#allocation2 + $0x3e4] sm:$0xf] }
 0x536   :  { %4263 = vmatpush.bf16.msrb.mxu0 %v6867_v2  ;;  %v7036_v2 = vld [vmem:[#allocation2 + $0x348] sm:$0xf0] }
 0x537   :  { %v7039_v30 = vor.u32 %v7657_v15, %v7036_v2  ;;  %v7069_v15 = vor.u32 %v7666_v7, %v7068_v23  ;;  %v7664_v2 = vld [vmem:[#allocation2 + $0x374] sm:$0xf0]  ;;  %v7118_v56 = vld [vmem:[#allocation2 + $0x3e8] sm:$0xf0]  ;;  %v6994_v23 = vld [vmem:[#allocation2 + $0x2f0] sm:$0xf] }
 0x538   :  { %4410 = vmatpush.bf16.msra.mxu3 %v6929_v52  ;;  %3931 = vmatpush.bf16.msra.mxu1 %v6687_v21  ;;  %v6941_v52 = vor.u32 %v7633_v59, %v6938_v32  ;;  %v7631_v21 = vld [vmem:[#allocation2 + $0x274] sm:$0xf]  ;;  %v7658_v59 = vld [vmem:[#allocation2 + $0x344] sm:$0xf0]  ;;  %v7648_v7 = vld [vmem:[#allocation2 + $0x2f4] sm:$0xf0] }
 0x539   :  { %4098 = vmatpush.bf16.msra.mxu2 %v6761_v28  ;;  %6827 = vmatmul.msk.bf16.vlgmr.msra.gmra.mxu0 %vm3748_vm7, %v3970_v35  ;;  %v7676_v35 = vld [vmem:[#allocation2 + $0x3d4] sm:$0xf0]  ;;  %v6930_v28 = vld [vmem:[#allocation2 + $0x278] sm:$0xf0] }
 0x53a   :  { %4264 = vmatpush.bf16.msrb.mxu0 %v6859_v41  ;;  %v7109_v55 = vor.u32 %v7676_v35, %v7108_v12  ;;  %v6933_v16 = vor.u32 %v7631_v21, %v6930_v28  ;;  %v6906_v12 = vld [vmem:[#allocation2 + $0x248] sm:$0xf0]  ;;  %v7034_v35 = vld [vmem:[#allocation2 + $0x340] sm:$0xf]  ;;  %v7026_v21 = vld [vmem:[#allocation2 + $0x330] sm:$0xf] }
 0x53b   :  { %3932 = vmatmul.bf16.vlgmr.msra.gmra.mxu1 %v10575_v5  ;;  %v6909_v25 = vor.u32 %v7625_v54, %v6906_v12  ;;  %v7656_v28 = vld [vmem:[#allocation2 + $0x334] sm:$0xf0]  ;;  %v7002_v54 = vld [vmem:[#allocation2 + $0x300] sm:$0xf]  ;;  %v7643_v12 = vld [vmem:[#allocation2 + $0x2d4] sm:$0xf] }
 0x53c   :  { %4234 = vmatpush.bf16.msrb.mxu1 %v6887_v1  ;;  %4411 = vmatpush.bf16.msra.mxu3 %v6921_v63  ;;  %v6846_v1 = vld [vmem:[#allocation2 + $0x1d0] sm:$0xf]  ;;  %v7672_v63 = vld [vmem:[#allocation2 + $0x3b4] sm:$0xf0] }
 0x53d   :  { %4280 = vmatpush.bf16.msrb.mxu2 %v6899_v24  ;;  %v7612_v24 = vld [vmem:[#allocation2 + $0x1d4] sm:$0xf0]  ;;  %v7093_v41 = vor.u32 %v7672_v63, %v7092_v61  ;;  %v7027_v61 = vor.u32 %v7656_v28, %v7026_v21  ;;  %v7673_v63 = vld [vmem:[#allocation2 + $0x3c4] sm:$0xf]  ;;  %v4479_v28 = vrot.slane %v10604_v47, 1 }
 0x53e   :  { %4099 = vmatmul.bf16.vlgmr.msra.gmra.mxu2 %v3969_v26  ;;  %v7616_v26 = vld [vmem:[#allocation2 + $0x1f4] sm:$0xf0]  ;;  %4265 = vmatpush.bf16.msrb.mxu0 %v6851_v29  ;;  %v6847_v37 = vor.u32 %v7612_v24, %v6846_v1  ;;  %v6917_v29 = vor.u32 %v7627_v0, %v6914_v39  ;;  %v7649_v24 = vld [vmem:[#allocation2 + $0x304] sm:$0xf] }
 0x53f   :  { %v6863_v38 = vor.u32 %v7616_v26, %v6862_v18  ;;  %v7020_v18 = vld [vmem:[#allocation2 + $0x328] sm:$0xf0]  ;;  %v7645_v39 = vld [vmem:[#allocation2 + $0x2e4] sm:$0xf] }
 0x540   :  { %4235 = vmatpush.bf16.msrb.mxu1 %v6879_v10  ;;  %4412 = vmatpush.bf16.msra.mxu3 %v6913_v6  ;;  %v6922_v10 = vld [vmem:[#allocation2 + $0x268] sm:$0xf0]  ;;  %v4309_v6 = vunpack.c.h.b16 %v10563_v13  ;;  %v7653_v13 = vld [vmem:[#allocation2 + $0x324] sm:$0xf] }
 0x541   :  { %4432 = vmatpush.bf16.msra.mxu2 %v6965_v20  ;;  %v7629_v20 = vld [vmem:[#allocation2 + $0x264] sm:$0xf]  ;;  %v7023_v32 = vor.u32 %v7653_v13, %v7020_v18 }
 0x542   :  { %4266 = vmatpush.bf16.msrb.mxu0 %v6843_v44  ;;  %v6925_v33 = vor.u32 %v7629_v20, %v6922_v10  ;;  %v10614_v26 = vpack.c.b16 %v4309_v6, %v4309_v6  ;;  %v7651_v44 = vld [vmem:[#allocation2 + $0x314] sm:$0xf]  ;;  %v7654_v20 = vld [vmem:[#allocation2 + $0x324] sm:$0xf0]  ;;  %v7094_v6 = vld [vmem:[#allocation2 + $0x3b8] sm:$0xf0] }
 0x543   :  { %v7015_v1 = vor.u32 %v7651_v44, %v7012_v34  ;;  %v7669_v18 = vld [vmem:[#allocation2 + $0x3a4] sm:$0xf]  ;;  %v7078_v34 = vld [vmem:[#allocation2 + $0x398] sm:$0xf0] }
 0x544   :  { %4236 = vmatpush.bf16.msrb.mxu1 %v6871_v31  ;;  %4413 = vmatpush.bf16.msra.mxu3 %v6905_v49  ;;  %v6830_v31 = vld [vmem:[#allocation2 + $0x1b0] sm:$0xf] }
 0x545   :  { %4433 = vmatpush.bf16.msra.mxu2 %v6957_v43  ;;  %v6839_v43 = vor.u32 %v7610_v22, %v6838_v40  ;;  %v7076_v49 = vld [vmem:[#allocation2 + $0x390] sm:$0xf]  ;;  %v7647_v40 = vld [vmem:[#allocation2 + $0x2f4] sm:$0xf]  ;;  %v6996_v22 = vld [vmem:[#allocation2 + $0x2f8] sm:$0xf0] }
 0x546   :  { %4267 = vmatpush.bf16.msrb.mxu0 %v6835_v58  ;;  %v7004_v58 = vld [vmem:[#allocation2 + $0x308] sm:$0xf0]  ;;  %v6999_v0 = vor.u32 %v7647_v40, %v6996_v22 }
 0x547   :  { %4414 = vmatmul.bf16.vlgmr.msra.gmra.mxu3 %v10604_v47  ;;  %v7007_v10 = vor.u32 %v7649_v24, %v7004_v58  ;;  %v6995_v58 = vor.u32 %v7648_v7, %v6994_v23  ;;  %v7216_v23 = vld [vmem:[#allocation2 + $0x4a0] sm:$0xf]  ;;  %v7702_v7 = vld [vmem:[#allocation2 + $0x4a4] sm:$0xf0] }
 0x548   :  { %4595 = vmatpush.bf16.msrb.mxu3 %v7043_v17  ;;  %4237 = vmatpush.bf16.msrb.mxu1 %v6863_v38  ;;  %v6831_v17 = vor.u32 %v7608_v3, %v6830_v31  ;;  %v6988_v31 = vld [vmem:[#allocation2 + $0x2e8] sm:$0xf0] }
 0x549   :  { %4434 = vmatpush.bf16.msra.mxu2 %v6949_v42  ;;  %4268 = vmatmul.bf16.vlgmr.msrb.gmra.mxu0 %v4138_v11  ;;  %v4480_v42 = vrot.slane %v10614_v26, 1 }
 0x54a   :  { %4452 = vmatpush.bf16.msra.mxu0 %v6973_v45  ;;  %v7060_v45 = vld [vmem:[#allocation2 + $0x370] sm:$0xf] }
 0x54b   :  { %v7061_v5 = vor.u32 %v7664_v2, %v7060_v45  ;;  %v7708_v45 = vld [vmem:[#allocation2 + $0x4d4] sm:$0xf0]  ;;  %v6986_v2 = vld [vmem:[#allocation2 + $0x2e0] sm:$0xf] }
 0x54c   :  { %4744 = vmatpush.bf16.msra.mxu3 %v7109_v55  ;;  %4238 = vmatpush.bf16.msrb.mxu1 %v6855_v57  ;;  %v7077_v55 = vor.u32 %v7668_v4, %v7076_v49  ;;  %v7110_v57 = vld [vmem:[#allocation2 + $0x3d8] sm:$0xf0]  ;;  %v7650_v49 = vld [vmem:[#allocation2 + $0x304] sm:$0xf0]  ;;  %v6991_v4 = vor.u32 %v7645_v39, %v6988_v31 }
 0x54d   :  { %4435 = vmatpush.bf16.msra.mxu2 %v6941_v52  ;;  %v7035_v52 = vor.u32 %v7658_v59, %v7034_v35  ;;  %v6980_v35 = vld [vmem:[#allocation2 + $0x2d8] sm:$0xf0]  ;;  %v7003_v44 = vor.u32 %v7650_v49, %v7002_v54  ;;  %v4818_v54 = vrot.slane %v10614_v26, 3  ;;  %v7224_v49 = vld [vmem:[#allocation2 + $0x4b0] sm:$0xf] }
 0x54e   :  { %6901 = vmatmul.msk.bf16.vlgmr.msrb.gmra.mxu2 %vm3748_vm7, %v4139_v8  ;;  %4601 = vmatpush.bf16.msrb.mxu0 %v7039_v30  ;;  %v6968_v8 = vld [vmem:[#allocation2 + $0x2c0] sm:$0xf]  ;;  %v7671_v30 = vld [vmem:[#allocation2 + $0x3b4] sm:$0xf] }
 0x54f   :  { %v6969_v38 = vor.u32 %v7642_v53, %v6968_v8  ;;  %v7191_v8 = vor.u32 %v7696_v46, %v7190_v27  ;;  %v7712_v53 = vld [vmem:[#allocation2 + $0x4f4] sm:$0xf0]  ;;  %v7689_v27 = vld [vmem:[#allocation2 + $0x444] sm:$0xf]  ;;  %v7168_v46 = vld [vmem:[#allocation2 + $0x448] sm:$0xf0] }
 0x550   :  { %4745 = vmatpush.bf16.msra.mxu3 %v7101_v36  ;;  %4239 = vmatpush.bf16.msrb.mxu1 %v6847_v37  ;;  %v7113_v36 = vor.u32 %v7675_v60, %v7110_v57  ;;  %v7018_v37 = vld [vmem:[#allocation2 + $0x320] sm:$0xf]  ;;  %v7693_v60 = vld [vmem:[#allocation2 + $0x464] sm:$0xf]  ;;  %v7184_v57 = vld [vmem:[#allocation2 + $0x468] sm:$0xf0] }
 0x551   :  { %4436 = vmatpush.bf16.msra.mxu2 %v6933_v16  ;;  %v7102_v16 = vld [vmem:[#allocation2 + $0x3c8] sm:$0xf0]  ;;  %v7019_v48 = vor.u32 %v7654_v20, %v7018_v37  ;;  %v7176_v37 = vld [vmem:[#allocation2 + $0x458] sm:$0xf0] }
 0x552   :  { %4602 = vmatpush.bf16.msrb.mxu0 %v7031_v50  ;;  %v7097_v50 = vor.u32 %v7671_v30, %v7094_v6  ;;  %v7706_v30 = vld [vmem:[#allocation2 + $0x4c4] sm:$0xf0] }
 0x553   :  { %v7678_v6 = vld [vmem:[#allocation2 + $0x3e4] sm:$0xf0] }
 0x554   :  { %4746 = vmatpush.bf16.msra.mxu3 %v7093_v41  ;;  %4240 = vmatpush.bf16.msrb.mxu1 %v6839_v43  ;;  %v7662_v41 = vld [vmem:[#allocation2 + $0x364] sm:$0xf0]  ;;  %v7652_v43 = vld [vmem:[#allocation2 + $0x314] sm:$0xf0] }
 0x555   :  { %4437 = vmatpush.bf16.msra.mxu2 %v6925_v33  ;;  %v7010_v33 = vld [vmem:[#allocation2 + $0x310] sm:$0xf]  ;;  %v7053_v3 = vor.u32 %v7662_v41, %v7052_v51  ;;  %v7644_v41 = vld [vmem:[#allocation2 + $0x2d4] sm:$0xf0] }
 0x556   :  { %4603 = vmatpush.bf16.msrb.mxu0 %v7023_v32  ;;  %v7011_v13 = vor.u32 %v7652_v43, %v7010_v33  ;;  %v7667_v32 = vld [vmem:[#allocation2 + $0x394] sm:$0xf]  ;;  %v6978_v51 = vld [vmem:[#allocation2 + $0x2d0] sm:$0xf]  ;;  %v7661_v43 = vld [vmem:[#allocation2 + $0x364] sm:$0xf] }
 0x557   :  { %7048 = vmatmul.msk.bf16.vlgmr.msrb.gmra.mxu3 %vm3748_vm7, %v4480_v42  ;;  %v7081_v21 = vor.u32 %v7667_v32, %v7078_v34  ;;  %v6979_v31 = vor.u32 %v7644_v41, %v6978_v51  ;;  %v7258_v32 = vld [vmem:[#allocation2 + $0x4f8] sm:$0xf0]  ;;  %v7685_v34 = vld [vmem:[#allocation2 + $0x424] sm:$0xf] }
 0x558   :  { %4747 = vmatpush.bf16.msra.mxu3 %v7085_v14  ;;  %4241 = vmatpush.bf16.msrb.mxu1 %v6831_v17  ;;  %v7256_v14 = vld [vmem:[#allocation2 + $0x4f0] sm:$0xf]  ;;  %v4648_v17 = vrot.slane %v10604_v47, 2 }
 0x559   :  { %4438 = vmatpush.bf16.msra.mxu2 %v6917_v29  ;;  %6975 = vmatmul.msk.bf16.vlgmr.msra.gmra.mxu0 %vm3748_vm7, %v10614_v26  ;;  %v7086_v29 = vld [vmem:[#allocation2 + $0x3a8] sm:$0xf0] }
 0x55a   :  { %4604 = vmatpush.bf16.msrb.mxu0 %v7015_v1  ;;  %v7089_v59 = vor.u32 %v7669_v18, %v7086_v29  ;;  %v7665_v1 = vld [vmem:[#allocation2 + $0x384] sm:$0xf]  ;;  %v7687_v18 = vld [vmem:[#allocation2 + $0x434] sm:$0xf]  ;;  %v7160_v29 = vld [vmem:[#allocation2 + $0x438] sm:$0xf0] }
 0x55b   :  { %4242 = vmatmul.bf16.vlgmr.msrb.gmra.mxu1 %v4138_v11  ;;  %v7105_v11 = vor.u32 %v7673_v63, %v7102_v16  ;;  %v7187_v63 = vor.u32 %v7693_v60, %v7184_v57  ;;  %v7691_v16 = vld [vmem:[#allocation2 + $0x454] sm:$0xf]  ;;  %v4649_v60 = vrot.slane %v10614_v26, 2  ;;  %v7709_v57 = vld [vmem:[#allocation2 + $0x4e4] sm:$0xf] }
 0x55c   :  { %4426 = vmatpush.bf16.msra.mxu1 %v6969_v38  ;;  %4748 = vmatpush.bf16.msra.mxu3 %v7077_v55  ;;  %v7257_v38 = vor.u32 %v7712_v53, %v7256_v14  ;;  %v7248_v55 = vld [vmem:[#allocation2 + $0x4e0] sm:$0xf]  ;;  %v7171_v53 = vor.u32 %v7689_v27, %v7168_v46  ;;  %v7686_v46 = vld [vmem:[#allocation2 + $0x424] sm:$0xf0] }
 0x55d   :  { %4439 = vmatpush.bf16.msra.mxu2 %v6909_v25  ;;  %v7710_v25 = vld [vmem:[#allocation2 + $0x4e4] sm:$0xf0]  ;;  %v7150_v27 = vld [vmem:[#allocation2 + $0x420] sm:$0xf] }
 0x55e   :  { %4605 = vmatpush.bf16.msrb.mxu0 %v7007_v10  ;;  %v7249_v24 = vor.u32 %v7710_v25, %v7248_v55  ;;  %v7663_v10 = vld [vmem:[#allocation2 + $0x374] sm:$0xf]  ;;  %v7152_v25 = vld [vmem:[#allocation2 + $0x428] sm:$0xf0] }
 0x560   :  { %4575 = vmatpush.bf16.msrb.mxu1 %v7035_v52  ;;  %4440 = vmatmul.bf16.vlgmr.msra.gmra.mxu2 %v10604_v47  ;;  %v6983_v52 = vor.u32 %v7643_v12, %v6980_v35 }
 0x561   :  { %4621 = vmatpush.bf16.msrb.mxu2 %v7047_v9  ;;  %4749 = vmatpush.bf16.msra.mxu3 %v7069_v15  ;;  %v7121_v9 = vor.u32 %v7677_v19, %v7118_v56  ;;  %v7070_v15 = vld [vmem:[#allocation2 + $0x388] sm:$0xf0]  ;;  %v7174_v19 = vld [vmem:[#allocation2 + $0x450] sm:$0xf]  ;;  %v7692_v56 = vld [vmem:[#allocation2 + $0x454] sm:$0xf0] }
 0x562   :  { %4606 = vmatpush.bf16.msrb.mxu0 %v6999_v0  ;;  %v7073_v20 = vor.u32 %v7665_v1, %v7070_v15  ;;  %v7054_v0 = vld [vmem:[#allocation2 + $0x368] sm:$0xf0]  ;;  %v7166_v1 = vld [vmem:[#allocation2 + $0x440] sm:$0xf]  ;;  %v7683_v15 = vld [vmem:[#allocation2 + $0x414] sm:$0xf] }
 0x563   :  { %v7057_v12 = vor.u32 %v7661_v43, %v7054_v0  ;;  %v7679_v0 = vld [vmem:[#allocation2 + $0x3f4] sm:$0xf] }
 0x564   :  { %4576 = vmatpush.bf16.msrb.mxu1 %v7027_v61  ;;  %v7646_v61 = vld [vmem:[#allocation2 + $0x2e4] sm:$0xf0] }
 0x565   :  { %4770 = vmatpush.bf16.msra.mxu2 %v7113_v36  ;;  %4750 = vmatpush.bf16.msra.mxu3 %v7061_v5  ;;  %v7240_v36 = vld [vmem:[#allocation2 + $0x4d0] sm:$0xf]  ;;  %v6987_v22 = vor.u32 %v7646_v61, %v6986_v2  ;;  %v7062_v5 = vld [vmem:[#allocation2 + $0x378] sm:$0xf0]  ;;  %v7700_v2 = vld [vmem:[#allocation2 + $0x494] sm:$0xf0] }
 0x566   :  { %4607 = vmatpush.bf16.msrb.mxu0 %v6991_v4  ;;  %v7241_v40 = vor.u32 %v7708_v45, %v7240_v36  ;;  %v7065_v33 = vor.u32 %v7663_v10, %v7062_v5  ;;  %v7704_v4 = vld [vmem:[#allocation2 + $0x4b4] sm:$0xf0]  ;;  %v7217_v36 = vor.u32 %v7702_v7, %v7216_v23  ;;  %v7208_v45 = vld [vmem:[#allocation2 + $0x490] sm:$0xf]  ;;  %v7699_v23 = vld [vmem:[#allocation2 + $0x494] sm:$0xf] }
 0x567   :  { %v7225_v55 = vor.u32 %v7704_v4, %v7224_v49  ;;  %v7688_v10 = vld [vmem:[#allocation2 + $0x434] sm:$0xf0]  ;;  %v7209_v5 = vor.u32 %v7700_v2, %v7208_v45  ;;  %v7210_v7 = vld [vmem:[#allocation2 + $0x498] sm:$0xf0] }
 0x568   :  { %4577 = vmatpush.bf16.msrb.mxu1 %v7019_v48  ;;  %v7116_v48 = vld [vmem:[#allocation2 + $0x3e0] sm:$0xf]  ;;  %v7684_v49 = vld [vmem:[#allocation2 + $0x414] sm:$0xf0] }
 0x569   :  { %4771 = vmatpush.bf16.msra.mxu2 %v7105_v11  ;;  %4751 = vmatpush.bf16.msra.mxu3 %v7053_v3  ;;  %v7232_v11 = vld [vmem:[#allocation2 + $0x4c0] sm:$0xf]  ;;  %v7117_v14 = vor.u32 %v7678_v6, %v7116_v48  ;;  %v7234_v48 = vld [vmem:[#allocation2 + $0x4c8] sm:$0xf0]  ;;  %v4987_v6 = vunpack.c.l.b16 %v10565_v62 }
 0x56a   :  { %4608 = vmatpush.bf16.msrb.mxu0 %v6983_v52  ;;  %v7233_v39 = vor.u32 %v7706_v30, %v7232_v11  ;;  %v7182_v3 = vld [vmem:[#allocation2 + $0x460] sm:$0xf]  ;;  %v7136_v11 = vld [vmem:[#allocation2 + $0x408] sm:$0xf0]  ;;  %v7698_v30 = vld [vmem:[#allocation2 + $0x484] sm:$0xf0] }
 0x56b   :  { %6974 = vmatmul.msk.bf16.vlgmr.msra.gmra.mxu1 %vm3748_vm7, %v10614_v26  ;;  %v7697_v26 = vld [vmem:[#allocation2 + $0x484] sm:$0xf] }
 0x56c   :  { %4578 = vmatpush.bf16.msrb.mxu1 %v7011_v13  ;;  %4752 = vmatmul.bf16.vlgmr.msra.gmra.mxu3 %v4648_v17  ;;  %v7192_v13 = vld [vmem:[#allocation2 + $0x478] sm:$0xf0] }
 0x56d   :  { %4772 = vmatpush.bf16.msra.mxu2 %v7097_v50  ;;  %4933 = vmatpush.bf16.msrb.mxu3 %v7191_v8  ;;  %v7694_v50 = vld [vmem:[#allocation2 + $0x464] sm:$0xf0]  ;;  %v7695_v8 = vld [vmem:[#allocation2 + $0x474] sm:$0xf] }
 0x56e   :  { %4790 = vmatpush.bf16.msra.mxu0 %v7121_v9  ;;  %v7183_v35 = vor.u32 %v7694_v50, %v7182_v3  ;;  %v7175_v9 = vor.u32 %v7692_v56, %v7174_v19  ;;  %v7713_v3 = vld [vmem:[#allocation2 + $0x504] sm:$0xf]  ;;  %v7266_v50 = vld [vmem:[#allocation2 + $0x508] sm:$0xf0]  ;;  %v7134_v56 = vld [vmem:[#allocation2 + $0x400] sm:$0xf] }
 0x56f   :  { %4609 = vmatmul.bf16.vlgmr.msrb.gmra.mxu0 %v4479_v28  ;;  %v7218_v19 = vld [vmem:[#allocation2 + $0x4a8] sm:$0xf0] }
 0x570   :  { %4579 = vmatpush.bf16.msrb.mxu1 %v7003_v44  ;;  %7049 = vmatmul.msk.bf16.vlgmr.msrb.gmra.mxu2 %vm3748_vm7, %v4480_v42  ;;  %v7179_v42 = vor.u32 %v7691_v16, %v7176_v37  ;;  %v7163_v44 = vor.u32 %v7687_v18, %v7160_v29  ;;  %v7707_v16 = vld [vmem:[#allocation2 + $0x4d4] sm:$0xf]  ;;  %v7242_v37 = vld [vmem:[#allocation2 + $0x4d8] sm:$0xf0]  ;;  %v4989_v18 = vpack.c.b16 %v4987_v6, %v4987_v6  ;;  %v7142_v29 = vld [vmem:[#allocation2 + $0x410] sm:$0xf] }
 0x571   :  { %5085 = vmatpush.bf16.msra.mxu3 %v7257_v38  ;;  %4773 = vmatpush.bf16.msra.mxu2 %v7089_v59  ;;  %v7195_v38 = vor.u32 %v7695_v8, %v7192_v13  ;;  %v7711_v59 = vld [vmem:[#allocation2 + $0x4f4] sm:$0xf]  ;;  %v7245_v51 = vor.u32 %v7707_v16, %v7242_v37  ;;  %v7226_v13 = vld [vmem:[#allocation2 + $0x4b8] sm:$0xf0] }
 0x572   :  { %4939 = vmatpush.bf16.msrb.mxu0 %v7187_v63  ;;  %v7261_v52 = vor.u32 %v7711_v59, %v7258_v32  ;;  %v4817_v59 = vrot.slane %v10604_v47, 3  ;;  %v7701_v32 = vld [vmem:[#allocation2 + $0x4a4] sm:$0xf]  ;;  %v7126_v47 = vld [vmem:[#allocation2 + $0x3f0] sm:$0xf] }
 0x574   :  { %4580 = vmatpush.bf16.msrb.mxu1 %v6995_v58  ;;  %v7155_v58 = vor.u32 %v7685_v34, %v7152_v25  ;;  %v7221_v34 = vor.u32 %v7701_v32, %v7218_v19 }
 0x575   :  { %4774 = vmatpush.bf16.msra.mxu2 %v7081_v21  ;;  %5086 = vmatpush.bf16.msra.mxu3 %v7249_v24  ;;  %v7250_v21 = vld [vmem:[#allocation2 + $0x4e8] sm:$0xf0]  ;;  %v7690_v24 = vld [vmem:[#allocation2 + $0x444] sm:$0xf0] }
 0x576   :  { %4940 = vmatpush.bf16.msrb.mxu0 %v7179_v42  ;;  %v7253_v61 = vor.u32 %v7709_v57, %v7250_v21  ;;  %v7167_v63 = vor.u32 %v7690_v24, %v7166_v1  ;;  %v7705_v42 = vld [vmem:[#allocation2 + $0x4c4] sm:$0xf]  ;;  %v7213_v57 = vor.u32 %v7699_v23, %v7210_v7  ;;  %v7202_v1 = vld [vmem:[#allocation2 + $0x488] sm:$0xf0] }
 0x577   :  { %v7205_v24 = vor.u32 %v7697_v26, %v7202_v1 }
 0x578   :  { %4581 = vmatpush.bf16.msrb.mxu1 %v6987_v22  ;;  %v7681_v22 = vld [vmem:[#allocation2 + $0x404] sm:$0xf] }
 0x579   :  { %4775 = vmatpush.bf16.msra.mxu2 %v7073_v20  ;;  %5087 = vmatpush.bf16.msra.mxu3 %v7241_v40  ;;  %v7158_v20 = vld [vmem:[#allocation2 + $0x430] sm:$0xf] }
 0x57a   :  { %4941 = vmatpush.bf16.msrb.mxu0 %v7171_v53  ;;  %v7159_v41 = vor.u32 %v7688_v10, %v7158_v20  ;;  %v7703_v53 = vld [vmem:[#allocation2 + $0x4b4] sm:$0xf] }
 0x57c   :  { %4582 = vmatpush.bf16.msrb.mxu1 %v6979_v31  ;;  %7196 = vmatmul.msk.bf16.vlgmr.msrb.gmra.mxu3 %vm3748_vm7, %v4818_v54  ;;  %v7237_v31 = vor.u32 %v7705_v42, %v7234_v48 }
 0x57d   :  { %4776 = vmatpush.bf16.msra.mxu2 %v7065_v33  ;;  %5088 = vmatpush.bf16.msra.mxu3 %v7233_v39  ;;  %v7139_v33 = vor.u32 %v7681_v22, %v7136_v11  ;;  %v7128_v39 = vld [vmem:[#allocation2 + $0x3f8] sm:$0xf0] }
 0x57e   :  { %4942 = vmatpush.bf16.msrb.mxu0 %v7163_v44  ;;  %v7131_v4 = vor.u32 %v7679_v0, %v7128_v39  ;;  %v7682_v44 = vld [vmem:[#allocation2 + $0x404] sm:$0xf0] }
 0x57f   :  { %4583 = vmatmul.bf16.vlgmr.msrb.gmra.mxu1 %v4479_v28  ;;  %v7144_v28 = vld [vmem:[#allocation2 + $0x418] sm:$0xf0]  ;;  %7123 = vmatmul.msk.bf16.vlgmr.msra.gmra.mxu0 %vm3748_vm7, %v4649_v60  ;;  %v7135_v25 = vor.u32 %v7682_v44, %v7134_v56 }
 0x580   :  { %4764 = vmatpush.bf16.msra.mxu1 %v7117_v14  ;;  %v7147_v40 = vor.u32 %v7683_v15, %v7144_v28  ;;  %v7151_v14 = vor.u32 %v7686_v46, %v7150_v27  ;;  %v4988_v15 = vunpack.c.h.b16 %v10565_v62 }
 0x581   :  { %4777 = vmatpush.bf16.msra.mxu2 %v7057_v12  ;;  %5089 = vmatpush.bf16.msra.mxu3 %v7225_v55  ;;  %v7269_v12 = vor.u32 %v7713_v3, %v7266_v50 }
 0x582   :  { %4943 = vmatpush.bf16.msrb.mxu0 %v7155_v58  ;;  %v3774_v8 = vpop.f32.mrf.mxu3  ;;  %v4990_v2 = vpack.c.b16 %v4988_v15, %v4988_v15 }
 0x584   :  { %4913 = vmatpush.bf16.msrb.mxu1 %v7183_v35  ;;  %4778 = vmatmul.bf16.vlgmr.msra.gmra.mxu2 %v4648_v17  ;;  %v7200_v17 = vld [vmem:[#allocation2 + $0x480] sm:$0xf]  ;;  %v7229_v35 = vor.u32 %v7703_v53, %v7226_v13 }
 0x585   :  { %4959 = vmatpush.bf16.msrb.mxu2 %v7195_v38  ;;  %5090 = vmatpush.bf16.msra.mxu3 %v7217_v36  ;;  %v7201_v43 = vor.u32 %v7698_v30, %v7200_v17  ;;  %v7143_v38 = vor.u32 %v7684_v49, %v7142_v29 }
 0x586   :  { %4944 = vmatpush.bf16.msrb.mxu0 %v7147_v40 }
 0x588   :  { %4914 = vmatpush.bf16.msrb.mxu1 %v7175_v9  ;;  %v7264_v9 = vld [vmem:[#allocation2 + $0x500] sm:$0xf] }
 0x589   :  { %5111 = vmatpush.bf16.msra.mxu2 %v7261_v52  ;;  %5091 = vmatpush.bf16.msra.mxu3 %v7209_v5  ;;  %v7680_v52 = vld [vmem:[#allocation2 + $0x3f4] sm:$0xf0] }
 0x58a   :  { %4945 = vmatpush.bf16.msrb.mxu0 %v7139_v33  ;;  %v3776_v55 = vpop.f32.mrf.mxu3  ;;  %v7127_v21 = vor.u32 %v7680_v52, %v7126_v47 }
 0x58c   :  { %4915 = vmatpush.bf16.msrb.mxu1 %v7167_v63 }
 0x58d   :  { %5112 = vmatpush.bf16.msra.mxu2 %v7253_v61  ;;  %5092 = vmatpush.bf16.msra.mxu3 %v7201_v43 }
 0x58e   :  { %4946 = vmatpush.bf16.msrb.mxu0 %v7131_v4 }
 0x58f   :  { %7122 = vmatmul.msk.bf16.vlgmr.msra.gmra.mxu1 %vm3748_vm7, %v4649_v60  ;;  %v7714_v60 = vld [vmem:[#allocation2 + $0x504] sm:$0xf0] }
 0x590   :  { %4916 = vmatpush.bf16.msrb.mxu1 %v7159_v41  ;;  %5093 = vmatmul.bf16.vlgmr.msra.gmra.mxu3 %v4989_v18 }
 0x591   :  { %5113 = vmatpush.bf16.msra.mxu2 %v7245_v51  ;;  %4947 = vmatmul.bf16.vlgmr.msrb.gmra.mxu0 %v4817_v59 }
 0x592   :  { %5131 = vmatpush.bf16.msra.mxu0 %v7269_v12  ;;  %v3920_v58 = vpop.f32.mrf.mxu3 }
 0x594   :  { %4917 = vmatpush.bf16.msrb.mxu1 %v7151_v14  ;;  %7197 = vmatmul.msk.bf16.vlgmr.msrb.gmra.mxu2 %vm3748_vm7, %v4818_v54  ;;  %v7265_v54 = vor.u32 %v7714_v60, %v7264_v9  ;;  %v3761_v36 = vpop.f32.mrf.mxu1 }
 0x595   :  { %5114 = vmatpush.bf16.msra.mxu2 %v7237_v31  ;;  %v3775_v28 = vadd.f32 %v3774_v8, %v3761_v36 }
 0x596   :  { %v3907_v45 = vpop.f32.mrf.mxu0 }
 0x597   :  { %v3908_v61 = vadd.f32 %v3907_v45, %v3775_v28 }
 0x598   :  { %4918 = vmatpush.bf16.msrb.mxu1 %v7143_v38 }
 0x599   :  { %5115 = vmatpush.bf16.msra.mxu2 %v7229_v35  ;;  %v3921_v63 = vadd.f32 %v3920_v58, %v3908_v61 }
 0x59a   :  { %v3922_v16 = vpop.f32.mrf.mxu3 }
 0x59c   :  { %4919 = vmatpush.bf16.msrb.mxu1 %v7135_v25  ;;  %v3763_v20 = vpop.f32.mrf.mxu1 }
 0x59d   :  { %5116 = vmatpush.bf16.msra.mxu2 %v7221_v34  ;;  %v3787_v37 = vpop.f32.mrf.mxu2 }
 0x59e   :  { %v3909_v10 = vpop.f32.mrf.mxu0 }
 0x5a0   :  { %4920 = vmatpush.bf16.msrb.mxu1 %v7127_v21 }
 0x5a1   :  { %5117 = vmatpush.bf16.msra.mxu2 %v7213_v57  ;;  %7271 = vmatmul.msk.bf16.vlgmr.msra.gmra.mxu0 %vm3748_vm7, %v4990_v2 }
 0x5a3   :  { %4921 = vmatmul.bf16.vlgmr.msrb.gmra.mxu1 %v4817_v59 }
 0x5a4   :  { %5105 = vmatpush.bf16.msra.mxu1 %v7265_v54  ;;  %v3800_v22 = vpop.f32.mrf.mxu1 }
 0x5a5   :  { %5118 = vmatpush.bf16.msra.mxu2 %v7205_v24  ;;  %v3789_v40 = vpop.f32.mrf.mxu2  ;;  %v3801_v5 = vadd.f32 %v3800_v22, %v3787_v37 }
 0x5a6   :  { %v4074_v62 = vpop.f32.mrf.mxu3  ;;  %v4087_v11 = vpop.f32.mrf.mxu0 }
 0x5a7   :  { %v4088_v17 = vadd.f32 %v4087_v11, %v4074_v62 }
 0x5a8   :  { %5119 = vmatmul.bf16.vlgmr.msra.gmra.mxu2 %v4989_v18 }
 0x5a9   :  { %v4117_v30 = vadd.f32 %v4088_v17, %v3921_v63 }
 0x5ac   :  { %v3802_v41 = vpop.f32.mrf.mxu1 }
 0x5ad   :  { %v3946_v51 = vpop.f32.mrf.mxu2 }
 0x5ae   :  { %v4089_v42 = vpop.f32.mrf.mxu0  ;;  %v4076_v48 = vpop.f32.mrf.mxu3 }
 0x5b3   :  { %7270 = vmatmul.msk.bf16.vlgmr.msra.gmra.mxu1 %vm3748_vm7, %v4990_v2 }
 0x5b5   :  { %v3948_v6 = vpop.f32.mrf.mxu2 }
 0x5b6   :  { %v4256_v46 = vpop.f32.mrf.mxu3  ;;  %v4113_v43 = vpop.f32.mrf.mxu0 }
 0x5b8   :  { %v3933_v27 = vpop.f32.mrf.mxu1 }
 0x5b9   :  { %v3934_v33 = vadd.f32 %v3933_v27, %v3801_v5 }
 0x5bb   :  { %v3947_v0 = vadd.f32 %v3946_v51, %v3934_v33 }
 0x5be   :  { %v4258_v50 = vpop.f32.mrf.mxu3  ;;  %v4115_v14 = vpop.f32.mrf.mxu0 }
 0x5c0   :  { %v3935_v3 = vpop.f32.mrf.mxu1 }
 0x5c1   :  { %v4100_v39 = vpop.f32.mrf.mxu2 }
 0x5c2   :  { %v4114_v31 = vadd.f32 %v4113_v43, %v4100_v39 }
 0x5c4   :  { %v4118_v8 = vadd.f32 %v4114_v31, %v3947_v0  ;;  %v5139_v0 = vld [vmem:[%s10669_s6] sm:$0x3] }
 0x5c6   :  { %v4269_v18 = vpop.f32.mrf.mxu0 }
 0x5c9   :  { %v4102_v53 = vpop.f32.mrf.mxu2 }
 0x5ca   :  { %v4415_v13 = vpop.f32.mrf.mxu3 }
 0x5ce   :  { %v4271_v35 = vpop.f32.mrf.mxu0 }
 0x5d1   :  { %v4282_v29 = vpop.f32.mrf.mxu2 }
 0x5d2   :  { %v4283_v49 = vadd.f32 %v4282_v29, %v4269_v18  ;;  %v4417_v4 = vpop.f32.mrf.mxu3 }
 0x5d3   :  { %v5149_v4 = vld [vmem:[%s10670_s7] sm:$0x3] }
 0x5d4   :  { %v4287_v12 = vadd.f32 %v4283_v49, %v4118_v8  ;;  %v5142_v8 = vperm.slane %v5139_v0, 1 }
 0x5d6   :  { %v4454_v44 = vpop.f32.mrf.mxu0 }
 0x5d8   :  { %v4243_v38 = vpop.f32.mrf.mxu1 }
 0x5d9   :  { %v4257_v59 = vadd.f32 %v4256_v46, %v4243_v38  ;;  %v4284_v32 = vpop.f32.mrf.mxu2  ;;  %v5141_v38 = vperm.slane %v5139_v0, 0 }
 0x5da   :  { %v4597_v56 = vpop.f32.mrf.mxu3 }
 0x5db   :  { %v4286_v19 = vadd.f32 %v4257_v59, %v4117_v30 }
 0x5de   :  { %v4456_v47 = vpop.f32.mrf.mxu0 }
 0x5e0   :  { %v4245_v34 = vpop.f32.mrf.mxu1 }
 0x5e1   :  { %v5151_v34 = vperm.slane %v5149_v4, 0 }
 0x5e2   :  { %v4599_v23 = vpop.f32.mrf.mxu3 }
 0x5e3   :  { %v4441_v55 = vpop.f32.mrf.mxu2 }
 0x5e4   :  { %v4455_v25 = vadd.f32 %v4454_v44, %v4441_v55 }
 0x5e6   :  { %v4459_v7 = vadd.f32 %v4455_v25, %v4287_v12 }
 0x5e8   :  { %v4428_v52 = vpop.f32.mrf.mxu1 }
 0x5e9   :  { %v4429_v9 = vadd.f32 %v4428_v52, %v4415_v13 }
 0x5eb   :  { %v4443_v60 = vpop.f32.mrf.mxu2  ;;  %v4458_v57 = vadd.f32 %v4429_v9, %v4286_v19 }
 0x5ec   :  { %v4610_v26 = vpop.f32.mrf.mxu0  ;;  %v7715_v60 = vld [vmem:[#allocation4] ss:$0 sm:$0xff] }
 0x5ef   :  { %v4753_v21 = vpop.f32.mrf.mxu3 }
 0x5f0   :  { %v4430_v1 = vpop.f32.mrf.mxu1 }
 0x5f3   :  { %v4623_v54 = vpop.f32.mrf.mxu2 }
 0x5f4   :  { %v4612_v58 = vpop.f32.mrf.mxu0  ;;  %v4624_v42 = vadd.f32 %v4623_v54, %v4610_v26 }
 0x5f6   :  { %v4628_v27 = vadd.f32 %v4624_v42, %v4459_v7 }
 0x5f7   :  { %v4755_v24 = vpop.f32.mrf.mxu3 }
 0x5fb   :  { %v4625_v28 = vpop.f32.mrf.mxu2 }
 0x5fc   :  { %v4584_v15 = vpop.f32.mrf.mxu1  ;;  %v4792_v2 = vpop.f32.mrf.mxu0 }
 0x5fd   :  { %v4598_v36 = vadd.f32 %v4597_v56, %v4584_v15  ;;  %v5152_v56 = vperm.slane %v5149_v4, 1 }
 0x5ff   :  { %v4627_v45 = vadd.f32 %v4598_v36, %v4458_v57  ;;  %v4935_v61 = vpop.f32.mrf.mxu3 }
 0x604   :  { %v4586_v63 = vpop.f32.mrf.mxu1  ;;  %v4794_v37 = vpop.f32.mrf.mxu0 }
 0x607   :  { %v4779_v16 = vpop.f32.mrf.mxu2  ;;  %v4937_v20 = vpop.f32.mrf.mxu3 }
 0x608   :  { %v4793_v48 = vadd.f32 %v4792_v2, %v4779_v16 }
 0x60a   :  { %v4797_v33 = vadd.f32 %v4793_v48, %v4628_v27 }
 0x60c   :  { %v4766_v10 = vpop.f32.mrf.mxu1 }
 0x60d   :  { %v4767_v50 = vadd.f32 %v4766_v10, %v4753_v21 }
 0x60e   :  { %v4948_v22 = vpop.f32.mrf.mxu0 }
 0x60f   :  { %v4781_v40 = vpop.f32.mrf.mxu2  ;;  %v4796_v18 = vadd.f32 %v4767_v50, %v4627_v45 }
 0x613   :  { %v5094_v5 = vpop.f32.mrf.mxu3 }
 0x614   :  { %v4768_v62 = vpop.f32.mrf.mxu1 }
 0x616   :  { %v4950_v17 = vpop.f32.mrf.mxu0 }
 0x617   :  { %v4961_v11 = vpop.f32.mrf.mxu2 }
 0x618   :  { %v4962_v46 = vadd.f32 %v4961_v11, %v4948_v22 }
 0x61a   :  { %v4966_v31 = vadd.f32 %v4962_v46, %v4797_v33 }
 0x61b   :  { %v5096_v30 = vpop.f32.mrf.mxu3 }
 0x61e   :  { %v5133_v6 = vpop.f32.mrf.mxu0 }
 0x61f   :  { %v4963_v41 = vpop.f32.mrf.mxu2 }
 0x620   :  { %v4922_v51 = vpop.f32.mrf.mxu1 }
 0x621   :  { %v4936_v53 = vadd.f32 %v4935_v61, %v4922_v51 }
 0x623   :  { %v4965_v12 = vadd.f32 %v4936_v53, %v4796_v18 }
 0x626   :  { %v5135_v13 = vpop.f32.mrf.mxu0 }
 0x628   :  { %v4924_v43 = vpop.f32.mrf.mxu1 }
 0x62b   :  { %v5120_v39 = vpop.f32.mrf.mxu2 }
 0x62c   :  { %v5134_v3 = vadd.f32 %v5133_v6, %v5120_v39 }
 0x62e   :  { %v5138_v14 = vadd.f32 %v5134_v3, %v4966_v31 }
 0x630   :  { %v5146_v29 = vadd.f32 %v5142_v8, %v5138_v14  ;;  %v5107_v49 = vpop.f32.mrf.mxu1 }
 0x631   :  { %v5108_v35 = vadd.f32 %v5107_v49, %v5094_v5 }
 0x632   :  { %v5148_v19 = vmax.f32 %v5146_v29, 0.0 }
 0x633   :  { %v5122_v59 = vpop.f32.mrf.mxu2  ;;  %v5137_v32 = vadd.f32 %v5108_v35, %v4965_v12 }
 0x634   :  { %v5156_v25 = vmul.f32 %v5152_v56, %v5148_v19 }
 0x635   :  { %v5145_v44 = vadd.f32 %v5141_v38, %v5137_v32 }
 0x636   :  { %v5159_v52 = vsel %vm5157_vm8, %v5156_v25, 0.0 }
 0x637   :  { %v5147_v55 = vmax.f32 %v5145_v44, 0.0 }
 0x638   :  { %v5109_v23 = vpop.f32.mrf.mxu1 }
 0x639   :  { %v5155_v7 = vmul.f32 %v5151_v34, %v5147_v55 }
 0x63b   :  { %v5158_v47 = vsel %vm5157_vm8, %v5155_v7, 0.0 }
 0x63c   :  { %v5160_v9 = vadd.f32 %v5159_v52, %v5158_v47 }
 0x63e   :  { %5161 = vadd.xlane.f32.xlu0 %v5160_v9 }
 0x6b1   :  { %v5162_v57 = vpop.xlane.xlu0 %5161 }
 0x6b2   :  { %v5167_v21 = vadd.f32 %v7715_v60, %v5162_v57 }
 0x6b4   :  { %v5168_v26 = vsub.f32 0.0, %v5167_v21 }
 0x6b6   :  { %v5169_v1 = vmul.f32 1.442695, %v5168_v26 }
 0x6b8   :  { %7716 = vpow2.f32 %v5169_v1 }
 0x6be   :  { %v7717_v54 = vpop.eup %7716 }
 0x6bf   :  { %v5171_v24 = vadd.f32 1.0, %v7717_v54 }
 0x6c1   :  { %7718 = vrcp.f32 %v5171_v24  ;;  %v5183_v28 = vand.u32 2147483648, %v5171_v24  ;;  %v5181_v2 = vand.u32 2147483647, %v5171_v24  ;;  %vm5177_vm10 = vweird.f32 %v5171_v24 }
 0x6c3   :  { %v5184_v63 = vor.u32 1.1754944e-38, %v5183_v28  ;;  %vm5182_vm13 = vcmp.eq.f32.partialorder %v5181_v2, 8.507059e+37 }
 0x6c7   :  { %v7719_v58 = vpop.eup %7718 }
 0x6c8   :  { %v5173_v15 = vmul.f32 %v7719_v58, %v5171_v24  ;;  %vm5178_vm9 = vweird.f32 %v7719_v58 }
 0x6c9   :  { %vm5179_vm11 = vmor %vm5177_vm10, %vm5178_vm9 }
 0x6ca   :  { %v5174_v36 = vsub.f32 1.0, %v5173_v15 }
 0x6cc   :  { %v5175_v45 = vmul.f32 %v7719_v58, %v5174_v36 }
 0x6ce   :  { %v5176_v61 = vadd.f32 %v7719_v58, %v5175_v45 }
 0x6d0   :  { %v5180_v16 = vsel %vm5179_vm11, %v7719_v58, %v5176_v61 }
 0x6d1   :  { %v5185_v37 = vsel %vm5182_vm13, %v5184_v63, %v5180_v16 }
 0x6d2   :  { %5188 = vst.msk [vmem:[%s10672_s9] sm:$0x3] %vm5187_vm12, %v5185_v37 }
 0x6d3   :  { %5193 = vsyncmov [#allocation3] }
 0x6d6   :  { %s5194_s16 = vpop.sfrf %5193 }
 0x6d7   :  { %p7272_p0 = scmp.ne.s32.totalorder %s5194_s16, 0 }
 0x6d9   :  { %5198 = shalt.err (%p7272_p0)  }

</bundles_post_ra>
